<compile_context>
chip_gen: v7x
topology: tpu7x:2x2x1
jax: 0.10.0
libtpu: 0.0.40
codegen_flags: <defaults>
</compile_context>

<pallas_src>
import functools

import jax
import jax.numpy as jnp
from jax.experimental import pallas as pl
from jax.experimental.pallas import tpu as pltpu


# ----------------------------------------------------------------------------
# Small helpers
# ----------------------------------------------------------------------------
def _round_up(x, m):
    return ((x + m - 1) // m) * m


def _pick_tile_m(M, cap=512):
    """Largest multiple-of-8 divisor of M that is <= min(cap, max(8, M//4)).

    Dividing M exactly means the wrapper never pads the activation (no extra
    HBM copy); targeting >= 4 grid steps keeps both v7x cores and the
    double-buffer pipeline busy even for small M.
    """
    assert M % 8 == 0, M
    target = min(cap, max(8, M // 4))
    best, d = 8, 8
    while d <= target:
        if M % d == 0:
            best = d
        d += 8
    return best


def _pick_unroll(T, cap=8):
    """Largest divisor of T that is <= cap (time steps unrolled per grid step)."""
    u = 1
    for c in range(2, min(T, cap) + 1):
        if T % c == 0:
            u = c
    return u


def _compiler_params(semantics, vmem_bytes=None):
    kwargs = dict(dimension_semantics=semantics)
    # Only raise the scoped-VMEM limit when the resident weights + double
    # buffers actually need it (v5e default 16 MiB, v6e/v7x 32 MiB); cap well
    # under v7x's 64 MiB physical VMEM.
    if vmem_bytes is not None and vmem_bytes > (16 << 20):
        kwargs["vmem_limit_bytes"] = int(min(vmem_bytes + (2 << 20), 56 << 20))
    return pltpu.CompilerParams(**kwargs)


def _sigmoid(x):
    # sigmoid(x) == 0.5*tanh(0.5*x) + 0.5 : one EUP op + one VPU fma,
    # no exp / exact divide on the recurrence critical path, no overflow.
    return 0.5 * jnp.tanh(0.5 * x) + 0.5


# ----------------------------------------------------------------------------
# Pallas kernels
# ----------------------------------------------------------------------------
def _matmul_bias_kernel(x_ref, w_ref, b_ref, o_ref):
    # x: (tm, K) bf16 ; w: (K, N) bf16 resident ; b: (1, N) f32 ; o: (tm, N)
    acc = jnp.dot(x_ref[...], w_ref[...], preferred_element_type=jnp.float32)
    o_ref[...] = (acc + b_ref[...]).astype(o_ref.dtype)


def _dual_matmul_bias_kernel(h_ref, w_ref, b_ref, o_ref):
    # out = h_fwd @ W_f + h_bwd @ W_b + bias   (fused Linear, no HBM concat)
    acc = jnp.dot(h_ref[0], w_ref[0], preferred_element_type=jnp.float32)
    acc = acc + jnp.dot(h_ref[1], w_ref[1], preferred_element_type=jnp.float32)
    o_ref[...] = (acc + b_ref[...]).astype(o_ref.dtype)


def _bilstm_dir_kernel(xp_ref, whh_ref, hseq_ref, h_s, c_s, *, Hp, U):
    """U unrolled time steps of ONE direction (selected by grid axis 0).

    xp_ref  : (U, Bp, 4Hp) bf16  precomputed x-projection (+ both biases)
    whh_ref : (1, Hp, 4Hp) bf16  recurrent weights of this direction
    hseq_ref: (1, U, Bp, Hp)     hidden-state output slab for this block
    h_s/c_s : (Bp, Hp) f32       VMEM state carried across the time grid axis
    """
    d = pl.program_id(0)   # 0 = forward, 1 = backward
    j = pl.program_id(1)   # time-block index (sequential, in-order)

    @pl.when(j == 0)
    def _():
        h_s[...] = jnp.zeros_like(h_s)
        c_s[...] = jnp.zeros_like(c_s)

    whh = whh_ref[0]       # (Hp, 4Hp) bf16

    def step(u):           # u is a static Python int (unrolled)
        gates = xp_ref[u].astype(jnp.float32) + jnp.dot(
            h_s[...].astype(jnp.bfloat16), whh,
            preferred_element_type=jnp.float32)
        i = _sigmoid(gates[:, 0 * Hp:1 * Hp])
        f = _sigmoid(gates[:, 1 * Hp:2 * Hp])
        g = jnp.tanh(gates[:, 2 * Hp:3 * Hp])
        o = _sigmoid(gates[:, 3 * Hp:4 * Hp])
        c = f * c_s[...] + i * g
        h = o * jnp.tanh(c)
        c_s[...] = c
        h_s[...] = h
        hseq_ref[0, u] = h.astype(hseq_ref.dtype)

    # Static unroll; the only difference between the two directions is the
    # order in which the U time steps inside the block are consumed.
    @pl.when(d == 0)
    def _():
        for u in range(U):
            step(u)

    @pl.when(d == 1)
    def _():
        for u in range(U - 1, -1, -1):
            step(u)


# ----------------------------------------------------------------------------
# pallas_call wrappers
# ----------------------------------------------------------------------------
def matmul_bias(x, w, b, out_dtype, *, cap_tile_m=512):
    """(M, K) @ (K, N) + b ; x, w bf16 lane-dense, b f32; tm divides M."""
    M, K = x.shape
    _, N = w.shape
    tm = _pick_tile_m(M, cap_tile_m)
    vmem = 2 * (tm * K * x.dtype.itemsize + K * N * w.dtype.itemsize
                + N * 4 + tm * N * jnp.dtype(out_dtype).itemsize)
    return pl.pallas_call(
        _matmul_bias_kernel,
        out_shape=jax.ShapeDtypeStruct((M, N), out_dtype),
        grid=(M // tm,),
        in_specs=[
            pl.BlockSpec((tm, K), lambda i: (i, 0)),
            pl.BlockSpec((K, N), lambda i: (0, 0)),    # resident weight
            pl.BlockSpec((1, N), lambda i: (0, 0)),    # resident bias
        ],
        out_specs=pl.BlockSpec((tm, N), lambda i: (i, 0)),
        compiler_params=_compiler_params(("parallel",), vmem),
    )(x, w, b.reshape(1, N))


def dual_linear(h2, w2, b, out_dtype, *, cap_tile_m=512):
    """h2:(2, M, Hp) bf16, w2:(2, Hp, Op) bf16, b:(Op,) f32 ->
       h2[0] @ w2[0] + h2[1] @ w2[1] + b   (fused bidirectional Linear)."""
    _, M, Hp = h2.shape
    Op = w2.shape[-1]
    tm = _pick_tile_m(M, cap_tile_m)
    vmem = 2 * (2 * tm * Hp * h2.dtype.itemsize + 2 * Hp * Op * w2.dtype.itemsize
                + Op * 4 + tm * Op * jnp.dtype(out_dtype).itemsize)
    return pl.pallas_call(
        _dual_matmul_bias_kernel,
        out_shape=jax.ShapeDtypeStruct((M, Op), out_dtype),
        grid=(M // tm,),
        in_specs=[
            pl.BlockSpec((2, tm, Hp), lambda i: (0, i, 0)),
            pl.BlockSpec((2, Hp, Op), lambda i: (0, 0, 0)),   # resident weights
            pl.BlockSpec((1, Op), lambda i: (0, 0)),
        ],
        out_specs=pl.BlockSpec((tm, Op), lambda i: (i, 0)),
        compiler_params=_compiler_params(("parallel",), vmem),
    )(h2, w2, b.reshape(1, Op))


def lstm_recurrence(xproj, whh2, *, T, Bp, Hp):
    """xproj: (T, Bp, 8Hp) bf16  [fwd gates | bwd gates] per time step.
       whh2 : (2, Hp, 4Hp) bf16  recurrent weights (fwd, bwd).

    Returns hseq (2, T, Bp, Hp) bf16: hseq[0] forward, hseq[1] backward hidden
    states at every time step (PyTorch bidirectional LSTM semantics).
    """
    U = _pick_unroll(T)
    Tb = T // U
    G = 4 * Hp
    kernel = functools.partial(_bilstm_dir_kernel, Hp=Hp, U=U)
    return pl.pallas_call(
        kernel,
        out_shape=jax.ShapeDtypeStruct((2, T, Bp, Hp), xproj.dtype),
        grid=(2, Tb),
        in_specs=[
            # U consecutive time steps of this direction's gate half; the
            # backward direction (d=1) walks the time blocks last-to-first.
            pl.BlockSpec((U, Bp, G),
                         lambda d, j: (j + d * (Tb - 1 - 2 * j), 0, d)),
            pl.BlockSpec((1, Hp, G), lambda d, j: (d, 0, 0)),
        ],
        out_specs=pl.BlockSpec((1, U, Bp, Hp),
                               lambda d, j: (d, j + d * (Tb - 1 - 2 * j), 0, 0)),
        scratch_shapes=[pltpu.VMEM((Bp, Hp), jnp.float32),
                        pltpu.VMEM((Bp, Hp), jnp.float32)],
        compiler_params=_compiler_params(("parallel", "arbitrary")),
    )(xproj, whh2)


# ----------------------------------------------------------------------------
# Weight packing (lane-dense per-gate padded layouts) — done once per call
# ----------------------------------------------------------------------------
def _pack_gate_weight(w, H, Hp, Kp):
    """PyTorch (4H, K) -> transposed (Kp, 4Hp); each gate in its own Hp-lane chunk.

    Padded rows/columns stay exactly 0 (required by the padded-lane invariant).
    """
    _, K = w.shape
    out = jnp.zeros((Kp, 4 * Hp), w.dtype)
    for g in range(4):
        out = out.at[:K, g * Hp:g * Hp + H].set(w[g * H:(g + 1) * H, :].T)
    return out


def _pack_gate_bias(b, H, Hp):
    out = jnp.zeros((4 * Hp,), b.dtype)
    for g in range(4):
        out = out.at[g * Hp:g * Hp + H].set(b[g * H:(g + 1) * H])
    return out


# ----------------------------------------------------------------------------
# BidirectionalLSTM forward
# ----------------------------------------------------------------------------
def bidirectional_lstm(x, p):
    """x: (B, T, input_size) -> (B, T, output_size).  PyTorch LSTM semantics."""
    B, T, D = x.shape
    H = p['w_hh_f'].shape[1]
    O = p['w_lin'].shape[0]

    Hp = _round_up(H, 128)
    Dp = _round_up(D, 128)
    Op = _round_up(O, 128)
    Bp = _round_up(B, 8)

    # ---- time-major, padded, bf16 activations (one fused XLA copy) ----------
    xpad = jnp.pad(x, ((0, Bp - B), (0, 0), (0, Dp - D)))
    xt = (jnp.transpose(xpad, (1, 0, 2))
          .reshape(T * Bp, Dp).astype(jnp.bfloat16))              # (T*Bp, Dp)

    # ---- fused input projection for both directions (+ both biases) ---------
    w_proj = jnp.concatenate(
        [_pack_gate_weight(p['w_ih_f'], H, Hp, Dp),
         _pack_gate_weight(p['w_ih_b'], H, Hp, Dp)],
        axis=1).astype(jnp.bfloat16)                              # (Dp, 8Hp)
    b_proj = jnp.concatenate(
        [_pack_gate_bias(p['b_ih_f'] + p['b_hh_f'], H, Hp),
         _pack_gate_bias(p['b_ih_b'] + p['b_hh_b'], H, Hp)])      # (8Hp,) f32
    xproj = matmul_bias(xt, w_proj, b_proj,
                        out_dtype=jnp.bfloat16).reshape(T, Bp, 8 * Hp)

    # ---- sequential bidirectional recurrence (one direction per v7x core) ---
    whh2 = jnp.stack([_pack_gate_weight(p['w_hh_f'], H, Hp, Hp),
                      _pack_gate_weight(p['w_hh_b'], H, Hp, Hp)]
                     ).astype(jnp.bfloat16)                       # (2, Hp, 4Hp)
    hseq = lstm_recurrence(xproj, whh2, T=T, Bp=Bp, Hp=Hp)        # (2, T, Bp, Hp)

    # ---- fused Linear over [h_fwd, h_bwd] (no concat materialized) ----------
    wl = p['w_lin']                                               # (O, 2H)
    wl_f = jnp.zeros((Hp, Op), wl.dtype).at[:H, :O].set(wl[:, :H].T)
    wl_b = jnp.zeros((Hp, Op), wl.dtype).at[:H, :O].set(wl[:, H:].T)
    wl2 = jnp.stack([wl_f, wl_b]).astype(jnp.bfloat16)            # (2, Hp, Op)
    bl = jnp.zeros((Op,), jnp.float32).at[:O].set(p['b_lin'])

    out = dual_linear(hseq.reshape(2, T * Bp, Hp), wl2, bl,
                      out_dtype=jnp.float32)                      # (T*Bp, Op)
    out = out.reshape(T, Bp, Op).transpose(1, 0, 2)[:B, :, :O]    # (B, T, O)
    return out


# ----------------------------------------------------------------------------
# Deterministic parameter init (PyTorch default-like uniform)
# ----------------------------------------------------------------------------
def init_params(key, input_size, hidden_size, output_size):
    H = hidden_size
    ks = jax.random.split(key, 10)

    def u(k, shape, scale):
        return jax.random.uniform(k, shape, jnp.float32, -scale, scale)

    s = 1.0 / (H ** 0.5)
    sl = 1.0 / ((2 * H) ** 0.5)
    return {
        'w_ih_f': u(ks[0], (4 * H, input_size), s),
        'w_hh_f': u(ks[1], (4 * H, H), s),
        'b_ih_f': u(ks[2], (4 * H,), s),
        'b_hh_f': u(ks[3], (4 * H,), s),
        'w_ih_b': u(ks[4], (4 * H, input_size), s),
        'w_hh_b': u(ks[5], (4 * H, H), s),
        'b_ih_b': u(ks[6], (4 * H,), s),
        'b_hh_b': u(ks[7], (4 * H,), s),
        'w_lin': u(ks[8], (output_size, 2 * H), sl),
        'b_lin': u(ks[9], (output_size,), sl),
    }


# ----------------------------------------------------------------------------
# Pure-JAX reference (PyTorch LSTM equations, gate order i,f,g,o) — f32
# ----------------------------------------------------------------------------
def _reference(x, p):
    hp = jax.lax.Precision.HIGHEST
    B, T, D = x.shape
    H = p['w_hh_f'].shape[1]

    def cell(carry, xt, w_ih, w_hh, b_ih, b_hh):
        h, c = carry
        gates = (jnp.dot(xt, w_ih.T, precision=hp)
                 + jnp.dot(h, w_hh.T, precision=hp) + b_ih + b_hh)
        i, f, g, o = jnp.split(gates, 4, axis=-1)
        i, f, o = jax.nn.sigmoid(i), jax.nn.sigmoid(f), jax.nn.sigmoid(o)
        g = jnp.tanh(g)
        c = f * c + i * g
        h = o * jnp.tanh(c)
        return (h, c), h

    h0 = jnp.zeros((B, H), x.dtype)
    c0 = jnp.zeros((B, H), x.dtype)
    xt_seq = jnp.transpose(x, (1, 0, 2))                          # (T, B, D)

    _, hf = jax.lax.scan(
        lambda carry, xt: cell(carry, xt, p['w_ih_f'], p['w_hh_f'],
                               p['b_ih_f'], p['b_hh_f']), (h0, c0), xt_seq)
    _, hb = jax.lax.scan(
        lambda carry, xt: cell(carry, xt, p['w_ih_b'], p['w_hh_b'],
                               p['b_ih_b'], p['b_hh_b']), (h0, c0), xt_seq[::-1])
    hb = hb[::-1]

    rec = jnp.concatenate([hf, hb], axis=-1)                      # (T, B, 2H)
    out = jnp.dot(rec, p['w_lin'].T, precision=hp) + p['b_lin']   # (T, B, O)
    return jnp.transpose(out, (1, 0, 2))                          # (B, T, O)


if __name__ == "__main__":
    key = jax.random.PRNGKey(0)
    kx, kp = jax.random.split(key)

    B, T, input_size, hidden_size, output_size = 2, 8, 16, 32, 32
    x = jax.random.normal(kx, (B, T, input_size), jnp.float32)
    params = init_params(kp, input_size, hidden_size, output_size)

    out = jax.block_until_ready(jax.jit(bidirectional_lstm)(x, params))
    assert out.shape == (B, T, output_size), out.shape

    ref = jax.block_until_ready(_reference(x, params))
    err = float(jnp.max(jnp.abs(out - ref)))
    # Tolerance reflects bf16 MXU operands (f32 accumulation): expected max
    # abs error ~1e-2 at these shapes; an index_map / packing regression would
    # produce errors orders of magnitude larger and still be caught.
    assert jnp.allclose(out, ref, rtol=2e-2, atol=2e-2), err

    print("KERNEL_OK")
</pallas_src>

<mosaic_0001>
module attributes {stable_mosaic.version = 11 : i64} {
  func.func @_matmul_bias_kernel(%arg0: i32, %arg1: memref<16x128xbf16, #tpu.memory_space<vmem>>, %arg2: memref<128x1024xbf16, #tpu.memory_space<vmem>>, %arg3: memref<1x1024xf32, #tpu.memory_space<vmem>>, %arg4: memref<16x1024xbf16, #tpu.memory_space<vmem>>) attributes {dimension_semantics = [#tpu.dimension_semantics<parallel>], iteration_bounds = array<i64: 4>, scalar_prefetch = 0 : i64, scratch_operands = 0 : i64, tpu.core_type = #tpu.core_type<tc>, window_params = [{transform_indices = @transform_0, window_bounds = array<i64: 16, 128>}, {pipeline_mode = #tpu.pipeline_mode<synchronous>, transform_indices = @transform_1, window_bounds = array<i64: 128, 1024>}, {pipeline_mode = #tpu.pipeline_mode<synchronous>, transform_indices = @transform_2, window_bounds = array<i64: 1, 1024>}, {transform_indices = @transform_3, window_bounds = array<i64: 16, 1024>}]} {
    %c0 = arith.constant 0 : index
    %c0_0 = arith.constant 0 : index
    %0 = vector.load %arg1[%c0, %c0_0] : memref<16x128xbf16, #tpu.memory_space<vmem>>, vector<16x128xbf16>
    %c0_1 = arith.constant 0 : index
    %c0_2 = arith.constant 0 : index
    %1 = vector.load %arg2[%c0_1, %c0_2] : memref<128x1024xbf16, #tpu.memory_space<vmem>>, vector<128x1024xbf16>
    %cst = arith.constant dense<0.000000e+00> : vector<16x1024xf32>
    %2 = tpu.matmul %0, %1, %cst {dimension_numbers = #tpu.dot_dimension_numbers<[1], [0], [0], [1], [0, 0, 1, 1], [], []>} : vector<16x128xbf16>, vector<128x1024xbf16>, vector<16x1024xf32> -> vector<16x1024xf32>
    %c0_3 = arith.constant 0 : index
    %c0_4 = arith.constant 0 : index
    %3 = vector.load %arg3[%c0_3, %c0_4] : memref<1x1024xf32, #tpu.memory_space<vmem>>, vector<1x1024xf32>
    %4 = vector.broadcast %3 : vector<1x1024xf32> to vector<16x1024xf32>
    %5 = arith.addf %2, %4 : vector<16x1024xf32>
    %6 = arith.truncf %5 : vector<16x1024xf32> to vector<16x1024xbf16>
    %c0_5 = arith.constant 0 : index
    %c0_6 = arith.constant 0 : index
    %7 = vector.load %arg4[%c0_5, %c0_6] : memref<16x1024xbf16, #tpu.memory_space<vmem>>, vector<16x1024xbf16>
    tpu.vector_store %arg4[%c0_5, %c0_6], %6 {strides = array<i32>} : memref<16x1024xbf16, #tpu.memory_space<vmem>>, vector<16x1024xbf16>,
    return
  }
  func.func @transform_0(%arg0: i32) -> (i32, i32) {
    %c0_i32 = arith.constant 0 : i32
    %c0_i32_0 = arith.constant 0 : i32
    return %arg0, %c0_i32 : i32, i32
  }
  func.func @transform_1(%arg0: i32) -> (i32, i32) {
    %c0_i32 = arith.constant 0 : i32
    %c0_i32_0 = arith.constant 0 : i32
    %c0_i32_1 = arith.constant 0 : i32
    return %c0_i32, %c0_i32_0 : i32, i32
  }
  func.func @transform_2(%arg0: i32) -> (i32, i32) {
    %c0_i32 = arith.constant 0 : i32
    %c0_i32_0 = arith.constant 0 : i32
    %c0_i32_1 = arith.constant 0 : i32
    return %c0_i32, %c0_i32_0 : i32, i32
  }
  func.func @transform_3(%arg0: i32) -> (i32, i32) {
    %c0_i32 = arith.constant 0 : i32
    %c0_i32_0 = arith.constant 0 : i32
    return %arg0, %c0_i32 : i32, i32
  }
}

module attributes {stable_mosaic.version = 11 : i64} {
  func.func @_bilstm_dir_kernel(%arg0: i32, %arg1: i32, %arg2: memref<8x8x512xbf16, #tpu.memory_space<vmem>>, %arg3: memref<1x128x512xbf16, #tpu.memory_space<vmem>>, %arg4: memref<1x8x8x128xbf16, #tpu.memory_space<vmem>>, %arg5: memref<8x128xf32, #tpu.memory_space<vmem>>, %arg6: memref<8x128xf32, #tpu.memory_space<vmem>>) attributes {dimension_semantics = [#tpu.dimension_semantics<parallel>, #tpu.dimension_semantics<arbitrary>], iteration_bounds = array<i64: 2, 1>, scalar_prefetch = 0 : i64, scratch_operands = 2 : i64, tpu.core_type = #tpu.core_type<tc>, window_params = [{transform_indices = @transform_0, window_bounds = array<i64: 8, 8, 512>}, {transform_indices = @transform_1, window_bounds = array<i64: 1, 128, 512>}, {transform_indices = @transform_2, window_bounds = array<i64: 1, 8, 8, 128>}]} {
    %c0_i32 = arith.constant 0 : i32
    %0 = arith.cmpi eq, %arg1, %c0_i32 : i32
    %1 = arith.extui %0 : i1 to i32
    %c0_i32_0 = arith.constant 0 : i32
    %2 = arith.cmpi ne, %1, %c0_i32_0 : i32
    scf.if %2 {
      %cst = arith.constant 0.000000e+00 : f32
      %11 = vector.broadcast %cst : f32 to vector<8x128xf32>
      %c0_6 = arith.constant 0 : index
      %c0_7 = arith.constant 0 : index
      %12 = vector.load %arg5[%c0_6, %c0_7] : memref<8x128xf32, #tpu.memory_space<vmem>>, vector<8x128xf32>
      tpu.vector_store %arg5[%c0_6, %c0_7], %11 {strides = array<i32>} : memref<8x128xf32, #tpu.memory_space<vmem>>, vector<8x128xf32>,
      %cst_8 = arith.constant 0.000000e+00 : f32
      %13 = vector.broadcast %cst_8 : f32 to vector<8x128xf32>
      %c0_9 = arith.constant 0 : index
      %c0_10 = arith.constant 0 : index
      %14 = vector.load %arg6[%c0_9, %c0_10] : memref<8x128xf32, #tpu.memory_space<vmem>>, vector<8x128xf32>
      tpu.vector_store %arg6[%c0_9, %c0_10], %13 {strides = array<i32>} : memref<8x128xf32, #tpu.memory_space<vmem>>, vector<8x128xf32>,
    } else {
    }
    %c0 = arith.constant 0 : index
    %c0_1 = arith.constant 0 : index
    %c0_2 = arith.constant 0 : index
    %3 = vector.load %arg3[%c0, %c0_1, %c0_2] : memref<1x128x512xbf16, #tpu.memory_space<vmem>>, vector<1x128x512xbf16>
    %4 = vector.shape_cast %3 : vector<1x128x512xbf16> to vector<128x512xbf16>
    %c0_i32_3 = arith.constant 0 : i32
    %5 = arith.cmpi eq, %arg0, %c0_i32_3 : i32
    %6 = arith.extui %5 : i1 to i32
    %c0_i32_4 = arith.constant 0 : i32
    %7 = arith.cmpi ne, %6, %c0_i32_4 : i32
    scf.if %7 {
      %c0_6 = arith.constant 0 : index
      %c0_7 = arith.constant 0 : index
      %c0_8 = arith.constant 0 : index
      %11 = vector.load %arg2[%c0_6, %c0_7, %c0_8] : memref<8x8x512xbf16, #tpu.memory_space<vmem>>, vector<1x8x512xbf16>
      %12 = vector.shape_cast %11 : vector<1x8x512xbf16> to vector<8x512xbf16>
      %13 = arith.extf %12 : vector<8x512xbf16> to vector<8x512xf32>
      %c0_9 = arith.constant 0 : index
      %c0_10 = arith.constant 0 : index
      %14 = vector.load %arg5[%c0_9, %c0_10] : memref<8x128xf32, #tpu.memory_space<vmem>>, vector<8x128xf32>
      %15 = arith.truncf %14 : vector<8x128xf32> to vector<8x128xbf16>
      %cst = arith.constant dense<0.000000e+00> : vector<8x512xf32>
      %16 = tpu.matmul %15, %4, %cst {dimension_numbers = #tpu.dot_dimension_numbers<[1], [0], [0], [1], [0, 0, 1, 1], [], []>} : vector<8x128xbf16>, vector<128x512xbf16>, vector<8x512xf32> -> vector<8x512xf32>
      %17 = arith.addf %13, %16 : vector<8x512xf32>
      %18 = vector.extract_strided_slice %17 {offsets = [0, 0], sizes = [8, 128], strides = [1, 1]} : vector<8x512xf32> to vector<8x128xf32>
      %cst_11 = arith.constant 5.000000e-01 : f32
      %19 = vector.broadcast %cst_11 : f32 to vector<8x128xf32>
      %20 = arith.mulf %19, %18 : vector<8x128xf32>
      %21 = math.tanh %20 : vector<8x128xf32>
      %cst_12 = arith.constant 5.000000e-01 : f32
      %22 = vector.broadcast %cst_12 : f32 to vector<8x128xf32>
      %23 = arith.mulf %22, %21 : vector<8x128xf32>
      %cst_13 = arith.constant 5.000000e-01 : f32
      %24 = vector.broadcast %cst_13 : f32 to vector<8x128xf32>
      %25 = arith.addf %23, %24 : vector<8x128xf32>
      %26 = vector.extract_strided_slice %17 {offsets = [0, 128], sizes = [8, 128], strides = [1, 1]} : vector<8x512xf32> to vector<8x128xf32>
      %cst_14 = arith.constant 5.000000e-01 : f32
      %27 = vector.broadcast %cst_14 : f32 to vector<8x128xf32>
      %28 = arith.mulf %27, %26 : vector<8x128xf32>
      %29 = math.tanh %28 : vector<8x128xf32>
      %cst_15 = arith.constant 5.000000e-01 : f32
      %30 = vector.broadcast %cst_15 : f32 to vector<8x128xf32>
      %31 = arith.mulf %30, %29 : vector<8x128xf32>
      %cst_16 = arith.constant 5.000000e-01 : f32
      %32 = vector.broadcast %cst_16 : f32 to vector<8x128xf32>
      %33 = arith.addf %31, %32 : vector<8x128xf32>
      %34 = vector.extract_strided_slice %17 {offsets = [0, 256], sizes = [8, 128], strides = [1, 1]} : vector<8x512xf32> to vector<8x128xf32>
      %35 = math.tanh %34 : vector<8x128xf32>
      %36 = vector.extract_strided_slice %17 {offsets = [0, 384], sizes = [8, 128], strides = [1, 1]} : vector<8x512xf32> to vector<8x128xf32>
      %cst_17 = arith.constant 5.000000e-01 : f32
      %37 = vector.broadcast %cst_17 : f32 to vector<8x128xf32>
      %38 = arith.mulf %37, %36 : vector<8x128xf32>
      %39 = math.tanh %38 : vector<8x128xf32>
      %cst_18 = arith.constant 5.000000e-01 : f32
      %40 = vector.broadcast %cst_18 : f32 to vector<8x128xf32>
      %41 = arith.mulf %40, %39 : vector<8x128xf32>
      %cst_19 = arith.constant 5.000000e-01 : f32
      %42 = vector.broadcast %cst_19 : f32 to vector<8x128xf32>
      %43 = arith.addf %41, %42 : vector<8x128xf32>
      %c0_20 = arith.constant 0 : index
      %c0_21 = arith.constant 0 : index
      %44 = vector.load %arg6[%c0_20, %c0_21] : memref<8x128xf32, #tpu.memory_space<vmem>>, vector<8x128xf32>
      %45 = arith.mulf %33, %44 : vector<8x128xf32>
      %46 = arith.mulf %25, %35 : vector<8x128xf32>
      %47 = arith.addf %45, %46 : vector<8x128xf32>
      %48 = math.tanh %47 : vector<8x128xf32>
      %49 = arith.mulf %43, %48 : vector<8x128xf32>
      %c0_22 = arith.constant 0 : index
      %c0_23 = arith.constant 0 : index
      %50 = vector.load %arg6[%c0_22, %c0_23] : memref<8x128xf32, #tpu.memory_space<vmem>>, vector<8x128xf32>
      tpu.vector_store %arg6[%c0_22, %c0_23], %47 {strides = array<i32>} : memref<8x128xf32, #tpu.memory_space<vmem>>, vector<8x128xf32>,
      %c0_24 = arith.constant 0 : index
      %c0_25 = arith.constant 0 : index
      %51 = vector.load %arg5[%c0_24, %c0_25] : memref<8x128xf32, #tpu.memory_space<vmem>>, vector<8x128xf32>
      tpu.vector_store %arg5[%c0_24, %c0_25], %49 {strides = array<i32>} : memref<8x128xf32, #tpu.memory_space<vmem>>, vector<8x128xf32>,
      %52 = arith.truncf %49 : vector<8x128xf32> to vector<8x128xbf16>
      %c0_26 = arith.constant 0 : index
      %c0_27 = arith.constant 0 : index
      %c0_28 = arith.constant 0 : index
      %c0_29 = arith.constant 0 : index
      %53 = vector.load %arg4[%c0_26, %c0_27, %c0_28, %c0_29] : memref<1x8x8x128xbf16, #tpu.memory_space<vmem>>, vector<1x1x8x128xbf16>
      %54 = vector.shape_cast %53 : vector<1x1x8x128xbf16> to vector<8x128xbf16>
      %55 = vector.shape_cast %52 : vector<8x128xbf16> to vector<1x1x8x128xbf16>
      tpu.vector_store %arg4[%c0_26, %c0_27, %c0_28, %c0_29], %55 {strides = array<i32>} : memref<1x8x8x128xbf16, #tpu.memory_space<vmem>>, vector<1x1x8x128xbf16>,
      %c1 = arith.constant 1 : index
      %c0_30 = arith.constant 0 : index
      %c0_31 = arith.constant 0 : index
      %56 = vector.load %arg2[%c1, %c0_30, %c0_31] : memref<8x8x512xbf16, #tpu.memory_space<vmem>>, vector<1x8x512xbf16>
      %57 = vector.shape_cast %56 : vector<1x8x512xbf16> to vector<8x512xbf16>
      %58 = arith.extf %57 : vector<8x512xbf16> to vector<8x512xf32>
      %c0_32 = arith.constant 0 : index
      %c0_33 = arith.constant 0 : index
      %59 = vector.load %arg5[%c0_32, %c0_33] : memref<8x128xf32, #tpu.memory_space<vmem>>, vector<8x128xf32>
      %60 = arith.truncf %59 : vector<8x128xf32> to vector<8x128xbf16>
      %cst_34 = arith.constant dense<0.000000e+00> : vector<8x512xf32>
      %61 = tpu.matmul %60, %4, %cst_34 {dimension_numbers = #tpu.dot_dimension_numbers<[1], [0], [0], [1], [0, 0, 1, 1], [], []>} : vector<8x128xbf16>, vector<128x512xbf16>, vector<8x512xf32> -> vector<8x512xf32>
      %62 = arith.addf %58, %61 : vector<8x512xf32>
      %63 = vector.extract_strided_slice %62 {offsets = [0, 0], sizes = [8, 128], strides = [1, 1]} : vector<8x512xf32> to vector<8x128xf32>
      %cst_35 = arith.constant 5.000000e-01 : f32
      %64 = vector.broadcast %cst_35 : f32 to vector<8x128xf32>
      %65 = arith.mulf %64, %63 : vector<8x128xf32>
      %66 = math.tanh %65 : vector<8x128xf32>
      %cst_36 = arith.constant 5.000000e-01 : f32
      %67 = vector.broadcast %cst_36 : f32 to vector<8x128xf32>
      %68 = arith.mulf %67, %66 : vector<8x128xf32>
      %cst_37 = arith.constant 5.000000e-01 : f32
      %69 = vector.broadcast %cst_37 : f32 to vector<8x128xf32>
      %70 = arith.addf %68, %69 : vector<8x128xf32>
      %71 = vector.extract_strided_slice %62 {offsets = [0, 128], sizes = [8, 128], strides = [1, 1]} : vector<8x512xf32> to vector<8x128xf32>
      %cst_38 = arith.constant 5.000000e-01 : f32
      %72 = vector.broadcast %cst_38 : f32 to vector<8x128xf32>
      %73 = arith.mulf %72, %71 : vector<8x128xf32>
      %74 = math.tanh %73 : vector<8x128xf32>
      %cst_39 = arith.constant 5.000000e-01 : f32
      %75 = vector.broadcast %cst_39 : f32 to vector<8x128xf32>
      %76 = arith.mulf %75, %74 : vector<8x128xf32>
      %cst_40 = arith.constant 5.000000e-01 : f32
      %77 = vector.broadcast %cst_40 : f32 to vector<8x128xf32>
      %78 = arith.addf %76, %77 : vector<8x128xf32>
      %79 = vector.extract_strided_slice %62 {offsets = [0, 256], sizes = [8, 128], strides = [1, 1]} : vector<8x512xf32> to vector<8x128xf32>
      %80 = math.tanh %79 : vector<8x128xf32>
      %81 = vector.extract_strided_slice %62 {offsets = [0, 384], sizes = [8, 128], strides = [1, 1]} : vector<8x512xf32> to vector<8x128xf32>
      %cst_41 = arith.constant 5.000000e-01 : f32
      %82 = vector.broadcast %cst_41 : f32 to vector<8x128xf32>
      %83 = arith.mulf %82, %81 : vector<8x128xf32>
      %84 = math.tanh %83 : vector<8x128xf32>
      %cst_42 = arith.constant 5.000000e-01 : f32
      %85 = vector.broadcast %cst_42 : f32 to vector<8x128xf32>
      %86 = arith.mulf %85, %84 : vector<8x128xf32>
      %cst_43 = arith.constant 5.000000e-01 : f32
      %87 = vector.broadcast %cst_43 : f32 to vector<8x128xf32>
      %88 = arith.addf %86, %87 : vector<8x128xf32>
      %c0_44 = arith.constant 0 : index
      %c0_45 = arith.constant 0 : index
      %89 = vector.load %arg6[%c0_44, %c0_45] : memref<8x128xf32, #tpu.memory_space<vmem>>, vector<8x128xf32>
      %90 = arith.mulf %78, %89 : vector<8x128xf32>
      %91 = arith.mulf %70, %80 : vector<8x128xf32>
      %92 = arith.addf %90, %91 : vector<8x128xf32>
      %93 = math.tanh %92 : vector<8x128xf32>
      %94 = arith.mulf %88, %93 : vector<8x128xf32>
      %c0_46 = arith.constant 0 : index
      %c0_47 = arith.constant 0 : index
      %95 = vector.load %arg6[%c0_46, %c0_47] : memref<8x128xf32, #tpu.memory_space<vmem>>, vector<8x128xf32>
      tpu.vector_store %arg6[%c0_46, %c0_47], %92 {strides = array<i32>} : memref<8x128xf32, #tpu.memory_space<vmem>>, vector<8x128xf32>,
      %c0_48 = arith.constant 0 : index
      %c0_49 = arith.constant 0 : index
      %96 = vector.load %arg5[%c0_48, %c0_49] : memref<8x128xf32, #tpu.memory_space<vmem>>, vector<8x128xf32>
      tpu.vector_store %arg5[%c0_48, %c0_49], %94 {strides = array<i32>} : memref<8x128xf32, #tpu.memory_space<vmem>>, vector<8x128xf32>,
      %97 = arith.truncf %94 : vector<8x128xf32> to vector<8x128xbf16>
      %c0_50 = arith.constant 0 : index
      %c1_51 = arith.constant 1 : index
      %c0_52 = arith.constant 0 : index
      %c0_53 = arith.constant 0 : index
      %98 = vector.load %arg4[%c0_50, %c1_51, %c0_52, %c0_53] : memref<1x8x8x128xbf16, #tpu.memory_space<vmem>>, vector<1x1x8x128xbf16>
      %99 = vector.shape_cast %98 : vector<1x1x8x128xbf16> to vector<8x128xbf16>
      %100 = vector.shape_cast %97 : vector<8x128xbf16> to vector<1x1x8x128xbf16>
      tpu.vector_store %arg4[%c0_50, %c1_51, %c0_52, %c0_53], %100 {strides = array<i32>} : memref<1x8x8x128xbf16, #tpu.memory_space<vmem>>, vector<1x1x8x128xbf16>,
      %c2 = arith.constant 2 : index
      %c0_54 = arith.constant 0 : index
      %c0_55 = arith.constant 0 : index
      %101 = vector.load %arg2[%c2, %c0_54, %c0_55] : memref<8x8x512xbf16, #tpu.memory_space<vmem>>, vector<1x8x512xbf16>
      %102 = vector.shape_cast %101 : vector<1x8x512xbf16> to vector<8x512xbf16>
      %103 = arith.extf %102 : vector<8x512xbf16> to vector<8x512xf32>
      %c0_56 = arith.constant 0 : index
      %c0_57 = arith.constant 0 : index
      %104 = vector.load %arg5[%c0_56, %c0_57] : memref<8x128xf32, #tpu.memory_space<vmem>>, vector<8x128xf32>
      %105 = arith.truncf %104 : vector<8x128xf32> to vector<8x128xbf16>
      %cst_58 = arith.constant dense<0.000000e+00> : vector<8x512xf32>
      %106 = tpu.matmul %105, %4, %cst_58 {dimension_numbers = #tpu.dot_dimension_numbers<[1], [0], [0], [1], [0, 0, 1, 1], [], []>} : vector<8x128xbf16>, vector<128x512xbf16>, vector<8x512xf32> -> vector<8x512xf32>
      %107 = arith.addf %103, %106 : vector<8x512xf32>
      %108 = vector.extract_strided_slice %107 {offsets = [0, 0], sizes = [8, 128], strides = [1, 1]} : vector<8x512xf32> to vector<8x128xf32>
      %cst_59 = arith.constant 5.000000e-01 : f32
      %109 = vector.broadcast %cst_59 : f32 to vector<8x128xf32>
      %110 = arith.mulf %109, %108 : vector<8x128xf32>
      %111 = math.tanh %110 : vector<8x128xf32>
      %cst_60 = arith.constant 5.000000e-01 : f32
      %112 = vector.broadcast %cst_60 : f32 to vector<8x128xf32>
      %113 = arith.mulf %112, %111 : vector<8x128xf32>
      %cst_61 = arith.constant 5.000000e-01 : f32
      %114 = vector.broadcast %cst_61 : f32 to vector<8x128xf32>
      %115 = arith.addf %113, %114 : vector<8x128xf32>
      %116 = vector.extract_strided_slice %107 {offsets = [0, 128], sizes = [8, 128], strides = [1, 1]} : vector<8x512xf32> to vector<8x128xf32>
      %cst_62 = arith.constant 5.000000e-01 : f32
      %117 = vector.broadcast %cst_62 : f32 to vector<8x128xf32>
      %118 = arith.mulf %117, %116 : vector<8x128xf32>
      %119 = math.tanh %118 : vector<8x128xf32>
      %cst_63 = arith.constant 5.000000e-01 : f32
      %120 = vector.broadcast %cst_63 : f32 to vector<8x128xf32>
      %121 = arith.mulf %120, %119 : vector<8x128xf32>
      %cst_64 = arith.constant 5.000000e-01 : f32
      %122 = vector.broadcast %cst_64 : f32 to vector<8x128xf32>
      %123 = arith.addf %121, %122 : vector<8x128xf32>
      %124 = vector.extract_strided_slice %107 {offsets = [0, 256], sizes = [8, 128], strides = [1, 1]} : vector<8x512xf32> to vector<8x128xf32>
      %125 = math.tanh %124 : vector<8x128xf32>
      %126 = vector.extract_strided_slice %107 {offsets = [0, 384], sizes = [8, 128], strides = [1, 1]} : vector<8x512xf32> to vector<8x128xf32>
      %cst_65 = arith.constant 5.000000e-01 : f32
      %127 = vector.broadcast %cst_65 : f32 to vector<8x128xf32>
      %128 = arith.mulf %127, %126 : vector<8x128xf32>
      %129 = math.tanh %128 : vector<8x128xf32>
      %cst_66 = arith.constant 5.000000e-01 : f32
      %130 = vector.broadcast %cst_66 : f32 to vector<8x128xf32>
      %131 = arith.mulf %130, %129 : vector<8x128xf32>
      %cst_67 = arith.constant 5.000000e-01 : f32
      %132 = vector.broadcast %cst_67 : f32 to vector<8x128xf32>
      %133 = arith.addf %131, %132 : vector<8x128xf32>
      %c0_68 = arith.constant 0 : index
      %c0_69 = arith.constant 0 : index
      %134 = vector.load %arg6[%c0_68, %c0_69] : memref<8x128xf32, #tpu.memory_space<vmem>>, vector<8x128xf32>
      %135 = arith.mulf %123, %134 : vector<8x128xf32>
      %136 = arith.mulf %115, %125 : vector<8x128xf32>
      %137 = arith.addf %135, %136 : vector<8x128xf32>
      %138 = math.tanh %137 : vector<8x128xf32>
      %139 = arith.mulf %133, %138 : vector<8x128xf32>
      %c0_70 = arith.constant 0 : index
      %c0_71 = arith.constant 0 : index
      %140 = vector.load %arg6[%c0_70, %c0_71] : memref<8x128xf32, #tpu.memory_space<vmem>>, vector<8x128xf32>
      tpu.vector_store %arg6[%c0_70, %c0_71], %137 {strides = array<i32>} : memref<8x128xf32, #tpu.memory_space<vmem>>, vector<8x128xf32>,
      %c0_72 = arith.constant 0 : index
      %c0_73 = arith.constant 0 : index
      %141 = vector.load %arg5[%c0_72, %c0_73] : memref<8x128xf32, #tpu.memory_space<vmem>>, vector<8x128xf32>
      tpu.vector_store %arg5[%c0_72, %c0_73], %139 {strides = array<i32>} : memref<8x128xf32, #tpu.memory_space<vmem>>, vector<8x128xf32>,
      %142 = arith.truncf %139 : vector<8x128xf32> to vector<8x128xbf16>
      %c0_74 = arith.constant 0 : index
      %c2_75 = arith.constant 2 : index
      %c0_76 = arith.constant 0 : index
      %c0_77 = arith.constant 0 : index
      %143 = vector.load %arg4[%c0_74, %c2_75, %c0_76, %c0_77] : memref<1x8x8x128xbf16, #tpu.memory_space<vmem>>, vector<1x1x8x128xbf16>
      %144 = vector.shape_cast %143 : vector<1x1x8x128xbf16> to vector<8x128xbf16>
      %145 = vector.shape_cast %142 : vector<8x128xbf16> to vector<1x1x8x128xbf16>
      tpu.vector_store %arg4[%c0_74, %c2_75, %c0_76, %c0_77], %145 {strides = array<i32>} : memref<1x8x8x128xbf16, #tpu.memory_space<vmem>>, vector<1x1x8x128xbf16>,
      %c3 = arith.constant 3 : index
      %c0_78 = arith.constant 0 : index
      %c0_79 = arith.constant 0 : index
      %146 = vector.load %arg2[%c3, %c0_78, %c0_79] : memref<8x8x512xbf16, #tpu.memory_space<vmem>>, vector<1x8x512xbf16>
      %147 = vector.shape_cast %146 : vector<1x8x512xbf16> to vector<8x512xbf16>
      %148 = arith.extf %147 : vector<8x512xbf16> to vector<8x512xf32>
      %c0_80 = arith.constant 0 : index
      %c0_81 = arith.constant 0 : index
      %149 = vector.load %arg5[%c0_80, %c0_81] : memref<8x128xf32, #tpu.memory_space<vmem>>, vector<8x128xf32>
      %150 = arith.truncf %149 : vector<8x128xf32> to vector<8x128xbf16>
      %cst_82 = arith.constant dense<0.000000e+00> : vector<8x512xf32>
      %151 = tpu.matmul %150, %4, %cst_82 {dimension_numbers = #tpu.dot_dimension_numbers<[1], [0], [0], [1], [0, 0, 1, 1], [], []>} : vector<8x128xbf16>, vector<128x512xbf16>, vector<8x512xf32> -> vector<8x512xf32>
      %152 = arith.addf %148, %151 : vector<8x512xf32>
      %153 = vector.extract_strided_slice %152 {offsets = [0, 0], sizes = [8, 128], strides = [1, 1]} : vector<8x512xf32> to vector<8x128xf32>
      %cst_83 = arith.constant 5.000000e-01 : f32
      %154 = vector.broadcast %cst_83 : f32 to vector<8x128xf32>
      %155 = arith.mulf %154, %153 : vector<8x128xf32>
      %156 = math.tanh %155 : vector<8x128xf32>
      %cst_84 = arith.constant 5.000000e-01 : f32
      %157 = vector.broadcast %cst_84 : f32 to vector<8x128xf32>
      %158 = arith.mulf %157, %156 : vector<8x128xf32>
      %cst_85 = arith.constant 5.000000e-01 : f32
      %159 = vector.broadcast %cst_85 : f32 to vector<8x128xf32>
      %160 = arith.addf %158, %159 : vector<8x128xf32>
      %161 = vector.extract_strided_slice %152 {offsets = [0, 128], sizes = [8, 128], strides = [1, 1]} : vector<8x512xf32> to vector<8x128xf32>
      %cst_86 = arith.constant 5.000000e-01 : f32
      %162 = vector.broadcast %cst_86 : f32 to vector<8x128xf32>
      %163 = arith.mulf %162, %161 : vector<8x128xf32>
      %164 = math.tanh %163 : vector<8x128xf32>
      %cst_87 = arith.constant 5.000000e-01 : f32
      %165 = vector.broadcast %cst_87 : f32 to vector<8x128xf32>
      %166 = arith.mulf %165, %164 : vector<8x128xf32>
      %cst_88 = arith.constant 5.000000e-01 : f32
      %167 = vector.broadcast %cst_88 : f32 to vector<8x128xf32>
      %168 = arith.addf %166, %167 : vector<8x128xf32>
      %169 = vector.extract_strided_slice %152 {offsets = [0, 256], sizes = [8, 128], strides = [1, 1]} : vector<8x512xf32> to vector<8x128xf32>
      %170 = math.tanh %169 : vector<8x128xf32>
      %171 = vector.extract_strided_slice %152 {offsets = [0, 384], sizes = [8, 128], strides = [1, 1]} : vector<8x512xf32> to vector<8x128xf32>
      %cst_89 = arith.constant 5.000000e-01 : f32
      %172 = vector.broadcast %cst_89 : f32 to vector<8x128xf32>
      %173 = arith.mulf %172, %171 : vector<8x128xf32>
      %174 = math.tanh %173 : vector<8x128xf32>
      %cst_90 = arith.constant 5.000000e-01 : f32
      %175 = vector.broadcast %cst_90 : f32 to vector<8x128xf32>
      %176 = arith.mulf %175, %174 : vector<8x128xf32>
      %cst_91 = arith.constant 5.000000e-01 : f32
      %177 = vector.broadcast %cst_91 : f32 to vector<8x128xf32>
      %178 = arith.addf %176, %177 : vector<8x128xf32>
      %c0_92 = arith.constant 0 : index
      %c0_93 = arith.constant 0 : index
      %179 = vector.load %arg6[%c0_92, %c0_93] : memref<8x128xf32, #tpu.memory_space<vmem>>, vector<8x128xf32>
      %180 = arith.mulf %168, %179 : vector<8x128xf32>
      %181 = arith.mulf %160, %170 : vector<8x128xf32>
      %182 = arith.addf %180, %181 : vector<8x128xf32>
      %183 = math.tanh %182 : vector<8x128xf32>
      %184 = arith.mulf %178, %183 : vector<8x128xf32>
      %c0_94 = arith.constant 0 : index
      %c0_95 = arith.constant 0 : index
      %185 = vector.load %arg6[%c0_94, %c0_95] : memref<8x128xf32, #tpu.memory_space<vmem>>, vector<8x128xf32>
      tpu.vector_store %arg6[%c0_94, %c0_95], %182 {strides = array<i32>} : memref<8x128xf32, #tpu.memory_space<vmem>>, vector<8x128xf32>,
      %c0_96 = arith.constant 0 : index
      %c0_97 = arith.constant 0 : index
      %186 = vector.load %arg5[%c0_96, %c0_97] : memref<8x128xf32, #tpu.memory_space<vmem>>, vector<8x128xf32>
      tpu.vector_store %arg5[%c0_96, %c0_97], %184 {strides = array<i32>} : memref<8x128xf32, #tpu.memory_space<vmem>>, vector<8x128xf32>,
      %187 = arith.truncf %184 : vector<8x128xf32> to vector<8x128xbf16>
      %c0_98 = arith.constant 0 : index
      %c3_99 = arith.constant 3 : index
      %c0_100 = arith.constant 0 : index
      %c0_101 = arith.constant 0 : index
      %188 = vector.load %arg4[%c0_98, %c3_99, %c0_100, %c0_101] : memref<1x8x8x128xbf16, #tpu.memory_space<vmem>>, vector<1x1x8x128xbf16>
      %189 = vector.shape_cast %188 : vector<1x1x8x128xbf16> to vector<8x128xbf16>
      %190 = vector.shape_cast %187 : vector<8x128xbf16> to vector<1x1x8x128xbf16>
      tpu.vector_store %arg4[%c0_98, %c3_99, %c0_100, %c0_101], %190 {strides = array<i32>} : memref<1x8x8x128xbf16, #tpu.memory_space<vmem>>, vector<1x1x8x128xbf16>,
      %c4 = arith.constant 4 : index
      %c0_102 = arith.constant 0 : index
      %c0_103 = arith.constant 0 : index
      %191 = vector.load %arg2[%c4, %c0_102, %c0_103] : memref<8x8x512xbf16, #tpu.memory_space<vmem>>, vector<1x8x512xbf16>
      %192 = vector.shape_cast %191 : vector<1x8x512xbf16> to vector<8x512xbf16>
      %193 = arith.extf %192 : vector<8x512xbf16> to vector<8x512xf32>
      %c0_104 = arith.constant 0 : index
      %c0_105 = arith.constant 0 : index
      %194 = vector.load %arg5[%c0_104, %c0_105] : memref<8x128xf32, #tpu.memory_space<vmem>>, vector<8x128xf32>
      %195 = arith.truncf %194 : vector<8x128xf32> to vector<8x128xbf16>
      %cst_106 = arith.constant dense<0.000000e+00> : vector<8x512xf32>
      %196 = tpu.matmul %195, %4, %cst_106 {dimension_numbers = #tpu.dot_dimension_numbers<[1], [0], [0], [1], [0, 0, 1, 1], [], []>} : vector<8x128xbf16>, vector<128x512xbf16>, vector<8x512xf32> -> vector<8x512xf32>
      %197 = arith.addf %193, %196 : vector<8x512xf32>
      %198 = vector.extract_strided_slice %197 {offsets = [0, 0], sizes = [8, 128], strides = [1, 1]} : vector<8x512xf32> to vector<8x128xf32>
      %cst_107 = arith.constant 5.000000e-01 : f32
      %199 = vector.broadcast %cst_107 : f32 to vector<8x128xf32>
      %200 = arith.mulf %199, %198 : vector<8x128xf32>
      %201 = math.tanh %200 : vector<8x128xf32>
      %cst_108 = arith.constant 5.000000e-01 : f32
      %202 = vector.broadcast %cst_108 : f32 to vector<8x128xf32>
      %203 = arith.mulf %202, %201 : vector<8x128xf32>
      %cst_109 = arith.constant 5.000000e-01 : f32
      %204 = vector.broadcast %cst_109 : f32 to vector<8x128xf32>
      %205 = arith.addf %203, %204 : vector<8x128xf32>
      %206 = vector.extract_strided_slice %197 {offsets = [0, 128], sizes = [8, 128], strides = [1, 1]} : vector<8x512xf32> to vector<8x128xf32>
      %cst_110 = arith.constant 5.000000e-01 : f32
      %207 = vector.broadcast %cst_110 : f32 to vector<8x128xf32>
      %208 = arith.mulf %207, %206 : vector<8x128xf32>
      %209 = math.tanh %208 : vector<8x128xf32>
      %cst_111 = arith.constant 5.000000e-01 : f32
      %210 = vector.broadcast %cst_111 : f32 to vector<8x128xf32>
      %211 = arith.mulf %210, %209 : vector<8x128xf32>
      %cst_112 = arith.constant 5.000000e-01 : f32
      %212 = vector.broadcast %cst_112 : f32 to vector<8x128xf32>
      %213 = arith.addf %211, %212 : vector<8x128xf32>
      %214 = vector.extract_strided_slice %197 {offsets = [0, 256], sizes = [8, 128], strides = [1, 1]} : vector<8x512xf32> to vector<8x128xf32>
      %215 = math.tanh %214 : vector<8x128xf32>
      %216 = vector.extract_strided_slice %197 {offsets = [0, 384], sizes = [8, 128], strides = [1, 1]} : vector<8x512xf32> to vector<8x128xf32>
      %cst_113 = arith.constant 5.000000e-01 : f32
      %217 = vector.broadcast %cst_113 : f32 to vector<8x128xf32>
      %218 = arith.mulf %217, %216 : vector<8x128xf32>
      %219 = math.tanh %218 : vector<8x128xf32>
      %cst_114 = arith.constant 5.000000e-01 : f32
      %220 = vector.broadcast %cst_114 : f32 to vector<8x128xf32>
      %221 = arith.mulf %220, %219 : vector<8x128xf32>
      %cst_115 = arith.constant 5.000000e-01 : f32
      %222 = vector.broadcast %cst_115 : f32 to vector<8x128xf32>
      %223 = arith.addf %221, %222 : vector<8x128xf32>
      %c0_116 = arith.constant 0 : index
      %c0_117 = arith.constant 0 : index
      %224 = vector.load %arg6[%c0_116, %c0_117] : memref<8x128xf32, #tpu.memory_space<vmem>>, vector<8x128xf32>
      %225 = arith.mulf %213, %224 : vector<8x128xf32>
      %226 = arith.mulf %205, %215 : vector<8x128xf32>
      %227 = arith.addf %225, %226 : vector<8x128xf32>
      %228 = math.tanh %227 : vector<8x128xf32>
      %229 = arith.mulf %223, %228 : vector<8x128xf32>
      %c0_118 = arith.constant 0 : index
      %c0_119 = arith.constant 0 : index
      %230 = vector.load %arg6[%c0_118, %c0_119] : memref<8x128xf32, #tpu.memory_space<vmem>>, vector<8x128xf32>
      tpu.vector_store %arg6[%c0_118, %c0_119], %227 {strides = array<i32>} : memref<8x128xf32, #tpu.memory_space<vmem>>, vector<8x128xf32>,
      %c0_120 = arith.constant 0 : index
      %c0_121 = arith.constant 0 : index
      %231 = vector.load %arg5[%c0_120, %c0_121] : memref<8x128xf32, #tpu.memory_space<vmem>>, vector<8x128xf32>
      tpu.vector_store %arg5[%c0_120, %c0_121], %229 {strides = array<i32>} : memref<8x128xf32, #tpu.memory_space<vmem>>, vector<8x128xf32>,
      %232 = arith.truncf %229 : vector<8x128xf32> to vector<8x128xbf16>
      %c0_122 = arith.constant 0 : index
      %c4_123 = arith.constant 4 : index
      %c0_124 = arith.constant 0 : index
      %c0_125 = arith.constant 0 : index
      %233 = vector.load %arg4[%c0_122, %c4_123, %c0_124, %c0_125] : memref<1x8x8x128xbf16, #tpu.memory_space<vmem>>, vector<1x1x8x128xbf16>
      %234 = vector.shape_cast %233 : vector<1x1x8x128xbf16> to vector<8x128xbf16>
      %235 = vector.shape_cast %232 : vector<8x128xbf16> to vector<1x1x8x128xbf16>
      tpu.vector_store %arg4[%c0_122, %c4_123, %c0_124, %c0_125], %235 {strides = array<i32>} : memref<1x8x8x128xbf16, #tpu.memory_space<vmem>>, vector<1x1x8x128xbf16>,
      %c5 = arith.constant 5 : index
      %c0_126 = arith.constant 0 : index
      %c0_127 = arith.constant 0 : index
      %236 = vector.load %arg2[%c5, %c0_126, %c0_127] : memref<8x8x512xbf16, #tpu.memory_space<vmem>>, vector<1x8x512xbf16>
      %237 = vector.shape_cast %236 : vector<1x8x512xbf16> to vector<8x512xbf16>
      %238 = arith.extf %237 : vector<8x512xbf16> to vector<8x512xf32>
      %c0_128 = arith.constant 0 : index
      %c0_129 = arith.constant 0 : index
      %239 = vector.load %arg5[%c0_128, %c0_129] : memref<8x128xf32, #tpu.memory_space<vmem>>, vector<8x128xf32>
      %240 = arith.truncf %239 : vector<8x128xf32> to vector<8x128xbf16>
      %cst_130 = arith.constant dense<0.000000e+00> : vector<8x512xf32>
      %241 = tpu.matmul %240, %4, %cst_130 {dimension_numbers = #tpu.dot_dimension_numbers<[1], [0], [0], [1], [0, 0, 1, 1], [], []>} : vector<8x128xbf16>, vector<128x512xbf16>, vector<8x512xf32> -> vector<8x512xf32>
      %242 = arith.addf %238, %241 : vector<8x512xf32>
      %243 = vector.extract_strided_slice %242 {offsets = [0, 0], sizes = [8, 128], strides = [1, 1]} : vector<8x512xf32> to vector<8x128xf32>
      %cst_131 = arith.constant 5.000000e-01 : f32
      %244 = vector.broadcast %cst_131 : f32 to vector<8x128xf32>
      %245 = arith.mulf %244, %243 : vector<8x128xf32>
      %246 = math.tanh %245 : vector<8x128xf32>
      %cst_132 = arith.constant 5.000000e-01 : f32
      %247 = vector.broadcast %cst_132 : f32 to vector<8x128xf32>
      %248 = arith.mulf %247, %246 : vector<8x128xf32>
      %cst_133 = arith.constant 5.000000e-01 : f32
      %249 = vector.broadcast %cst_133 : f32 to vector<8x128xf32>
      %250 = arith.addf %248, %249 : vector<8x128xf32>
      %251 = vector.extract_strided_slice %242 {offsets = [0, 128], sizes = [8, 128], strides = [1, 1]} : vector<8x512xf32> to vector<8x128xf32>
      %cst_134 = arith.constant 5.000000e-01 : f32
      %252 = vector.broadcast %cst_134 : f32 to vector<8x128xf32>
      %253 = arith.mulf %252, %251 : vector<8x128xf32>
      %254 = math.tanh %253 : vector<8x128xf32>
      %cst_135 = arith.constant 5.000000e-01 : f32
      %255 = vector.broadcast %cst_135 : f32 to vector<8x128xf32>
      %256 = arith.mulf %255, %254 : vector<8x128xf32>
      %cst_136 = arith.constant 5.000000e-01 : f32
      %257 = vector.broadcast %cst_136 : f32 to vector<8x128xf32>
      %258 = arith.addf %256, %257 : vector<8x128xf32>
      %259 = vector.extract_strided_slice %242 {offsets = [0, 256], sizes = [8, 128], strides = [1, 1]} : vector<8x512xf32> to vector<8x128xf32>
      %260 = math.tanh %259 : vector<8x128xf32>
      %261 = vector.extract_strided_slice %242 {offsets = [0, 384], sizes = [8, 128], strides = [1, 1]} : vector<8x512xf32> to vector<8x128xf32>
      %cst_137 = arith.constant 5.000000e-01 : f32
      %262 = vector.broadcast %cst_137 : f32 to vector<8x128xf32>
      %263 = arith.mulf %262, %261 : vector<8x128xf32>
      %264 = math.tanh %263 : vector<8x128xf32>
      %cst_138 = arith.constant 5.000000e-01 : f32
      %265 = vector.broadcast %cst_138 : f32 to vector<8x128xf32>
      %266 = arith.mulf %265, %264 : vector<8x128xf32>
      %cst_139 = arith.constant 5.000000e-01 : f32
      %267 = vector.broadcast %cst_139 : f32 to vector<8x128xf32>
      %268 = arith.addf %266, %267 : vector<8x128xf32>
      %c0_140 = arith.constant 0 : index
      %c0_141 = arith.constant 0 : index
      %269 = vector.load %arg6[%c0_140, %c0_141] : memref<8x128xf32, #tpu.memory_space<vmem>>, vector<8x128xf32>
      %270 = arith.mulf %258, %269 : vector<8x128xf32>
      %271 = arith.mulf %250, %260 : vector<8x128xf32>
      %272 = arith.addf %270, %271 : vector<8x128xf32>
      %273 = math.tanh %272 : vector<8x128xf32>
      %274 = arith.mulf %268, %273 : vector<8x128xf32>
      %c0_142 = arith.constant 0 : index
      %c0_143 = arith.constant 0 : index
      %275 = vector.load %arg6[%c0_142, %c0_143] : memref<8x128xf32, #tpu.memory_space<vmem>>, vector<8x128xf32>
      tpu.vector_store %arg6[%c0_142, %c0_143], %272 {strides = array<i32>} : memref<8x128xf32, #tpu.memory_space<vmem>>, vector<8x128xf32>,
      %c0_144 = arith.constant 0 : index
      %c0_145 = arith.constant 0 : index
      %276 = vector.load %arg5[%c0_144, %c0_145] : memref<8x128xf32, #tpu.memory_space<vmem>>, vector<8x128xf32>
      tpu.vector_store %arg5[%c0_144, %c0_145], %274 {strides = array<i32>} : memref<8x128xf32, #tpu.memory_space<vmem>>, vector<8x128xf32>,
      %277 = arith.truncf %274 : vector<8x128xf32> to vector<8x128xbf16>
      %c0_146 = arith.constant 0 : index
      %c5_147 = arith.constant 5 : index
      %c0_148 = arith.constant 0 : index
      %c0_149 = arith.constant 0 : index
      %278 = vector.load %arg4[%c0_146, %c5_147, %c0_148, %c0_149] : memref<1x8x8x128xbf16, #tpu.memory_space<vmem>>, vector<1x1x8x128xbf16>
      %279 = vector.shape_cast %278 : vector<1x1x8x128xbf16> to vector<8x128xbf16>
      %280 = vector.shape_cast %277 : vector<8x128xbf16> to vector<1x1x8x128xbf16>
      tpu.vector_store %arg4[%c0_146, %c5_147, %c0_148, %c0_149], %280 {strides = array<i32>} : memref<1x8x8x128xbf16, #tpu.memory_space<vmem>>, vector<1x1x8x128xbf16>,
      %c6 = arith.constant 6 : index
      %c0_150 = arith.constant 0 : index
      %c0_151 = arith.constant 0 : index
      %281 = vector.load %arg2[%c6, %c0_150, %c0_151] : memref<8x8x512xbf16, #tpu.memory_space<vmem>>, vector<1x8x512xbf16>
      %282 = vector.shape_cast %281 : vector<1x8x512xbf16> to vector<8x512xbf16>
      %283 = arith.extf %282 : vector<8x512xbf16> to vector<8x512xf32>
      %c0_152 = arith.constant 0 : index
      %c0_153 = arith.constant 0 : index
      %284 = vector.load %arg5[%c0_152, %c0_153] : memref<8x128xf32, #tpu.memory_space<vmem>>, vector<8x128xf32>
      %285 = arith.truncf %284 : vector<8x128xf32> to vector<8x128xbf16>
      %cst_154 = arith.constant dense<0.000000e+00> : vector<8x512xf32>
      %286 = tpu.matmul %285, %4, %cst_154 {dimension_numbers = #tpu.dot_dimension_numbers<[1], [0], [0], [1], [0, 0, 1, 1], [], []>} : vector<8x128xbf16>, vector<128x512xbf16>, vector<8x512xf32> -> vector<8x512xf32>
      %287 = arith.addf %283, %286 : vector<8x512xf32>
      %288 = vector.extract_strided_slice %287 {offsets = [0, 0], sizes = [8, 128], strides = [1, 1]} : vector<8x512xf32> to vector<8x128xf32>
      %cst_155 = arith.constant 5.000000e-01 : f32
      %289 = vector.broadcast %cst_155 : f32 to vector<8x128xf32>
      %290 = arith.mulf %289, %288 : vector<8x128xf32>
      %291 = math.tanh %290 : vector<8x128xf32>
      %cst_156 = arith.constant 5.000000e-01 : f32
      %292 = vector.broadcast %cst_156 : f32 to vector<8x128xf32>
      %293 = arith.mulf %292, %291 : vector<8x128xf32>
      %cst_157 = arith.constant 5.000000e-01 : f32
      %294 = vector.broadcast %cst_157 : f32 to vector<8x128xf32>
      %295 = arith.addf %293, %294 : vector<8x128xf32>
      %296 = vector.extract_strided_slice %287 {offsets = [0, 128], sizes = [8, 128], strides = [1, 1]} : vector<8x512xf32> to vector<8x128xf32>
      %cst_158 = arith.constant 5.000000e-01 : f32
      %297 = vector.broadcast %cst_158 : f32 to vector<8x128xf32>
      %298 = arith.mulf %297, %296 : vector<8x128xf32>
      %299 = math.tanh %298 : vector<8x128xf32>
      %cst_159 = arith.constant 5.000000e-01 : f32
      %300 = vector.broadcast %cst_159 : f32 to vector<8x128xf32>
      %301 = arith.mulf %300, %299 : vector<8x128xf32>
      %cst_160 = arith.constant 5.000000e-01 : f32
      %302 = vector.broadcast %cst_160 : f32 to vector<8x128xf32>
      %303 = arith.addf %301, %302 : vector<8x128xf32>
      %304 = vector.extract_strided_slice %287 {offsets = [0, 256], sizes = [8, 128], strides = [1, 1]} : vector<8x512xf32> to vector<8x128xf32>
      %305 = math.tanh %304 : vector<8x128xf32>
      %306 = vector.extract_strided_slice %287 {offsets = [0, 384], sizes = [8, 128], strides = [1, 1]} : vector<8x512xf32> to vector<8x128xf32>
      %cst_161 = arith.constant 5.000000e-01 : f32
      %307 = vector.broadcast %cst_161 : f32 to vector<8x128xf32>
      %308 = arith.mulf %307, %306 : vector<8x128xf32>
      %309 = math.tanh %308 : vector<8x128xf32>
      %cst_162 = arith.constant 5.000000e-01 : f32
      %310 = vector.broadcast %cst_162 : f32 to vector<8x128xf32>
      %311 = arith.mulf %310, %309 : vector<8x128xf32>
      %cst_163 = arith.constant 5.000000e-01 : f32
      %312 = vector.broadcast %cst_163 : f32 to vector<8x128xf32>
      %313 = arith.addf %311, %312 : vector<8x128xf32>
      %c0_164 = arith.constant 0 : index
      %c0_165 = arith.constant 0 : index
      %314 = vector.load %arg6[%c0_164, %c0_165] : memref<8x128xf32, #tpu.memory_space<vmem>>, vector<8x128xf32>
      %315 = arith.mulf %303, %314 : vector<8x128xf32>
      %316 = arith.mulf %295, %305 : vector<8x128xf32>
      %317 = arith.addf %315, %316 : vector<8x128xf32>
      %318 = math.tanh %317 : vector<8x128xf32>
      %319 = arith.mulf %313, %318 : vector<8x128xf32>
      %c0_166 = arith.constant 0 : index
      %c0_167 = arith.constant 0 : index
      %320 = vector.load %arg6[%c0_166, %c0_167] : memref<8x128xf32, #tpu.memory_space<vmem>>, vector<8x128xf32>
      tpu.vector_store %arg6[%c0_166, %c0_167], %317 {strides = array<i32>} : memref<8x128xf32, #tpu.memory_space<vmem>>, vector<8x128xf32>,
      %c0_168 = arith.constant 0 : index
      %c0_169 = arith.constant 0 : index
      %321 = vector.load %arg5[%c0_168, %c0_169] : memref<8x128xf32, #tpu.memory_space<vmem>>, vector<8x128xf32>
      tpu.vector_store %arg5[%c0_168, %c0_169], %319 {strides = array<i32>} : memref<8x128xf32, #tpu.memory_space<vmem>>, vector<8x128xf32>,
      %322 = arith.truncf %319 : vector<8x128xf32> to vector<8x128xbf16>
      %c0_170 = arith.constant 0 : index
      %c6_171 = arith.constant 6 : index
      %c0_172 = arith.constant 0 : index
      %c0_173 = arith.constant 0 : index
      %323 = vector.load %arg4[%c0_170, %c6_171, %c0_172, %c0_173] : memref<1x8x8x128xbf16, #tpu.memory_space<vmem>>, vector<1x1x8x128xbf16>
      %324 = vector.shape_cast %323 : vector<1x1x8x128xbf16> to vector<8x128xbf16>
      %325 = vector.shape_cast %322 : vector<8x128xbf16> to vector<1x1x8x128xbf16>
      tpu.vector_store %arg4[%c0_170, %c6_171, %c0_172, %c0_173], %325 {strides = array<i32>} : memref<1x8x8x128xbf16, #tpu.memory_space<vmem>>, vector<1x1x8x128xbf16>,
      %c7 = arith.constant 7 : index
      %c0_174 = arith.constant 0 : index
      %c0_175 = arith.constant 0 : index
      %326 = vector.load %arg2[%c7, %c0_174, %c0_175] : memref<8x8x512xbf16, #tpu.memory_space<vmem>>, vector<1x8x512xbf16>
      %327 = vector.shape_cast %326 : vector<1x8x512xbf16> to vector<8x512xbf16>
      %328 = arith.extf %327 : vector<8x512xbf16> to vector<8x512xf32>
      %c0_176 = arith.constant 0 : index
      %c0_177 = arith.constant 0 : index
      %329 = vector.load %arg5[%c0_176, %c0_177] : memref<8x128xf32, #tpu.memory_space<vmem>>, vector<8x128xf32>
      %330 = arith.truncf %329 : vector<8x128xf32> to vector<8x128xbf16>
      %cst_178 = arith.constant dense<0.000000e+00> : vector<8x512xf32>
      %331 = tpu.matmul %330, %4, %cst_178 {dimension_numbers = #tpu.dot_dimension_numbers<[1], [0], [0], [1], [0, 0, 1, 1], [], []>} : vector<8x128xbf16>, vector<128x512xbf16>, vector<8x512xf32> -> vector<8x512xf32>
      %332 = arith.addf %328, %331 : vector<8x512xf32>
      %333 = vector.extract_strided_slice %332 {offsets = [0, 0], sizes = [8, 128], strides = [1, 1]} : vector<8x512xf32> to vector<8x128xf32>
      %cst_179 = arith.constant 5.000000e-01 : f32
      %334 = vector.broadcast %cst_179 : f32 to vector<8x128xf32>
      %335 = arith.mulf %334, %333 : vector<8x128xf32>
      %336 = math.tanh %335 : vector<8x128xf32>
      %cst_180 = arith.constant 5.000000e-01 : f32
      %337 = vector.broadcast %cst_180 : f32 to vector<8x128xf32>
      %338 = arith.mulf %337, %336 : vector<8x128xf32>
      %cst_181 = arith.constant 5.000000e-01 : f32
      %339 = vector.broadcast %cst_181 : f32 to vector<8x128xf32>
      %340 = arith.addf %338, %339 : vector<8x128xf32>
      %341 = vector.extract_strided_slice %332 {offsets = [0, 128], sizes = [8, 128], strides = [1, 1]} : vector<8x512xf32> to vector<8x128xf32>
      %cst_182 = arith.constant 5.000000e-01 : f32
      %342 = vector.broadcast %cst_182 : f32 to vector<8x128xf32>
      %343 = arith.mulf %342, %341 : vector<8x128xf32>
      %344 = math.tanh %343 : vector<8x128xf32>
      %cst_183 = arith.constant 5.000000e-01 : f32
      %345 = vector.broadcast %cst_183 : f32 to vector<8x128xf32>
      %346 = arith.mulf %345, %344 : vector<8x128xf32>
      %cst_184 = arith.constant 5.000000e-01 : f32
      %347 = vector.broadcast %cst_184 : f32 to vector<8x128xf32>
      %348 = arith.addf %346, %347 : vector<8x128xf32>
      %349 = vector.extract_strided_slice %332 {offsets = [0, 256], sizes = [8, 128], strides = [1, 1]} : vector<8x512xf32> to vector<8x128xf32>
      %350 = math.tanh %349 : vector<8x128xf32>
      %351 = vector.extract_strided_slice %332 {offsets = [0, 384], sizes = [8, 128], strides = [1, 1]} : vector<8x512xf32> to vector<8x128xf32>
      %cst_185 = arith.constant 5.000000e-01 : f32
      %352 = vector.broadcast %cst_185 : f32 to vector<8x128xf32>
      %353 = arith.mulf %352, %351 : vector<8x128xf32>
      %354 = math.tanh %353 : vector<8x128xf32>
      %cst_186 = arith.constant 5.000000e-01 : f32
      %355 = vector.broadcast %cst_186 : f32 to vector<8x128xf32>
      %356 = arith.mulf %355, %354 : vector<8x128xf32>
      %cst_187 = arith.constant 5.000000e-01 : f32
      %357 = vector.broadcast %cst_187 : f32 to vector<8x128xf32>
      %358 = arith.addf %356, %357 : vector<8x128xf32>
      %c0_188 = arith.constant 0 : index
      %c0_189 = arith.constant 0 : index
      %359 = vector.load %arg6[%c0_188, %c0_189] : memref<8x128xf32, #tpu.memory_space<vmem>>, vector<8x128xf32>
      %360 = arith.mulf %348, %359 : vector<8x128xf32>
      %361 = arith.mulf %340, %350 : vector<8x128xf32>
      %362 = arith.addf %360, %361 : vector<8x128xf32>
      %363 = math.tanh %362 : vector<8x128xf32>
      %364 = arith.mulf %358, %363 : vector<8x128xf32>
      %c0_190 = arith.constant 0 : index
      %c0_191 = arith.constant 0 : index
      %365 = vector.load %arg6[%c0_190, %c0_191] : memref<8x128xf32, #tpu.memory_space<vmem>>, vector<8x128xf32>
      tpu.vector_store %arg6[%c0_190, %c0_191], %362 {strides = array<i32>} : memref<8x128xf32, #tpu.memory_space<vmem>>, vector<8x128xf32>,
      %c0_192 = arith.constant 0 : index
      %c0_193 = arith.constant 0 : index
      %366 = vector.load %arg5[%c0_192, %c0_193] : memref<8x128xf32, #tpu.memory_space<vmem>>, vector<8x128xf32>
      tpu.vector_store %arg5[%c0_192, %c0_193], %364 {strides = array<i32>} : memref<8x128xf32, #tpu.memory_space<vmem>>, vector<8x128xf32>,
      %367 = arith.truncf %364 : vector<8x128xf32> to vector<8x128xbf16>
      %c0_194 = arith.constant 0 : index
      %c7_195 = arith.constant 7 : index
      %c0_196 = arith.constant 0 : index
      %c0_197 = arith.constant 0 : index
      %368 = vector.load %arg4[%c0_194, %c7_195, %c0_196, %c0_197] : memref<1x8x8x128xbf16, #tpu.memory_space<vmem>>, vector<1x1x8x128xbf16>
      %369 = vector.shape_cast %368 : vector<1x1x8x128xbf16> to vector<8x128xbf16>
      %370 = vector.shape_cast %367 : vector<8x128xbf16> to vector<1x1x8x128xbf16>
      tpu.vector_store %arg4[%c0_194, %c7_195, %c0_196, %c0_197], %370 {strides = array<i32>} : memref<1x8x8x128xbf16, #tpu.memory_space<vmem>>, vector<1x1x8x128xbf16>,
    } else {
    }
    %c1_i32 = arith.constant 1 : i32
    %8 = arith.cmpi eq, %arg0, %c1_i32 : i32
    %9 = arith.extui %8 : i1 to i32
    %c0_i32_5 = arith.constant 0 : i32
    %10 = arith.cmpi ne, %9, %c0_i32_5 : i32
    scf.if %10 {
      %c7 = arith.constant 7 : index
      %c0_6 = arith.constant 0 : index
      %c0_7 = arith.constant 0 : index
      %11 = vector.load %arg2[%c7, %c0_6, %c0_7] : memref<8x8x512xbf16, #tpu.memory_space<vmem>>, vector<1x8x512xbf16>
      %12 = vector.shape_cast %11 : vector<1x8x512xbf16> to vector<8x512xbf16>
      %13 = arith.extf %12 : vector<8x512xbf16> to vector<8x512xf32>
      %c0_8 = arith.constant 0 : index
      %c0_9 = arith.constant 0 : index
      %14 = vector.load %arg5[%c0_8, %c0_9] : memref<8x128xf32, #tpu.memory_space<vmem>>, vector<8x128xf32>
      %15 = arith.truncf %14 : vector<8x128xf32> to vector<8x128xbf16>
      %cst = arith.constant dense<0.000000e+00> : vector<8x512xf32>
      %16 = tpu.matmul %15, %4, %cst {dimension_numbers = #tpu.dot_dimension_numbers<[1], [0], [0], [1], [0, 0, 1, 1], [], []>} : vector<8x128xbf16>, vector<128x512xbf16>, vector<8x512xf32> -> vector<8x512xf32>
      %17 = arith.addf %13, %16 : vector<8x512xf32>
      %18 = vector.extract_strided_slice %17 {offsets = [0, 0], sizes = [8, 128], strides = [1, 1]} : vector<8x512xf32> to vector<8x128xf32>
      %cst_10 = arith.constant 5.000000e-01 : f32
      %19 = vector.broadcast %cst_10 : f32 to vector<8x128xf32>
      %20 = arith.mulf %19, %18 : vector<8x128xf32>
      %21 = math.tanh %20 : vector<8x128xf32>
      %cst_11 = arith.constant 5.000000e-01 : f32
      %22 = vector.broadcast %cst_11 : f32 to vector<8x128xf32>
      %23 = arith.mulf %22, %21 : vector<8x128xf32>
      %cst_12 = arith.constant 5.000000e-01 : f32
      %24 = vector.broadcast %cst_12 : f32 to vector<8x128xf32>
      %25 = arith.addf %23, %24 : vector<8x128xf32>
      %26 = vector.extract_strided_slice %17 {offsets = [0, 128], sizes = [8, 128], strides = [1, 1]} : vector<8x512xf32> to vector<8x128xf32>
      %cst_13 = arith.constant 5.000000e-01 : f32
      %27 = vector.broadcast %cst_13 : f32 to vector<8x128xf32>
      %28 = arith.mulf %27, %26 : vector<8x128xf32>
      %29 = math.tanh %28 : vector<8x128xf32>
      %cst_14 = arith.constant 5.000000e-01 : f32
      %30 = vector.broadcast %cst_14 : f32 to vector<8x128xf32>
      %31 = arith.mulf %30, %29 : vector<8x128xf32>
      %cst_15 = arith.constant 5.000000e-01 : f32
      %32 = vector.broadcast %cst_15 : f32 to vector<8x128xf32>
      %33 = arith.addf %31, %32 : vector<8x128xf32>
      %34 = vector.extract_strided_slice %17 {offsets = [0, 256], sizes = [8, 128], strides = [1, 1]} : vector<8x512xf32> to vector<8x128xf32>
      %35 = math.tanh %34 : vector<8x128xf32>
      %36 = vector.extract_strided_slice %17 {offsets = [0, 384], sizes = [8, 128], strides = [1, 1]} : vector<8x512xf32> to vector<8x128xf32>
      %cst_16 = arith.constant 5.000000e-01 : f32
      %37 = vector.broadcast %cst_16 : f32 to vector<8x128xf32>
      %38 = arith.mulf %37, %36 : vector<8x128xf32>
      %39 = math.tanh %38 : vector<8x128xf32>
      %cst_17 = arith.constant 5.000000e-01 : f32
      %40 = vector.broadcast %cst_17 : f32 to vector<8x128xf32>
      %41 = arith.mulf %40, %39 : vector<8x128xf32>
      %cst_18 = arith.constant 5.000000e-01 : f32
      %42 = vector.broadcast %cst_18 : f32 to vector<8x128xf32>
      %43 = arith.addf %41, %42 : vector<8x128xf32>
      %c0_19 = arith.constant 0 : index
      %c0_20 = arith.constant 0 : index
      %44 = vector.load %arg6[%c0_19, %c0_20] : memref<8x128xf32, #tpu.memory_space<vmem>>, vector<8x128xf32>
      %45 = arith.mulf %33, %44 : vector<8x128xf32>
      %46 = arith.mulf %25, %35 : vector<8x128xf32>
      %47 = arith.addf %45, %46 : vector<8x128xf32>
      %48 = math.tanh %47 : vector<8x128xf32>
      %49 = arith.mulf %43, %48 : vector<8x128xf32>
      %c0_21 = arith.constant 0 : index
      %c0_22 = arith.constant 0 : index
      %50 = vector.load %arg6[%c0_21, %c0_22] : memref<8x128xf32, #tpu.memory_space<vmem>>, vector<8x128xf32>
      tpu.vector_store %arg6[%c0_21, %c0_22], %47 {strides = array<i32>} : memref<8x128xf32, #tpu.memory_space<vmem>>, vector<8x128xf32>,
      %c0_23 = arith.constant 0 : index
      %c0_24 = arith.constant 0 : index
      %51 = vector.load %arg5[%c0_23, %c0_24] : memref<8x128xf32, #tpu.memory_space<vmem>>, vector<8x128xf32>
      tpu.vector_store %arg5[%c0_23, %c0_24], %49 {strides = array<i32>} : memref<8x128xf32, #tpu.memory_space<vmem>>, vector<8x128xf32>,
      %52 = arith.truncf %49 : vector<8x128xf32> to vector<8x128xbf16>
      %c0_25 = arith.constant 0 : index
      %c7_26 = arith.constant 7 : index
      %c0_27 = arith.constant 0 : index
      %c0_28 = arith.constant 0 : index
      %53 = vector.load %arg4[%c0_25, %c7_26, %c0_27, %c0_28] : memref<1x8x8x128xbf16, #tpu.memory_space<vmem>>, vector<1x1x8x128xbf16>
      %54 = vector.shape_cast %53 : vector<1x1x8x128xbf16> to vector<8x128xbf16>
      %55 = vector.shape_cast %52 : vector<8x128xbf16> to vector<1x1x8x128xbf16>
      tpu.vector_store %arg4[%c0_25, %c7_26, %c0_27, %c0_28], %55 {strides = array<i32>} : memref<1x8x8x128xbf16, #tpu.memory_space<vmem>>, vector<1x1x8x128xbf16>,
      %c6 = arith.constant 6 : index
      %c0_29 = arith.constant 0 : index
      %c0_30 = arith.constant 0 : index
      %56 = vector.load %arg2[%c6, %c0_29, %c0_30] : memref<8x8x512xbf16, #tpu.memory_space<vmem>>, vector<1x8x512xbf16>
      %57 = vector.shape_cast %56 : vector<1x8x512xbf16> to vector<8x512xbf16>
      %58 = arith.extf %57 : vector<8x512xbf16> to vector<8x512xf32>
      %c0_31 = arith.constant 0 : index
      %c0_32 = arith.constant 0 : index
      %59 = vector.load %arg5[%c0_31, %c0_32] : memref<8x128xf32, #tpu.memory_space<vmem>>, vector<8x128xf32>
      %60 = arith.truncf %59 : vector<8x128xf32> to vector<8x128xbf16>
      %cst_33 = arith.constant dense<0.000000e+00> : vector<8x512xf32>
      %61 = tpu.matmul %60, %4, %cst_33 {dimension_numbers = #tpu.dot_dimension_numbers<[1], [0], [0], [1], [0, 0, 1, 1], [], []>} : vector<8x128xbf16>, vector<128x512xbf16>, vector<8x512xf32> -> vector<8x512xf32>
      %62 = arith.addf %58, %61 : vector<8x512xf32>
      %63 = vector.extract_strided_slice %62 {offsets = [0, 0], sizes = [8, 128], strides = [1, 1]} : vector<8x512xf32> to vector<8x128xf32>
      %cst_34 = arith.constant 5.000000e-01 : f32
      %64 = vector.broadcast %cst_34 : f32 to vector<8x128xf32>
      %65 = arith.mulf %64, %63 : vector<8x128xf32>
      %66 = math.tanh %65 : vector<8x128xf32>
      %cst_35 = arith.constant 5.000000e-01 : f32
      %67 = vector.broadcast %cst_35 : f32 to vector<8x128xf32>
      %68 = arith.mulf %67, %66 : vector<8x128xf32>
      %cst_36 = arith.constant 5.000000e-01 : f32
      %69 = vector.broadcast %cst_36 : f32 to vector<8x128xf32>
      %70 = arith.addf %68, %69 : vector<8x128xf32>
      %71 = vector.extract_strided_slice %62 {offsets = [0, 128], sizes = [8, 128], strides = [1, 1]} : vector<8x512xf32> to vector<8x128xf32>
      %cst_37 = arith.constant 5.000000e-01 : f32
      %72 = vector.broadcast %cst_37 : f32 to vector<8x128xf32>
      %73 = arith.mulf %72, %71 : vector<8x128xf32>
      %74 = math.tanh %73 : vector<8x128xf32>
      %cst_38 = arith.constant 5.000000e-01 : f32
      %75 = vector.broadcast %cst_38 : f32 to vector<8x128xf32>
      %76 = arith.mulf %75, %74 : vector<8x128xf32>
      %cst_39 = arith.constant 5.000000e-01 : f32
      %77 = vector.broadcast %cst_39 : f32 to vector<8x128xf32>
      %78 = arith.addf %76, %77 : vector<8x128xf32>
      %79 = vector.extract_strided_slice %62 {offsets = [0, 256], sizes = [8, 128], strides = [1, 1]} : vector<8x512xf32> to vector<8x128xf32>
      %80 = math.tanh %79 : vector<8x128xf32>
      %81 = vector.extract_strided_slice %62 {offsets = [0, 384], sizes = [8, 128], strides = [1, 1]} : vector<8x512xf32> to vector<8x128xf32>
      %cst_40 = arith.constant 5.000000e-01 : f32
      %82 = vector.broadcast %cst_40 : f32 to vector<8x128xf32>
      %83 = arith.mulf %82, %81 : vector<8x128xf32>
      %84 = math.tanh %83 : vector<8x128xf32>
      %cst_41 = arith.constant 5.000000e-01 : f32
      %85 = vector.broadcast %cst_41 : f32 to vector<8x128xf32>
      %86 = arith.mulf %85, %84 : vector<8x128xf32>
      %cst_42 = arith.constant 5.000000e-01 : f32
      %87 = vector.broadcast %cst_42 : f32 to vector<8x128xf32>
      %88 = arith.addf %86, %87 : vector<8x128xf32>
      %c0_43 = arith.constant 0 : index
      %c0_44 = arith.constant 0 : index
      %89 = vector.load %arg6[%c0_43, %c0_44] : memref<8x128xf32, #tpu.memory_space<vmem>>, vector<8x128xf32>
      %90 = arith.mulf %78, %89 : vector<8x128xf32>
      %91 = arith.mulf %70, %80 : vector<8x128xf32>
      %92 = arith.addf %90, %91 : vector<8x128xf32>
      %93 = math.tanh %92 : vector<8x128xf32>
      %94 = arith.mulf %88, %93 : vector<8x128xf32>
      %c0_45 = arith.constant 0 : index
      %c0_46 = arith.constant 0 : index
      %95 = vector.load %arg6[%c0_45, %c0_46] : memref<8x128xf32, #tpu.memory_space<vmem>>, vector<8x128xf32>
      tpu.vector_store %arg6[%c0_45, %c0_46], %92 {strides = array<i32>} : memref<8x128xf32, #tpu.memory_space<vmem>>, vector<8x128xf32>,
      %c0_47 = arith.constant 0 : index
      %c0_48 = arith.constant 0 : index
      %96 = vector.load %arg5[%c0_47, %c0_48] : memref<8x128xf32, #tpu.memory_space<vmem>>, vector<8x128xf32>
      tpu.vector_store %arg5[%c0_47, %c0_48], %94 {strides = array<i32>} : memref<8x128xf32, #tpu.memory_space<vmem>>, vector<8x128xf32>,
      %97 = arith.truncf %94 : vector<8x128xf32> to vector<8x128xbf16>
      %c0_49 = arith.constant 0 : index
      %c6_50 = arith.constant 6 : index
      %c0_51 = arith.constant 0 : index
      %c0_52 = arith.constant 0 : index
      %98 = vector.load %arg4[%c0_49, %c6_50, %c0_51, %c0_52] : memref<1x8x8x128xbf16, #tpu.memory_space<vmem>>, vector<1x1x8x128xbf16>
      %99 = vector.shape_cast %98 : vector<1x1x8x128xbf16> to vector<8x128xbf16>
      %100 = vector.shape_cast %97 : vector<8x128xbf16> to vector<1x1x8x128xbf16>
      tpu.vector_store %arg4[%c0_49, %c6_50, %c0_51, %c0_52], %100 {strides = array<i32>} : memref<1x8x8x128xbf16, #tpu.memory_space<vmem>>, vector<1x1x8x128xbf16>,
      %c5 = arith.constant 5 : index
      %c0_53 = arith.constant 0 : index
      %c0_54 = arith.constant 0 : index
      %101 = vector.load %arg2[%c5, %c0_53, %c0_54] : memref<8x8x512xbf16, #tpu.memory_space<vmem>>, vector<1x8x512xbf16>
      %102 = vector.shape_cast %101 : vector<1x8x512xbf16> to vector<8x512xbf16>
      %103 = arith.extf %102 : vector<8x512xbf16> to vector<8x512xf32>
      %c0_55 = arith.constant 0 : index
      %c0_56 = arith.constant 0 : index
      %104 = vector.load %arg5[%c0_55, %c0_56] : memref<8x128xf32, #tpu.memory_space<vmem>>, vector<8x128xf32>
      %105 = arith.truncf %104 : vector<8x128xf32> to vector<8x128xbf16>
      %cst_57 = arith.constant dense<0.000000e+00> : vector<8x512xf32>
      %106 = tpu.matmul %105, %4, %cst_57 {dimension_numbers = #tpu.dot_dimension_numbers<[1], [0], [0], [1], [0, 0, 1, 1], [], []>} : vector<8x128xbf16>, vector<128x512xbf16>, vector<8x512xf32> -> vector<8x512xf32>
      %107 = arith.addf %103, %106 : vector<8x512xf32>
      %108 = vector.extract_strided_slice %107 {offsets = [0, 0], sizes = [8, 128], strides = [1, 1]} : vector<8x512xf32> to vector<8x128xf32>
      %cst_58 = arith.constant 5.000000e-01 : f32
      %109 = vector.broadcast %cst_58 : f32 to vector<8x128xf32>
      %110 = arith.mulf %109, %108 : vector<8x128xf32>
      %111 = math.tanh %110 : vector<8x128xf32>
      %cst_59 = arith.constant 5.000000e-01 : f32
      %112 = vector.broadcast %cst_59 : f32 to vector<8x128xf32>
      %113 = arith.mulf %112, %111 : vector<8x128xf32>
      %cst_60 = arith.constant 5.000000e-01 : f32
      %114 = vector.broadcast %cst_60 : f32 to vector<8x128xf32>
      %115 = arith.addf %113, %114 : vector<8x128xf32>
      %116 = vector.extract_strided_slice %107 {offsets = [0, 128], sizes = [8, 128], strides = [1, 1]} : vector<8x512xf32> to vector<8x128xf32>
      %cst_61 = arith.constant 5.000000e-01 : f32
      %117 = vector.broadcast %cst_61 : f32 to vector<8x128xf32>
      %118 = arith.mulf %117, %116 : vector<8x128xf32>
      %119 = math.tanh %118 : vector<8x128xf32>
      %cst_62 = arith.constant 5.000000e-01 : f32
      %120 = vector.broadcast %cst_62 : f32 to vector<8x128xf32>
      %121 = arith.mulf %120, %119 : vector<8x128xf32>
      %cst_63 = arith.constant 5.000000e-01 : f32
      %122 = vector.broadcast %cst_63 : f32 to vector<8x128xf32>
      %123 = arith.addf %121, %122 : vector<8x128xf32>
      %124 = vector.extract_strided_slice %107 {offsets = [0, 256], sizes = [8, 128], strides = [1, 1]} : vector<8x512xf32> to vector<8x128xf32>
      %125 = math.tanh %124 : vector<8x128xf32>
      %126 = vector.extract_strided_slice %107 {offsets = [0, 384], sizes = [8, 128], strides = [1, 1]} : vector<8x512xf32> to vector<8x128xf32>
      %cst_64 = arith.constant 5.000000e-01 : f32
      %127 = vector.broadcast %cst_64 : f32 to vector<8x128xf32>
      %128 = arith.mulf %127, %126 : vector<8x128xf32>
      %129 = math.tanh %128 : vector<8x128xf32>
      %cst_65 = arith.constant 5.000000e-01 : f32
      %130 = vector.broadcast %cst_65 : f32 to vector<8x128xf32>
      %131 = arith.mulf %130, %129 : vector<8x128xf32>
      %cst_66 = arith.constant 5.000000e-01 : f32
      %132 = vector.broadcast %cst_66 : f32 to vector<8x128xf32>
      %133 = arith.addf %131, %132 : vector<8x128xf32>
      %c0_67 = arith.constant 0 : index
      %c0_68 = arith.constant 0 : index
      %134 = vector.load %arg6[%c0_67, %c0_68] : memref<8x128xf32, #tpu.memory_space<vmem>>, vector<8x128xf32>
      %135 = arith.mulf %123, %134 : vector<8x128xf32>
      %136 = arith.mulf %115, %125 : vector<8x128xf32>
      %137 = arith.addf %135, %136 : vector<8x128xf32>
      %138 = math.tanh %137 : vector<8x128xf32>
      %139 = arith.mulf %133, %138 : vector<8x128xf32>
      %c0_69 = arith.constant 0 : index
      %c0_70 = arith.constant 0 : index
      %140 = vector.load %arg6[%c0_69, %c0_70] : memref<8x128xf32, #tpu.memory_space<vmem>>, vector<8x128xf32>
      tpu.vector_store %arg6[%c0_69, %c0_70], %137 {strides = array<i32>} : memref<8x128xf32, #tpu.memory_space<vmem>>, vector<8x128xf32>,
      %c0_71 = arith.constant 0 : index
      %c0_72 = arith.constant 0 : index
      %141 = vector.load %arg5[%c0_71, %c0_72] : memref<8x128xf32, #tpu.memory_space<vmem>>, vector<8x128xf32>
      tpu.vector_store %arg5[%c0_71, %c0_72], %139 {strides = array<i32>} : memref<8x128xf32, #tpu.memory_space<vmem>>, vector<8x128xf32>,
      %142 = arith.truncf %139 : vector<8x128xf32> to vector<8x128xbf16>
      %c0_73 = arith.constant 0 : index
      %c5_74 = arith.constant 5 : index
      %c0_75 = arith.constant 0 : index
      %c0_76 = arith.constant 0 : index
      %143 = vector.load %arg4[%c0_73, %c5_74, %c0_75, %c0_76] : memref<1x8x8x128xbf16, #tpu.memory_space<vmem>>, vector<1x1x8x128xbf16>
      %144 = vector.shape_cast %143 : vector<1x1x8x128xbf16> to vector<8x128xbf16>
      %145 = vector.shape_cast %142 : vector<8x128xbf16> to vector<1x1x8x128xbf16>
      tpu.vector_store %arg4[%c0_73, %c5_74, %c0_75, %c0_76], %145 {strides = array<i32>} : memref<1x8x8x128xbf16, #tpu.memory_space<vmem>>, vector<1x1x8x128xbf16>,
      %c4 = arith.constant 4 : index
      %c0_77 = arith.constant 0 : index
      %c0_78 = arith.constant 0 : index
      %146 = vector.load %arg2[%c4, %c0_77, %c0_78] : memref<8x8x512xbf16, #tpu.memory_space<vmem>>, vector<1x8x512xbf16>
      %147 = vector.shape_cast %146 : vector<1x8x512xbf16> to vector<8x512xbf16>
      %148 = arith.extf %147 : vector<8x512xbf16> to vector<8x512xf32>
      %c0_79 = arith.constant 0 : index
      %c0_80 = arith.constant 0 : index
      %149 = vector.load %arg5[%c0_79, %c0_80] : memref<8x128xf32, #tpu.memory_space<vmem>>, vector<8x128xf32>
      %150 = arith.truncf %149 : vector<8x128xf32> to vector<8x128xbf16>
      %cst_81 = arith.constant dense<0.000000e+00> : vector<8x512xf32>
      %151 = tpu.matmul %150, %4, %cst_81 {dimension_numbers = #tpu.dot_dimension_numbers<[1], [0], [0], [1], [0, 0, 1, 1], [], []>} : vector<8x128xbf16>, vector<128x512xbf16>, vector<8x512xf32> -> vector<8x512xf32>
      %152 = arith.addf %148, %151 : vector<8x512xf32>
      %153 = vector.extract_strided_slice %152 {offsets = [0, 0], sizes = [8, 128], strides = [1, 1]} : vector<8x512xf32> to vector<8x128xf32>
      %cst_82 = arith.constant 5.000000e-01 : f32
      %154 = vector.broadcast %cst_82 : f32 to vector<8x128xf32>
      %155 = arith.mulf %154, %153 : vector<8x128xf32>
      %156 = math.tanh %155 : vector<8x128xf32>
      %cst_83 = arith.constant 5.000000e-01 : f32
      %157 = vector.broadcast %cst_83 : f32 to vector<8x128xf32>
      %158 = arith.mulf %157, %156 : vector<8x128xf32>
      %cst_84 = arith.constant 5.000000e-01 : f32
      %159 = vector.broadcast %cst_84 : f32 to vector<8x128xf32>
      %160 = arith.addf %158, %159 : vector<8x128xf32>
      %161 = vector.extract_strided_slice %152 {offsets = [0, 128], sizes = [8, 128], strides = [1, 1]} : vector<8x512xf32> to vector<8x128xf32>
      %cst_85 = arith.constant 5.000000e-01 : f32
      %162 = vector.broadcast %cst_85 : f32 to vector<8x128xf32>
      %163 = arith.mulf %162, %161 : vector<8x128xf32>
      %164 = math.tanh %163 : vector<8x128xf32>
      %cst_86 = arith.constant 5.000000e-01 : f32
      %165 = vector.broadcast %cst_86 : f32 to vector<8x128xf32>
      %166 = arith.mulf %165, %164 : vector<8x128xf32>
      %cst_87 = arith.constant 5.000000e-01 : f32
      %167 = vector.broadcast %cst_87 : f32 to vector<8x128xf32>
      %168 = arith.addf %166, %167 : vector<8x128xf32>
      %169 = vector.extract_strided_slice %152 {offsets = [0, 256], sizes = [8, 128], strides = [1, 1]} : vector<8x512xf32> to vector<8x128xf32>
      %170 = math.tanh %169 : vector<8x128xf32>
      %171 = vector.extract_strided_slice %152 {offsets = [0, 384], sizes = [8, 128], strides = [1, 1]} : vector<8x512xf32> to vector<8x128xf32>
      %cst_88 = arith.constant 5.000000e-01 : f32
      %172 = vector.broadcast %cst_88 : f32 to vector<8x128xf32>
      %173 = arith.mulf %172, %171 : vector<8x128xf32>
      %174 = math.tanh %173 : vector<8x128xf32>
      %cst_89 = arith.constant 5.000000e-01 : f32
      %175 = vector.broadcast %cst_89 : f32 to vector<8x128xf32>
      %176 = arith.mulf %175, %174 : vector<8x128xf32>
      %cst_90 = arith.constant 5.000000e-01 : f32
      %177 = vector.broadcast %cst_90 : f32 to vector<8x128xf32>
      %178 = arith.addf %176, %177 : vector<8x128xf32>
      %c0_91 = arith.constant 0 : index
      %c0_92 = arith.constant 0 : index
      %179 = vector.load %arg6[%c0_91, %c0_92] : memref<8x128xf32, #tpu.memory_space<vmem>>, vector<8x128xf32>
      %180 = arith.mulf %168, %179 : vector<8x128xf32>
      %181 = arith.mulf %160, %170 : vector<8x128xf32>
      %182 = arith.addf %180, %181 : vector<8x128xf32>
      %183 = math.tanh %182 : vector<8x128xf32>
      %184 = arith.mulf %178, %183 : vector<8x128xf32>
      %c0_93 = arith.constant 0 : index
      %c0_94 = arith.constant 0 : index
      %185 = vector.load %arg6[%c0_93, %c0_94] : memref<8x128xf32, #tpu.memory_space<vmem>>, vector<8x128xf32>
      tpu.vector_store %arg6[%c0_93, %c0_94], %182 {strides = array<i32>} : memref<8x128xf32, #tpu.memory_space<vmem>>, vector<8x128xf32>,
      %c0_95 = arith.constant 0 : index
      %c0_96 = arith.constant 0 : index
      %186 = vector.load %arg5[%c0_95, %c0_96] : memref<8x128xf32, #tpu.memory_space<vmem>>, vector<8x128xf32>
      tpu.vector_store %arg5[%c0_95, %c0_96], %184 {strides = array<i32>} : memref<8x128xf32, #tpu.memory_space<vmem>>, vector<8x128xf32>,
      %187 = arith.truncf %184 : vector<8x128xf32> to vector<8x128xbf16>
      %c0_97 = arith.constant 0 : index
      %c4_98 = arith.constant 4 : index
      %c0_99 = arith.constant 0 : index
      %c0_100 = arith.constant 0 : index
      %188 = vector.load %arg4[%c0_97, %c4_98, %c0_99, %c0_100] : memref<1x8x8x128xbf16, #tpu.memory_space<vmem>>, vector<1x1x8x128xbf16>
      %189 = vector.shape_cast %188 : vector<1x1x8x128xbf16> to vector<8x128xbf16>
      %190 = vector.shape_cast %187 : vector<8x128xbf16> to vector<1x1x8x128xbf16>
      tpu.vector_store %arg4[%c0_97, %c4_98, %c0_99, %c0_100], %190 {strides = array<i32>} : memref<1x8x8x128xbf16, #tpu.memory_space<vmem>>, vector<1x1x8x128xbf16>,
      %c3 = arith.constant 3 : index
      %c0_101 = arith.constant 0 : index
      %c0_102 = arith.constant 0 : index
      %191 = vector.load %arg2[%c3, %c0_101, %c0_102] : memref<8x8x512xbf16, #tpu.memory_space<vmem>>, vector<1x8x512xbf16>
      %192 = vector.shape_cast %191 : vector<1x8x512xbf16> to vector<8x512xbf16>
      %193 = arith.extf %192 : vector<8x512xbf16> to vector<8x512xf32>
      %c0_103 = arith.constant 0 : index
      %c0_104 = arith.constant 0 : index
      %194 = vector.load %arg5[%c0_103, %c0_104] : memref<8x128xf32, #tpu.memory_space<vmem>>, vector<8x128xf32>
      %195 = arith.truncf %194 : vector<8x128xf32> to vector<8x128xbf16>
      %cst_105 = arith.constant dense<0.000000e+00> : vector<8x512xf32>
      %196 = tpu.matmul %195, %4, %cst_105 {dimension_numbers = #tpu.dot_dimension_numbers<[1], [0], [0], [1], [0, 0, 1, 1], [], []>} : vector<8x128xbf16>, vector<128x512xbf16>, vector<8x512xf32> -> vector<8x512xf32>
      %197 = arith.addf %193, %196 : vector<8x512xf32>
      %198 = vector.extract_strided_slice %197 {offsets = [0, 0], sizes = [8, 128], strides = [1, 1]} : vector<8x512xf32> to vector<8x128xf32>
      %cst_106 = arith.constant 5.000000e-01 : f32
      %199 = vector.broadcast %cst_106 : f32 to vector<8x128xf32>
      %200 = arith.mulf %199, %198 : vector<8x128xf32>
      %201 = math.tanh %200 : vector<8x128xf32>
      %cst_107 = arith.constant 5.000000e-01 : f32
      %202 = vector.broadcast %cst_107 : f32 to vector<8x128xf32>
      %203 = arith.mulf %202, %201 : vector<8x128xf32>
      %cst_108 = arith.constant 5.000000e-01 : f32
      %204 = vector.broadcast %cst_108 : f32 to vector<8x128xf32>
      %205 = arith.addf %203, %204 : vector<8x128xf32>
      %206 = vector.extract_strided_slice %197 {offsets = [0, 128], sizes = [8, 128], strides = [1, 1]} : vector<8x512xf32> to vector<8x128xf32>
      %cst_109 = arith.constant 5.000000e-01 : f32
      %207 = vector.broadcast %cst_109 : f32 to vector<8x128xf32>
      %208 = arith.mulf %207, %206 : vector<8x128xf32>
      %209 = math.tanh %208 : vector<8x128xf32>
      %cst_110 = arith.constant 5.000000e-01 : f32
      %210 = vector.broadcast %cst_110 : f32 to vector<8x128xf32>
      %211 = arith.mulf %210, %209 : vector<8x128xf32>
      %cst_111 = arith.constant 5.000000e-01 : f32
      %212 = vector.broadcast %cst_111 : f32 to vector<8x128xf32>
      %213 = arith.addf %211, %212 : vector<8x128xf32>
      %214 = vector.extract_strided_slice %197 {offsets = [0, 256], sizes = [8, 128], strides = [1, 1]} : vector<8x512xf32> to vector<8x128xf32>
      %215 = math.tanh %214 : vector<8x128xf32>
      %216 = vector.extract_strided_slice %197 {offsets = [0, 384], sizes = [8, 128], strides = [1, 1]} : vector<8x512xf32> to vector<8x128xf32>
      %cst_112 = arith.constant 5.000000e-01 : f32
      %217 = vector.broadcast %cst_112 : f32 to vector<8x128xf32>
      %218 = arith.mulf %217, %216 : vector<8x128xf32>
      %219 = math.tanh %218 : vector<8x128xf32>
      %cst_113 = arith.constant 5.000000e-01 : f32
      %220 = vector.broadcast %cst_113 : f32 to vector<8x128xf32>
      %221 = arith.mulf %220, %219 : vector<8x128xf32>
      %cst_114 = arith.constant 5.000000e-01 : f32
      %222 = vector.broadcast %cst_114 : f32 to vector<8x128xf32>
      %223 = arith.addf %221, %222 : vector<8x128xf32>
      %c0_115 = arith.constant 0 : index
      %c0_116 = arith.constant 0 : index
      %224 = vector.load %arg6[%c0_115, %c0_116] : memref<8x128xf32, #tpu.memory_space<vmem>>, vector<8x128xf32>
      %225 = arith.mulf %213, %224 : vector<8x128xf32>
      %226 = arith.mulf %205, %215 : vector<8x128xf32>
      %227 = arith.addf %225, %226 : vector<8x128xf32>
      %228 = math.tanh %227 : vector<8x128xf32>
      %229 = arith.mulf %223, %228 : vector<8x128xf32>
      %c0_117 = arith.constant 0 : index
      %c0_118 = arith.constant 0 : index
      %230 = vector.load %arg6[%c0_117, %c0_118] : memref<8x128xf32, #tpu.memory_space<vmem>>, vector<8x128xf32>
      tpu.vector_store %arg6[%c0_117, %c0_118], %227 {strides = array<i32>} : memref<8x128xf32, #tpu.memory_space<vmem>>, vector<8x128xf32>,
      %c0_119 = arith.constant 0 : index
      %c0_120 = arith.constant 0 : index
      %231 = vector.load %arg5[%c0_119, %c0_120] : memref<8x128xf32, #tpu.memory_space<vmem>>, vector<8x128xf32>
      tpu.vector_store %arg5[%c0_119, %c0_120], %229 {strides = array<i32>} : memref<8x128xf32, #tpu.memory_space<vmem>>, vector<8x128xf32>,
      %232 = arith.truncf %229 : vector<8x128xf32> to vector<8x128xbf16>
      %c0_121 = arith.constant 0 : index
      %c3_122 = arith.constant 3 : index
      %c0_123 = arith.constant 0 : index
      %c0_124 = arith.constant 0 : index
      %233 = vector.load %arg4[%c0_121, %c3_122, %c0_123, %c0_124] : memref<1x8x8x128xbf16, #tpu.memory_space<vmem>>, vector<1x1x8x128xbf16>
      %234 = vector.shape_cast %233 : vector<1x1x8x128xbf16> to vector<8x128xbf16>
      %235 = vector.shape_cast %232 : vector<8x128xbf16> to vector<1x1x8x128xbf16>
      tpu.vector_store %arg4[%c0_121, %c3_122, %c0_123, %c0_124], %235 {strides = array<i32>} : memref<1x8x8x128xbf16, #tpu.memory_space<vmem>>, vector<1x1x8x128xbf16>,
      %c2 = arith.constant 2 : index
      %c0_125 = arith.constant 0 : index
      %c0_126 = arith.constant 0 : index
      %236 = vector.load %arg2[%c2, %c0_125, %c0_126] : memref<8x8x512xbf16, #tpu.memory_space<vmem>>, vector<1x8x512xbf16>
      %237 = vector.shape_cast %236 : vector<1x8x512xbf16> to vector<8x512xbf16>
      %238 = arith.extf %237 : vector<8x512xbf16> to vector<8x512xf32>
      %c0_127 = arith.constant 0 : index
      %c0_128 = arith.constant 0 : index
      %239 = vector.load %arg5[%c0_127, %c0_128] : memref<8x128xf32, #tpu.memory_space<vmem>>, vector<8x128xf32>
      %240 = arith.truncf %239 : vector<8x128xf32> to vector<8x128xbf16>
      %cst_129 = arith.constant dense<0.000000e+00> : vector<8x512xf32>
      %241 = tpu.matmul %240, %4, %cst_129 {dimension_numbers = #tpu.dot_dimension_numbers<[1], [0], [0], [1], [0, 0, 1, 1], [], []>} : vector<8x128xbf16>, vector<128x512xbf16>, vector<8x512xf32> -> vector<8x512xf32>
      %242 = arith.addf %238, %241 : vector<8x512xf32>
      %243 = vector.extract_strided_slice %242 {offsets = [0, 0], sizes = [8, 128], strides = [1, 1]} : vector<8x512xf32> to vector<8x128xf32>
      %cst_130 = arith.constant 5.000000e-01 : f32
      %244 = vector.broadcast %cst_130 : f32 to vector<8x128xf32>
      %245 = arith.mulf %244, %243 : vector<8x128xf32>
      %246 = math.tanh %245 : vector<8x128xf32>
      %cst_131 = arith.constant 5.000000e-01 : f32
      %247 = vector.broadcast %cst_131 : f32 to vector<8x128xf32>
      %248 = arith.mulf %247, %246 : vector<8x128xf32>
      %cst_132 = arith.constant 5.000000e-01 : f32
      %249 = vector.broadcast %cst_132 : f32 to vector<8x128xf32>
      %250 = arith.addf %248, %249 : vector<8x128xf32>
      %251 = vector.extract_strided_slice %242 {offsets = [0, 128], sizes = [8, 128], strides = [1, 1]} : vector<8x512xf32> to vector<8x128xf32>
      %cst_133 = arith.constant 5.000000e-01 : f32
      %252 = vector.broadcast %cst_133 : f32 to vector<8x128xf32>
      %253 = arith.mulf %252, %251 : vector<8x128xf32>
      %254 = math.tanh %253 : vector<8x128xf32>
      %cst_134 = arith.constant 5.000000e-01 : f32
      %255 = vector.broadcast %cst_134 : f32 to vector<8x128xf32>
      %256 = arith.mulf %255, %254 : vector<8x128xf32>
      %cst_135 = arith.constant 5.000000e-01 : f32
      %257 = vector.broadcast %cst_135 : f32 to vector<8x128xf32>
      %258 = arith.addf %256, %257 : vector<8x128xf32>
      %259 = vector.extract_strided_slice %242 {offsets = [0, 256], sizes = [8, 128], strides = [1, 1]} : vector<8x512xf32> to vector<8x128xf32>
      %260 = math.tanh %259 : vector<8x128xf32>
      %261 = vector.extract_strided_slice %242 {offsets = [0, 384], sizes = [8, 128], strides = [1, 1]} : vector<8x512xf32> to vector<8x128xf32>
      %cst_136 = arith.constant 5.000000e-01 : f32
      %262 = vector.broadcast %cst_136 : f32 to vector<8x128xf32>
      %263 = arith.mulf %262, %261 : vector<8x128xf32>
      %264 = math.tanh %263 : vector<8x128xf32>
      %cst_137 = arith.constant 5.000000e-01 : f32
      %265 = vector.broadcast %cst_137 : f32 to vector<8x128xf32>
      %266 = arith.mulf %265, %264 : vector<8x128xf32>
      %cst_138 = arith.constant 5.000000e-01 : f32
      %267 = vector.broadcast %cst_138 : f32 to vector<8x128xf32>
      %268 = arith.addf %266, %267 : vector<8x128xf32>
      %c0_139 = arith.constant 0 : index
      %c0_140 = arith.constant 0 : index
      %269 = vector.load %arg6[%c0_139, %c0_140] : memref<8x128xf32, #tpu.memory_space<vmem>>, vector<8x128xf32>
      %270 = arith.mulf %258, %269 : vector<8x128xf32>
      %271 = arith.mulf %250, %260 : vector<8x128xf32>
      %272 = arith.addf %270, %271 : vector<8x128xf32>
      %273 = math.tanh %272 : vector<8x128xf32>
      %274 = arith.mulf %268, %273 : vector<8x128xf32>
      %c0_141 = arith.constant 0 : index
      %c0_142 = arith.constant 0 : index
      %275 = vector.load %arg6[%c0_141, %c0_142] : memref<8x128xf32, #tpu.memory_space<vmem>>, vector<8x128xf32>
      tpu.vector_store %arg6[%c0_141, %c0_142], %272 {strides = array<i32>} : memref<8x128xf32, #tpu.memory_space<vmem>>, vector<8x128xf32>,
      %c0_143 = arith.constant 0 : index
      %c0_144 = arith.constant 0 : index
      %276 = vector.load %arg5[%c0_143, %c0_144] : memref<8x128xf32, #tpu.memory_space<vmem>>, vector<8x128xf32>
      tpu.vector_store %arg5[%c0_143, %c0_144], %274 {strides = array<i32>} : memref<8x128xf32, #tpu.memory_space<vmem>>, vector<8x128xf32>,
      %277 = arith.truncf %274 : vector<8x128xf32> to vector<8x128xbf16>
      %c0_145 = arith.constant 0 : index
      %c2_146 = arith.constant 2 : index
      %c0_147 = arith.constant 0 : index
      %c0_148 = arith.constant 0 : index
      %278 = vector.load %arg4[%c0_145, %c2_146, %c0_147, %c0_148] : memref<1x8x8x128xbf16, #tpu.memory_space<vmem>>, vector<1x1x8x128xbf16>
      %279 = vector.shape_cast %278 : vector<1x1x8x128xbf16> to vector<8x128xbf16>
      %280 = vector.shape_cast %277 : vector<8x128xbf16> to vector<1x1x8x128xbf16>
      tpu.vector_store %arg4[%c0_145, %c2_146, %c0_147, %c0_148], %280 {strides = array<i32>} : memref<1x8x8x128xbf16, #tpu.memory_space<vmem>>, vector<1x1x8x128xbf16>,
      %c1 = arith.constant 1 : index
      %c0_149 = arith.constant 0 : index
      %c0_150 = arith.constant 0 : index
      %281 = vector.load %arg2[%c1, %c0_149, %c0_150] : memref<8x8x512xbf16, #tpu.memory_space<vmem>>, vector<1x8x512xbf16>
      %282 = vector.shape_cast %281 : vector<1x8x512xbf16> to vector<8x512xbf16>
      %283 = arith.extf %282 : vector<8x512xbf16> to vector<8x512xf32>
      %c0_151 = arith.constant 0 : index
      %c0_152 = arith.constant 0 : index
      %284 = vector.load %arg5[%c0_151, %c0_152] : memref<8x128xf32, #tpu.memory_space<vmem>>, vector<8x128xf32>
      %285 = arith.truncf %284 : vector<8x128xf32> to vector<8x128xbf16>
      %cst_153 = arith.constant dense<0.000000e+00> : vector<8x512xf32>
      %286 = tpu.matmul %285, %4, %cst_153 {dimension_numbers = #tpu.dot_dimension_numbers<[1], [0], [0], [1], [0, 0, 1, 1], [], []>} : vector<8x128xbf16>, vector<128x512xbf16>, vector<8x512xf32> -> vector<8x512xf32>
      %287 = arith.addf %283, %286 : vector<8x512xf32>
      %288 = vector.extract_strided_slice %287 {offsets = [0, 0], sizes = [8, 128], strides = [1, 1]} : vector<8x512xf32> to vector<8x128xf32>
      %cst_154 = arith.constant 5.000000e-01 : f32
      %289 = vector.broadcast %cst_154 : f32 to vector<8x128xf32>
      %290 = arith.mulf %289, %288 : vector<8x128xf32>
      %291 = math.tanh %290 : vector<8x128xf32>
      %cst_155 = arith.constant 5.000000e-01 : f32
      %292 = vector.broadcast %cst_155 : f32 to vector<8x128xf32>
      %293 = arith.mulf %292, %291 : vector<8x128xf32>
      %cst_156 = arith.constant 5.000000e-01 : f32
      %294 = vector.broadcast %cst_156 : f32 to vector<8x128xf32>
      %295 = arith.addf %293, %294 : vector<8x128xf32>
      %296 = vector.extract_strided_slice %287 {offsets = [0, 128], sizes = [8, 128], strides = [1, 1]} : vector<8x512xf32> to vector<8x128xf32>
      %cst_157 = arith.constant 5.000000e-01 : f32
      %297 = vector.broadcast %cst_157 : f32 to vector<8x128xf32>
      %298 = arith.mulf %297, %296 : vector<8x128xf32>
      %299 = math.tanh %298 : vector<8x128xf32>
      %cst_158 = arith.constant 5.000000e-01 : f32
      %300 = vector.broadcast %cst_158 : f32 to vector<8x128xf32>
      %301 = arith.mulf %300, %299 : vector<8x128xf32>
      %cst_159 = arith.constant 5.000000e-01 : f32
      %302 = vector.broadcast %cst_159 : f32 to vector<8x128xf32>
      %303 = arith.addf %301, %302 : vector<8x128xf32>
      %304 = vector.extract_strided_slice %287 {offsets = [0, 256], sizes = [8, 128], strides = [1, 1]} : vector<8x512xf32> to vector<8x128xf32>
      %305 = math.tanh %304 : vector<8x128xf32>
      %306 = vector.extract_strided_slice %287 {offsets = [0, 384], sizes = [8, 128], strides = [1, 1]} : vector<8x512xf32> to vector<8x128xf32>
      %cst_160 = arith.constant 5.000000e-01 : f32
      %307 = vector.broadcast %cst_160 : f32 to vector<8x128xf32>
      %308 = arith.mulf %307, %306 : vector<8x128xf32>
      %309 = math.tanh %308 : vector<8x128xf32>
      %cst_161 = arith.constant 5.000000e-01 : f32
      %310 = vector.broadcast %cst_161 : f32 to vector<8x128xf32>
      %311 = arith.mulf %310, %309 : vector<8x128xf32>
      %cst_162 = arith.constant 5.000000e-01 : f32
      %312 = vector.broadcast %cst_162 : f32 to vector<8x128xf32>
      %313 = arith.addf %311, %312 : vector<8x128xf32>
      %c0_163 = arith.constant 0 : index
      %c0_164 = arith.constant 0 : index
      %314 = vector.load %arg6[%c0_163, %c0_164] : memref<8x128xf32, #tpu.memory_space<vmem>>, vector<8x128xf32>
      %315 = arith.mulf %303, %314 : vector<8x128xf32>
      %316 = arith.mulf %295, %305 : vector<8x128xf32>
      %317 = arith.addf %315, %316 : vector<8x128xf32>
      %318 = math.tanh %317 : vector<8x128xf32>
      %319 = arith.mulf %313, %318 : vector<8x128xf32>
      %c0_165 = arith.constant 0 : index
      %c0_166 = arith.constant 0 : index
      %320 = vector.load %arg6[%c0_165, %c0_166] : memref<8x128xf32, #tpu.memory_space<vmem>>, vector<8x128xf32>
      tpu.vector_store %arg6[%c0_165, %c0_166], %317 {strides = array<i32>} : memref<8x128xf32, #tpu.memory_space<vmem>>, vector<8x128xf32>,
      %c0_167 = arith.constant 0 : index
      %c0_168 = arith.constant 0 : index
      %321 = vector.load %arg5[%c0_167, %c0_168] : memref<8x128xf32, #tpu.memory_space<vmem>>, vector<8x128xf32>
      tpu.vector_store %arg5[%c0_167, %c0_168], %319 {strides = array<i32>} : memref<8x128xf32, #tpu.memory_space<vmem>>, vector<8x128xf32>,
      %322 = arith.truncf %319 : vector<8x128xf32> to vector<8x128xbf16>
      %c0_169 = arith.constant 0 : index
      %c1_170 = arith.constant 1 : index
      %c0_171 = arith.constant 0 : index
      %c0_172 = arith.constant 0 : index
      %323 = vector.load %arg4[%c0_169, %c1_170, %c0_171, %c0_172] : memref<1x8x8x128xbf16, #tpu.memory_space<vmem>>, vector<1x1x8x128xbf16>
      %324 = vector.shape_cast %323 : vector<1x1x8x128xbf16> to vector<8x128xbf16>
      %325 = vector.shape_cast %322 : vector<8x128xbf16> to vector<1x1x8x128xbf16>
      tpu.vector_store %arg4[%c0_169, %c1_170, %c0_171, %c0_172], %325 {strides = array<i32>} : memref<1x8x8x128xbf16, #tpu.memory_space<vmem>>, vector<1x1x8x128xbf16>,
      %c0_173 = arith.constant 0 : index
      %c0_174 = arith.constant 0 : index
      %c0_175 = arith.constant 0 : index
      %326 = vector.load %arg2[%c0_173, %c0_174, %c0_175] : memref<8x8x512xbf16, #tpu.memory_space<vmem>>, vector<1x8x512xbf16>
      %327 = vector.shape_cast %326 : vector<1x8x512xbf16> to vector<8x512xbf16>
      %328 = arith.extf %327 : vector<8x512xbf16> to vector<8x512xf32>
      %c0_176 = arith.constant 0 : index
      %c0_177 = arith.constant 0 : index
      %329 = vector.load %arg5[%c0_176, %c0_177] : memref<8x128xf32, #tpu.memory_space<vmem>>, vector<8x128xf32>
      %330 = arith.truncf %329 : vector<8x128xf32> to vector<8x128xbf16>
      %cst_178 = arith.constant dense<0.000000e+00> : vector<8x512xf32>
      %331 = tpu.matmul %330, %4, %cst_178 {dimension_numbers = #tpu.dot_dimension_numbers<[1], [0], [0], [1], [0, 0, 1, 1], [], []>} : vector<8x128xbf16>, vector<128x512xbf16>, vector<8x512xf32> -> vector<8x512xf32>
      %332 = arith.addf %328, %331 : vector<8x512xf32>
      %333 = vector.extract_strided_slice %332 {offsets = [0, 0], sizes = [8, 128], strides = [1, 1]} : vector<8x512xf32> to vector<8x128xf32>
      %cst_179 = arith.constant 5.000000e-01 : f32
      %334 = vector.broadcast %cst_179 : f32 to vector<8x128xf32>
      %335 = arith.mulf %334, %333 : vector<8x128xf32>
      %336 = math.tanh %335 : vector<8x128xf32>
      %cst_180 = arith.constant 5.000000e-01 : f32
      %337 = vector.broadcast %cst_180 : f32 to vector<8x128xf32>
      %338 = arith.mulf %337, %336 : vector<8x128xf32>
      %cst_181 = arith.constant 5.000000e-01 : f32
      %339 = vector.broadcast %cst_181 : f32 to vector<8x128xf32>
      %340 = arith.addf %338, %339 : vector<8x128xf32>
      %341 = vector.extract_strided_slice %332 {offsets = [0, 128], sizes = [8, 128], strides = [1, 1]} : vector<8x512xf32> to vector<8x128xf32>
      %cst_182 = arith.constant 5.000000e-01 : f32
      %342 = vector.broadcast %cst_182 : f32 to vector<8x128xf32>
      %343 = arith.mulf %342, %341 : vector<8x128xf32>
      %344 = math.tanh %343 : vector<8x128xf32>
      %cst_183 = arith.constant 5.000000e-01 : f32
      %345 = vector.broadcast %cst_183 : f32 to vector<8x128xf32>
      %346 = arith.mulf %345, %344 : vector<8x128xf32>
      %cst_184 = arith.constant 5.000000e-01 : f32
      %347 = vector.broadcast %cst_184 : f32 to vector<8x128xf32>
      %348 = arith.addf %346, %347 : vector<8x128xf32>
      %349 = vector.extract_strided_slice %332 {offsets = [0, 256], sizes = [8, 128], strides = [1, 1]} : vector<8x512xf32> to vector<8x128xf32>
      %350 = math.tanh %349 : vector<8x128xf32>
      %351 = vector.extract_strided_slice %332 {offsets = [0, 384], sizes = [8, 128], strides = [1, 1]} : vector<8x512xf32> to vector<8x128xf32>
      %cst_185 = arith.constant 5.000000e-01 : f32
      %352 = vector.broadcast %cst_185 : f32 to vector<8x128xf32>
      %353 = arith.mulf %352, %351 : vector<8x128xf32>
      %354 = math.tanh %353 : vector<8x128xf32>
      %cst_186 = arith.constant 5.000000e-01 : f32
      %355 = vector.broadcast %cst_186 : f32 to vector<8x128xf32>
      %356 = arith.mulf %355, %354 : vector<8x128xf32>
      %cst_187 = arith.constant 5.000000e-01 : f32
      %357 = vector.broadcast %cst_187 : f32 to vector<8x128xf32>
      %358 = arith.addf %356, %357 : vector<8x128xf32>
      %c0_188 = arith.constant 0 : index
      %c0_189 = arith.constant 0 : index
      %359 = vector.load %arg6[%c0_188, %c0_189] : memref<8x128xf32, #tpu.memory_space<vmem>>, vector<8x128xf32>
      %360 = arith.mulf %348, %359 : vector<8x128xf32>
      %361 = arith.mulf %340, %350 : vector<8x128xf32>
      %362 = arith.addf %360, %361 : vector<8x128xf32>
      %363 = math.tanh %362 : vector<8x128xf32>
      %364 = arith.mulf %358, %363 : vector<8x128xf32>
      %c0_190 = arith.constant 0 : index
      %c0_191 = arith.constant 0 : index
      %365 = vector.load %arg6[%c0_190, %c0_191] : memref<8x128xf32, #tpu.memory_space<vmem>>, vector<8x128xf32>
      tpu.vector_store %arg6[%c0_190, %c0_191], %362 {strides = array<i32>} : memref<8x128xf32, #tpu.memory_space<vmem>>, vector<8x128xf32>,
      %c0_192 = arith.constant 0 : index
      %c0_193 = arith.constant 0 : index
      %366 = vector.load %arg5[%c0_192, %c0_193] : memref<8x128xf32, #tpu.memory_space<vmem>>, vector<8x128xf32>
      tpu.vector_store %arg5[%c0_192, %c0_193], %364 {strides = array<i32>} : memref<8x128xf32, #tpu.memory_space<vmem>>, vector<8x128xf32>,
      %367 = arith.truncf %364 : vector<8x128xf32> to vector<8x128xbf16>
      %c0_194 = arith.constant 0 : index
      %c0_195 = arith.constant 0 : index
      %c0_196 = arith.constant 0 : index
      %c0_197 = arith.constant 0 : index
      %368 = vector.load %arg4[%c0_194, %c0_195, %c0_196, %c0_197] : memref<1x8x8x128xbf16, #tpu.memory_space<vmem>>, vector<1x1x8x128xbf16>
      %369 = vector.shape_cast %368 : vector<1x1x8x128xbf16> to vector<8x128xbf16>
      %370 = vector.shape_cast %367 : vector<8x128xbf16> to vector<1x1x8x128xbf16>
      tpu.vector_store %arg4[%c0_194, %c0_195, %c0_196, %c0_197], %370 {strides = array<i32>} : memref<1x8x8x128xbf16, #tpu.memory_space<vmem>>, vector<1x1x8x128xbf16>,
    } else {
    }
    return
  }
  func.func @transform_0(%arg0: i32, %arg1: i32) -> (i32, i32, i32) {
    %c2_i32 = arith.constant 2 : i32
    %0 = arith.muli %c2_i32, %arg1 : i32
    %c0_i32 = arith.constant 0 : i32
    %1 = arith.subi %c0_i32, %0 : i32
    %2 = arith.muli %arg0, %1 : i32
    %3 = arith.addi %arg1, %2 : i32
    %c0_i32_0 = arith.constant 0 : i32
    %c0_i32_1 = arith.constant 0 : i32
    return %3, %c0_i32_0, %arg0 : i32, i32, i32
  }
  func.func @transform_1(%arg0: i32, %arg1: i32) -> (i32, i32, i32) {
    %c0_i32 = arith.constant 0 : i32
    %c0_i32_0 = arith.constant 0 : i32
    %c0_i32_1 = arith.constant 0 : i32
    return %arg0, %c0_i32, %c0_i32_0 : i32, i32, i32
  }
  func.func @transform_2(%arg0: i32, %arg1: i32) -> (i32, i32, i32, i32) {
    %c2_i32 = arith.constant 2 : i32
    %0 = arith.muli %c2_i32, %arg1 : i32
    %c0_i32 = arith.constant 0 : i32
    %1 = arith.subi %c0_i32, %0 : i32
    %2 = arith.muli %arg0, %1 : i32
    %3 = arith.addi %arg1, %2 : i32
    %c0_i32_0 = arith.constant 0 : i32
    %c0_i32_1 = arith.constant 0 : i32
    %c0_i32_2 = arith.constant 0 : i32
    return %arg0, %3, %c0_i32_0, %c0_i32_1 : i32, i32, i32, i32
  }
}

module attributes {stable_mosaic.version = 11 : i64} {
  func.func @_dual_matmul_bias_kernel(%arg0: i32, %arg1: memref<2x16x128xbf16, #tpu.memory_space<vmem>>, %arg2: memref<2x128x128xbf16, #tpu.memory_space<vmem>>, %arg3: memref<1x128xf32, #tpu.memory_space<vmem>>, %arg4: memref<16x128xf32, #tpu.memory_space<vmem>>) attributes {dimension_semantics = [#tpu.dimension_semantics<parallel>], iteration_bounds = array<i64: 4>, scalar_prefetch = 0 : i64, scratch_operands = 0 : i64, tpu.core_type = #tpu.core_type<tc>, window_params = [{transform_indices = @transform_0, window_bounds = array<i64: 2, 16, 128>}, {pipeline_mode = #tpu.pipeline_mode<synchronous>, transform_indices = @transform_1, window_bounds = array<i64: 2, 128, 128>}, {pipeline_mode = #tpu.pipeline_mode<synchronous>, transform_indices = @transform_2, window_bounds = array<i64: 1, 128>}, {transform_indices = @transform_3, window_bounds = array<i64: 16, 128>}]} {
    %c0 = arith.constant 0 : index
    %c0_0 = arith.constant 0 : index
    %c0_1 = arith.constant 0 : index
    %0 = vector.load %arg1[%c0, %c0_0, %c0_1] : memref<2x16x128xbf16, #tpu.memory_space<vmem>>, vector<1x16x128xbf16>
    %1 = vector.shape_cast %0 : vector<1x16x128xbf16> to vector<16x128xbf16>
    %c0_2 = arith.constant 0 : index
    %c0_3 = arith.constant 0 : index
    %c0_4 = arith.constant 0 : index
    %2 = vector.load %arg2[%c0_2, %c0_3, %c0_4] : memref<2x128x128xbf16, #tpu.memory_space<vmem>>, vector<1x128x128xbf16>
    %3 = vector.shape_cast %2 : vector<1x128x128xbf16> to vector<128x128xbf16>
    %cst = arith.constant dense<0.000000e+00> : vector<16x128xf32>
    %4 = tpu.matmul %1, %3, %cst {dimension_numbers = #tpu.dot_dimension_numbers<[1], [0], [0], [1], [0, 0, 1, 1], [], []>} : vector<16x128xbf16>, vector<128x128xbf16>, vector<16x128xf32> -> vector<16x128xf32>
    %c1 = arith.constant 1 : index
    %c0_5 = arith.constant 0 : index
    %c0_6 = arith.constant 0 : index
    %5 = vector.load %arg1[%c1, %c0_5, %c0_6] : memref<2x16x128xbf16, #tpu.memory_space<vmem>>, vector<1x16x128xbf16>
    %6 = vector.shape_cast %5 : vector<1x16x128xbf16> to vector<16x128xbf16>
    %c1_7 = arith.constant 1 : index
    %c0_8 = arith.constant 0 : index
    %c0_9 = arith.constant 0 : index
    %7 = vector.load %arg2[%c1_7, %c0_8, %c0_9] : memref<2x128x128xbf16, #tpu.memory_space<vmem>>, vector<1x128x128xbf16>
    %8 = vector.shape_cast %7 : vector<1x128x128xbf16> to vector<128x128xbf16>
    %cst_10 = arith.constant dense<0.000000e+00> : vector<16x128xf32>
    %9 = tpu.matmul %6, %8, %cst_10 {dimension_numbers = #tpu.dot_dimension_numbers<[1], [0], [0], [1], [0, 0, 1, 1], [], []>} : vector<16x128xbf16>, vector<128x128xbf16>, vector<16x128xf32> -> vector<16x128xf32>
    %10 = arith.addf %4, %9 : vector<16x128xf32>
    %c0_11 = arith.constant 0 : index
    %c0_12 = arith.constant 0 : index
    %11 = vector.load %arg3[%c0_11, %c0_12] : memref<1x128xf32, #tpu.memory_space<vmem>>, vector<1x128xf32>
    %12 = vector.broadcast %11 : vector<1x128xf32> to vector<16x128xf32>
    %13 = arith.addf %10, %12 : vector<16x128xf32>
    %c0_13 = arith.constant 0 : index
    %c0_14 = arith.constant 0 : index
    %14 = vector.load %arg4[%c0_13, %c0_14] : memref<16x128xf32, #tpu.memory_space<vmem>>, vector<16x128xf32>
    tpu.vector_store %arg4[%c0_13, %c0_14], %13 {strides = array<i32>} : memref<16x128xf32, #tpu.memory_space<vmem>>, vector<16x128xf32>,
    return
  }
  func.func @transform_0(%arg0: i32) -> (i32, i32, i32) {
    %c0_i32 = arith.constant 0 : i32
    %c0_i32_0 = arith.constant 0 : i32
    %c0_i32_1 = arith.constant 0 : i32
    return %c0_i32, %arg0, %c0_i32_0 : i32, i32, i32
  }
  func.func @transform_1(%arg0: i32) -> (i32, i32, i32) {
    %c0_i32 = arith.constant 0 : i32
    %c0_i32_0 = arith.constant 0 : i32
    %c0_i32_1 = arith.constant 0 : i32
    %c0_i32_2 = arith.constant 0 : i32
    return %c0_i32, %c0_i32_0, %c0_i32_1 : i32, i32, i32
  }
  func.func @transform_2(%arg0: i32) -> (i32, i32) {
    %c0_i32 = arith.constant 0 : i32
    %c0_i32_0 = arith.constant 0 : i32
    %c0_i32_1 = arith.constant 0 : i32
    return %c0_i32, %c0_i32_0 : i32, i32
  }
  func.func @transform_3(%arg0: i32) -> (i32, i32) {
    %c0_i32 = arith.constant 0 : i32
    %c0_i32_0 = arith.constant 0 : i32
    return %arg0, %c0_i32 : i32, i32
  }
}

</mosaic_0001>

<bundles_post_ra>
// kernel: bidirectional_lstm.3
= control target key start
LH: loop header
LB: loop body
LE: loop exit
PB: predicated region body
PF: predicated region fallthrough
CT: control target
= control target key end

     0   :  { %s1030_s12 = smov 0   ;;  %s1269_s0 = inlined_call_operand.vmem [shape: bf16[64,128], index: 0, kind: input, shape index: {}]   ;;  %s1270_s1 = inlined_call_operand.vmem [shape: bf16[128,1024], index: 1, kind: input, shape index: {}]   ;;  %s1271_s2 = inlined_call_operand.vmem [shape: f32[1,1024], index: 2, kind: input, shape index: {}]   ;;  %s1272_s3 = inlined_call_operand.vmem [shape: bf16[64,1024], index: 3, kind: output, shape index: {}]  }
   0x1 LB: > { %s897_s13 = sadd.s32 4294967295, %s1007_s12   ;;  %p901_p0 = scmp.ge.s32.totalorder %s1007_s12, 1  ;;  %s1007_s12 = sphi %s1030_s12, %s13_s12  }
   0x2   : > { %p138_p1 = scmp.lt.s32.totalorder %s1007_s12, 5 }
   0x4   : > { %p139_p2 = pnand %p901_p0, %p138_p1 }
   0x5   : > { %v179_v0 = vld [vmem:[%s1270_s1] sm:$0xff] (!%p139_p2)  ;;  %v180_v2 = vld [vmem:[%s1270_s1 + $0x8] sm:$0xff] (!%p139_p2)  ;;  %s902_s20 = sshll.u32 (!%p139_p2), %s897_s13, 1  ;;  %v1009_v8 = vmov (!%p139_p2), 0   ;;  %v181_v63 = vld [vmem:[%s1270_s1 + $0x10] sm:$0xff] (!%p139_p2) }
   0x6   : > { %142 = sbr.rel (%p139_p2) target bundleno = 293 (0x125), region = 32  ;;  %v183_v1 = vld [vmem:[%s1270_s1 + $0x20] sm:$0xff] (!%p139_p2)  ;;  %v184_v4 = vld [vmem:[%s1270_s1 + $0x28] sm:$0xff] (!%p139_p2)  ;;  %643 = vmatprep.mubr.bf16.mxu0 (!%p139_p2), %v1009_v8  ;;  %686 = vmatprep.mubr.bf16.mxu1 (!%p139_p2), %v1009_v8  ;;  %p164_p3 = scmp.lt.s32.totalorder (!%p139_p2), %s902_s20, 7 }
   0x7   : > { %v909_v3 = vcombine.high (!%p139_p2), %v179_v0, %v183_v1  ;;  %v908_v5 = vcombine.low (!%p139_p2), %v179_v0, %v183_v1  ;;  %v187_v6 = vld [vmem:[%s1270_s1 + $0x40] sm:$0xff] (!%p139_p2)  ;;  %v911_v9 = vcombine.high (!%p139_p2), %v180_v2, %v184_v4  ;;  %v910_v10 = vcombine.low (!%p139_p2), %v180_v2, %v184_v4  ;;  %v188_v12 = vld [vmem:[%s1270_s1 + $0x48] sm:$0xff] (!%p139_p2)  ;;  %v185_v0 = vld [vmem:[%s1270_s1 + $0x30] sm:$0xff] (!%p139_p2) }
   0x8   : > { %v191_v7 = vld [vmem:[%s1270_s1 + $0x60] sm:$0xff] (!%p139_p2)  ;;  %v192_v13 = vld [vmem:[%s1270_s1 + $0x68] sm:$0xff] (!%p139_p2)  ;;  %v182_v1 = vld [vmem:[%s1270_s1 + $0x18] sm:$0xff] (!%p139_p2) }
   0x9   : > { %v917_v11 = vcombine.high (!%p139_p2), %v187_v6, %v191_v7  ;;  %v195_v14 = vld [vmem:[%s1270_s1 + $0x80] sm:$0xff] (!%p139_p2)  ;;  %611 = vmatprep.subr.bf16.mxu0 (!%p139_p2), %v909_v3  ;;  %v919_v15 = vcombine.high (!%p139_p2), %v188_v12, %v192_v13  ;;  %v196_v17 = vld [vmem:[%s1270_s1 + $0x88] sm:$0xff] (!%p139_p2)  ;;  %654 = vmatprep.subr.bf16.mxu1 (!%p139_p2), %v911_v9  ;;  %v916_v19 = vcombine.low (!%p139_p2), %v187_v6, %v191_v7  ;;  %v186_v2 = vld [vmem:[%s1270_s1 + $0x38] sm:$0xff] (!%p139_p2) }
   0xa   : > { %v199_v16 = vld [vmem:[%s1270_s1 + $0xa0] sm:$0xff] (!%p139_p2)  ;;  %v200_v18 = vld [vmem:[%s1270_s1 + $0xa8] sm:$0xff] (!%p139_p2)  ;;  %612 = vmatpush1.bf16.msra.mxu0 (!%p139_p2), %v908_v5  ;;  %655 = vmatpush1.bf16.msra.mxu1 (!%p139_p2), %v910_v10  ;;  %v918_v20 = vcombine.low (!%p139_p2), %v188_v12, %v192_v13  ;;  %v913_v5 = vcombine.high (!%p139_p2), %v181_v63, %v185_v0  ;;  %v915_v6 = vcombine.high (!%p139_p2), %v182_v1, %v186_v2  ;;  %v189_v7 = vld [vmem:[%s1270_s1 + $0x50] sm:$0xff] (!%p139_p2) }
   0xb   : > { %613 = vmatprep.subr.bf16.mxu0 (!%p139_p2), %v917_v11  ;;  %v925_v21 = vcombine.high (!%p139_p2), %v195_v14, %v199_v16  ;;  %656 = vmatprep.subr.bf16.mxu1 (!%p139_p2), %v919_v15  ;;  %v927_v22 = vcombine.high (!%p139_p2), %v196_v17, %v200_v18  ;;  %v203_v23 = vld [vmem:[%s1270_s1 + $0xc0] sm:$0xff] (!%p139_p2)  ;;  %v204_v25 = vld [vmem:[%s1270_s1 + $0xc8] sm:$0xff] (!%p139_p2)  ;;  %v924_v27 = vcombine.low (!%p139_p2), %v195_v14, %v199_v16  ;;  %v193_v9 = vld [vmem:[%s1270_s1 + $0x70] sm:$0xff] (!%p139_p2) }
   0xc   : > { %v207_v24 = vld [vmem:[%s1270_s1 + $0xe0] sm:$0xff] (!%p139_p2)  ;;  %v208_v26 = vld [vmem:[%s1270_s1 + $0xe8] sm:$0xff] (!%p139_p2)  ;;  %v926_v28 = vcombine.low (!%p139_p2), %v196_v17, %v200_v18  ;;  %v190_v11 = vld [vmem:[%s1270_s1 + $0x58] sm:$0xff] (!%p139_p2)  ;;  %v912_v13 = vcombine.low (!%p139_p2), %v181_v63, %v185_v0  ;;  %v914_v14 = vcombine.low (!%p139_p2), %v182_v1, %v186_v2  ;;  %v921_v15 = vcombine.high (!%p139_p2), %v189_v7, %v193_v9 }
   0xd   : > { %s1274_s20 = smov (!%p164_p3, %s902_s20), 7  ;;  %v933_v29 = vcombine.high %v203_v23, %v207_v24  ;;  %v935_v30 = vcombine.high %v204_v25, %v208_v26  ;;  %v211_v31 = vld [vmem:[%s1270_s1 + $0x100] sm:$0xff]  ;;  %v212_v33 = vld [vmem:[%s1270_s1 + $0x108] sm:$0xff]  ;;  %v932_v35 = vcombine.low %v203_v23, %v207_v24  ;;  %v934_v36 = vcombine.low %v204_v25, %v208_v26  ;;  %v194_v12 = vld [vmem:[%s1270_s1 + $0x78] sm:$0xff] }
   0xe   : > { %s903_s17 = sshll.u32 %s1274_s20, 2  ;;  %614 = vmatpush1.bf16.msra.mxu0 %v916_v19  ;;  %657 = vmatpush1.bf16.msra.mxu1 %v918_v20  ;;  %v215_v32 = vld [vmem:[%s1270_s1 + $0x120] sm:$0xff]  ;;  %v216_v34 = vld [vmem:[%s1270_s1 + $0x128] sm:$0xff]  ;;  %v923_v16 = vcombine.high %v190_v11, %v194_v12  ;;  %v197_v17 = vld [vmem:[%s1270_s1 + $0x90] sm:$0xff]  ;;  %v245_v2 = vlaneseq  ;;  %s982_s26 = sshll.u32 %s1274_s20, 5 }
   0xf   : > { %615 = vmatprep.subr.bf16.mxu0 %v925_v21  ;;  %s1094_s25 = scalar_lea.vmem %s1269_s0, %s903_s17  ;;  %658 = vmatprep.subr.bf16.mxu1 %v927_v22  ;;  %v941_v37 = vcombine.high %v211_v31, %v215_v32  ;;  %v943_v38 = vcombine.high %v212_v33, %v216_v34  ;;  %v219_v39 = vld [vmem:[%s1270_s1 + $0x140] sm:$0xff]  ;;  %v220_v41 = vld [vmem:[%s1270_s1 + $0x148] sm:$0xff]  ;;  %v940_v43 = vcombine.low %v211_v31, %v215_v32  ;;  %v201_v18 = vld [vmem:[%s1270_s1 + $0xb0] sm:$0xff]  ;;  %s1256_s28 = scalar_lea.vmem %s1272_s3, %s982_s26 }
  0x10   : > { %v223_v40 = vld [vmem:[%s1270_s1 + $0x160] sm:$0xff]  ;;  %v224_v42 = vld [vmem:[%s1270_s1 + $0x168] sm:$0xff]  ;;  %v942_v44 = vcombine.low %v212_v33, %v216_v34  ;;  %v198_v19 = vld [vmem:[%s1270_s1 + $0x98] sm:$0xff]  ;;  %v920_v21 = vcombine.low %v189_v7, %v193_v9  ;;  %v922_v22 = vcombine.low %v190_v11, %v194_v12  ;;  %v929_v23 = vcombine.high %v197_v17, %v201_v18 }
  0x11   : > { %v949_v45 = vcombine.high %v219_v39, %v223_v40  ;;  %v951_v46 = vcombine.high %v220_v41, %v224_v42  ;;  %v227_v47 = vld [vmem:[%s1270_s1 + $0x180] sm:$0xff]  ;;  %v228_v49 = vld [vmem:[%s1270_s1 + $0x188] sm:$0xff]  ;;  %v948_v51 = vcombine.low %v219_v39, %v223_v40  ;;  %v950_v52 = vcombine.low %v220_v41, %v224_v42  ;;  %v202_v20 = vld [vmem:[%s1270_s1 + $0xb8] sm:$0xff] }
  0x12   : > { %616 = vmatpush1.bf16.msra.mxu0 %v924_v27  ;;  %659 = vmatpush1.bf16.msra.mxu1 %v926_v28  ;;  %v231_v48 = vld [vmem:[%s1270_s1 + $0x1a0] sm:$0xff]  ;;  %v232_v50 = vld [vmem:[%s1270_s1 + $0x1a8] sm:$0xff]  ;;  %v931_v24 = vcombine.high %v198_v19, %v202_v20  ;;  %v205_v25 = vld [vmem:[%s1270_s1 + $0xd0] sm:$0xff] }
  0x13   : > { %617 = vmatprep.subr.bf16.mxu0 %v933_v29  ;;  %660 = vmatprep.subr.bf16.mxu1 %v935_v30  ;;  %v957_v53 = vcombine.high %v227_v47, %v231_v48  ;;  %v959_v54 = vcombine.high %v228_v49, %v232_v50  ;;  %v235_v55 = vld [vmem:[%s1270_s1 + $0x1c0] sm:$0xff]  ;;  %v236_v57 = vld [vmem:[%s1270_s1 + $0x1c8] sm:$0xff]  ;;  %v956_v59 = vcombine.low %v227_v47, %v231_v48  ;;  %v209_v26 = vld [vmem:[%s1270_s1 + $0xf0] sm:$0xff] }
  0x14   : > { %v239_v56 = vld [vmem:[%s1270_s1 + $0x1e0] sm:$0xff]  ;;  %v240_v58 = vld [vmem:[%s1270_s1 + $0x1e8] sm:$0xff]  ;;  %v958_v60 = vcombine.low %v228_v49, %v232_v50  ;;  %v206_v27 = vld [vmem:[%s1270_s1 + $0xd8] sm:$0xff]  ;;  %v928_v29 = vcombine.low %v197_v17, %v201_v18  ;;  %v930_v30 = vcombine.low %v198_v19, %v202_v20  ;;  %v937_v31 = vcombine.high %v205_v25, %v209_v26 }
  0x15   : > { %v965_v61 = vcombine.high %v235_v55, %v239_v56  ;;  %v967_v62 = vcombine.high %v236_v57, %v240_v58  ;;  %v964_v3 = vcombine.low %v235_v55, %v239_v56  ;;  %v966_v4 = vcombine.low %v236_v57, %v240_v58  ;;  %v1163_v10 = vld [vmem:[%s1094_s25] sm:$0xff]   ;;  %v210_v28 = vld [vmem:[%s1270_s1 + $0xf8] sm:$0xff]  ;;  %v213_v33 = vld [vmem:[%s1270_s1 + $0x110] sm:$0xff] }
  0x16   : > { %618 = vmatpush1.bf16.msra.mxu0 %v932_v35  ;;  %661 = vmatpush1.bf16.msra.mxu1 %v934_v36  ;;  %v939_v32 = vcombine.high %v206_v27, %v210_v28  ;;  %v217_v34 = vld [vmem:[%s1270_s1 + $0x130] sm:$0xff]  ;;  %v218_v35 = vld [vmem:[%s1270_s1 + $0x138] sm:$0xff]  ;;  %v936_v36 = vcombine.low %v205_v25, %v209_v26 }
  0x17   : > { %619 = vmatprep.subr.bf16.mxu0 %v941_v37  ;;  %662 = vmatprep.subr.bf16.mxu1 %v943_v38  ;;  %v938_v37 = vcombine.low %v206_v27, %v210_v28  ;;  %v945_v38 = vcombine.high %v213_v33, %v217_v34  ;;  %v221_v40 = vld [vmem:[%s1270_s1 + $0x150] sm:$0xff]  ;;  %v222_v42 = vld [vmem:[%s1270_s1 + $0x158] sm:$0xff] }
  0x18   : > { %v225_v41 = vld [vmem:[%s1270_s1 + $0x170] sm:$0xff]  ;;  %v230_v50 = vld [vmem:[%s1270_s1 + $0x198] sm:$0xff] }
  0x19   : > { %v229_v48 = vld [vmem:[%s1270_s1 + $0x190] sm:$0xff]  ;;  %v238_v58 = vld [vmem:[%s1270_s1 + $0x1d8] sm:$0xff] }
  0x1a   : > { %620 = vmatpush1.bf16.msra.mxu0 %v940_v43  ;;  %663 = vmatpush1.bf16.msra.mxu1 %v942_v44  ;;  %v226_v43 = vld [vmem:[%s1270_s1 + $0x178] sm:$0xff]  ;;  %v944_v44 = vcombine.low %v213_v33, %v217_v34  ;;  %v233_v49 = vld [vmem:[%s1270_s1 + $0x1b0] sm:$0xff] }
  0x1b   : > { %621 = vmatprep.subr.bf16.mxu0 %v949_v45  ;;  %664 = vmatprep.subr.bf16.mxu1 %v951_v46  ;;  %v953_v46 = vcombine.high %v221_v40, %v225_v41  ;;  %v955_v47 = vcombine.high %v222_v42, %v226_v43  ;;  %v237_v56 = vld [vmem:[%s1270_s1 + $0x1d0] sm:$0xff] }
  0x1c   : > { %v241_v57 = vld [vmem:[%s1270_s1 + $0x1f0] sm:$0xff] }
  0x1d   : > { %v968_v0 = vcombine.low %v237_v56, %v241_v57 }
  0x1e   : > { %622 = vmatpush1.bf16.msra.mxu0 %v948_v51  ;;  %665 = vmatpush1.bf16.msra.mxu1 %v950_v52  ;;  %v234_v51 = vld [vmem:[%s1270_s1 + $0x1b8] sm:$0xff]  ;;  %v952_v52 = vcombine.low %v221_v40, %v225_v41 }
  0x1f   : > { %623 = vmatprep.subr.bf16.mxu0 %v957_v53  ;;  %666 = vmatprep.subr.bf16.mxu1 %v959_v54  ;;  %v954_v53 = vcombine.low %v222_v42, %v226_v43  ;;  %v961_v54 = vcombine.high %v229_v48, %v233_v49  ;;  %v963_v55 = vcombine.high %v230_v50, %v234_v51 }
  0x22   : > { %624 = vmatpush1.bf16.msra.mxu0 %v956_v59  ;;  %667 = vmatpush1.bf16.msra.mxu1 %v958_v60  ;;  %v242_v59 = vld [vmem:[%s1270_s1 + $0x1f8] sm:$0xff]  ;;  %v960_v60 = vcombine.low %v229_v48, %v233_v49 }
  0x23   : > { %625 = vmatprep.subr.bf16.mxu0 %v965_v61  ;;  %668 = vmatprep.subr.bf16.mxu1 %v967_v62  ;;  %v962_v61 = vcombine.low %v230_v50, %v234_v51  ;;  %v969_v62 = vcombine.high %v237_v56, %v241_v57  ;;  %v971_v63 = vcombine.high %v238_v58, %v242_v59 }
  0x24   : > { %v970_v1 = vcombine.low %v238_v58, %v242_v59 }
  0x26   : > { %626 = vmatpush1.bf16.msra.mxu0 %v964_v3  ;;  %669 = vmatpush1.bf16.msra.mxu1 %v966_v4  ;;  %v246_v3 = vshrl.u32 %v245_v2, 7 }
  0x27   : > { %697 = vmatprep.subr.bf16.mxu0 %v913_v5  ;;  %740 = vmatprep.subr.bf16.mxu1 %v915_v6  ;;  %v243_v5 = vld [vmem:[%s1271_s2] sm:$0xff] }
  0x28   : > { %v247_v4 = vsub.s32 0, %v246_v3  ;;  %v255_v6 = vsub.s32 2, %v246_v3  ;;  %v251_v7 = vsub.s32 1, %v246_v3  ;;  %v259_v9 = vsub.s32 3, %v246_v3 }
  0x29   : > { %644 = vmatmul.mubr.bf16.vlgmr.msra.gmra.mrb[0].mxu0 %v1163_v10  ;;  %687 = vmatmul.mubr.bf16.vlgmr.msra.gmra.mrb[0].mxu1 %v1163_v10  ;;  %v263_v34 = vsub.s32 4, %v246_v3 }
  0x2a   : > { %698 = vmatpush1.bf16.msra.mxu0 %v912_v13  ;;  %741 = vmatpush1.bf16.msra.mxu1 %v914_v14  ;;  %v248_v11 = vrot.slane %v243_v5, %v247_v4  ;;  %v256_v12 = vrot.slane %v243_v5, %v255_v6  ;;  %v252_v13 = vrot.slane %v243_v5, %v251_v7 }
  0x2b   : > { %699 = vmatprep.subr.bf16.mxu0 %v921_v15  ;;  %742 = vmatprep.subr.bf16.mxu1 %v923_v16  ;;  %v260_v14 = vrot.slane %v243_v5, %v259_v9 }
  0x2c   : > { %729 = vmatprep.mubr.bf16.mxu0 %v1009_v8  ;;  %772 = vmatprep.mubr.bf16.mxu1 %v1009_v8  ;;  %v214_v8 = vld [vmem:[%s1270_s1 + $0x118] sm:$0xff] }
  0x2d   : > { %v947_v39 = vcombine.high %v214_v8, %v218_v35  ;;  %v946_v45 = vcombine.low %v214_v8, %v218_v35  ;;  %v271_v8 = vsub.s32 6, %v246_v3  ;;  %v267_v35 = vsub.s32 5, %v246_v3 }
  0x2e   : > { %700 = vmatpush1.bf16.msra.mxu0 %v920_v21  ;;  %743 = vmatpush1.bf16.msra.mxu1 %v922_v22 }
  0x2f   : > { %701 = vmatprep.subr.bf16.mxu0 %v929_v23  ;;  %744 = vmatprep.subr.bf16.mxu1 %v931_v24 }
  0x32   : > { %702 = vmatpush1.bf16.msra.mxu0 %v928_v29  ;;  %745 = vmatpush1.bf16.msra.mxu1 %v930_v30 }
  0x33   : > { %703 = vmatprep.subr.bf16.mxu0 %v937_v31  ;;  %746 = vmatprep.subr.bf16.mxu1 %v939_v32 }
  0x36   : > { %704 = vmatpush1.bf16.msra.mxu0 %v936_v36  ;;  %747 = vmatpush1.bf16.msra.mxu1 %v938_v37  ;;  %v275_v36 = vsub.s32 7, %v246_v3  ;;  %v264_v37 = vrot.slane %v243_v5, %v263_v34 }
  0x37   : > { %705 = vmatprep.subr.bf16.mxu0 %v945_v38  ;;  %748 = vmatprep.subr.bf16.mxu1 %v947_v39  ;;  %v272_v38 = vrot.slane %v243_v5, %v271_v8  ;;  %v268_v39 = vrot.slane %v243_v5, %v267_v35 }
  0x38   : > { %v276_v40 = vrot.slane %v243_v5, %v275_v36 }
  0x3a   : > { %706 = vmatpush1.bf16.msra.mxu0 %v944_v44  ;;  %749 = vmatpush1.bf16.msra.mxu1 %v946_v45 }
  0x3b   : > { %707 = vmatprep.subr.bf16.mxu0 %v953_v46  ;;  %750 = vmatprep.subr.bf16.mxu1 %v955_v47 }
  0x3e   : > { %708 = vmatpush1.bf16.msra.mxu0 %v952_v52  ;;  %751 = vmatpush1.bf16.msra.mxu1 %v954_v53 }
  0x3f   : > { %709 = vmatprep.subr.bf16.mxu0 %v961_v54  ;;  %752 = vmatprep.subr.bf16.mxu1 %v963_v55 }
  0x42   : > { %710 = vmatpush1.bf16.msra.mxu0 %v960_v60  ;;  %753 = vmatpush1.bf16.msra.mxu1 %v962_v61 }
  0x43   : > { %711 = vmatprep.subr.bf16.mxu0 %v969_v62  ;;  %754 = vmatprep.subr.bf16.mxu1 %v971_v63 }
  0x46   : > { %712 = vmatpush1.bf16.msra.mxu0 %v968_v0  ;;  %755 = vmatpush1.bf16.msra.mxu1 %v970_v1 }
  0x49   : > { %730 = vmatmul.mubr.bf16.vlgmr.msra.gmra.mrb[4].mxu0 %v1163_v10  ;;  %773 = vmatmul.mubr.bf16.vlgmr.msra.gmra.mrb[4].mxu1 %v1163_v10 }
  0xfc   : > { %v645_v15 = vpop.f32.mrb[0].mxu0  ;;  %v688_v17 = vpop.f32.mrb[0].mxu1 }
  0xfd   : > { %v646_v16 = vadd.f32 %v645_v15, %v248_v11  ;;  %v647_v18 = vpop.f32.mrb[1].mxu0  ;;  %v689_v10 = vadd.f32 %v688_v17, %v256_v12  ;;  %v690_v20 = vpop.f32.mrb[1].mxu1 }
  0xfe   : > { %v648_v19 = vadd.f32 %v647_v18, %v252_v13  ;;  %v649_v21 = vpop.f32.mrb[2].mxu0  ;;  %v691_v22 = vadd.f32 %v690_v20, %v260_v14  ;;  %v692_v24 = vpop.f32.mrb[2].mxu1 }
  0xff   : > { %v650_v23 = vadd.f32 %v649_v21, %v248_v11  ;;  %v651_v25 = vpop.f32.mrb[3].mxu0  ;;  %v693_v27 = vadd.f32 %v692_v24, %v256_v12  ;;  %v694_v29 = vpop.f32.mrb[3].mxu1 }
 0x100   : > { %v983_v26 = vpack.c.bf16 %v648_v19, %v646_v16  ;;  %v652_v28 = vadd.f32 %v651_v25, %v252_v13  ;;  %v984_v30 = vpack.c.bf16 %v691_v22, %v689_v10  ;;  %v695_v31 = vadd.f32 %v694_v29, %v260_v14 }
 0x102   : > { %831 = vst [vmem:[%s1256_s28] sm:$0xff] %v983_v26  ;;  %v987_v32 = vpack.c.bf16 %v652_v28, %v650_v23  ;;  %832 = vst [vmem:[%s1256_s28 + $0x8] sm:$0xff] %v984_v30  ;;  %v988_v33 = vpack.c.bf16 %v695_v31, %v693_v27 }
 0x104   : > { %835 = vst [vmem:[%s1256_s28 + $0x20] sm:$0xff] %v987_v32  ;;  %836 = vst [vmem:[%s1256_s28 + $0x28] sm:$0xff] %v988_v33 }
 0x11c   : > { %v731_v41 = vpop.f32.mrb[4].mxu0  ;;  %v774_v43 = vpop.f32.mrb[4].mxu1 }
 0x11d   : > { %v732_v42 = vadd.f32 %v731_v41, %v264_v37  ;;  %v733_v44 = vpop.f32.mrb[5].mxu0  ;;  %v775_v45 = vadd.f32 %v774_v43, %v272_v38  ;;  %v776_v47 = vpop.f32.mrb[5].mxu1 }
 0x11e   : > { %v734_v46 = vadd.f32 %v733_v44, %v268_v39  ;;  %v735_v48 = vpop.f32.mrb[6].mxu0  ;;  %v777_v49 = vadd.f32 %v776_v47, %v276_v40  ;;  %v778_v51 = vpop.f32.mrb[6].mxu1 }
 0x11f   : > { %v736_v50 = vadd.f32 %v735_v48, %v264_v37  ;;  %v737_v52 = vpop.f32.mrb[7].mxu0  ;;  %v779_v54 = vadd.f32 %v778_v51, %v272_v38  ;;  %v780_v56 = vpop.f32.mrb[7].mxu1 }
 0x120   : > { %v985_v53 = vpack.c.bf16 %v734_v46, %v732_v42  ;;  %v738_v55 = vadd.f32 %v737_v52, %v268_v39  ;;  %v986_v57 = vpack.c.bf16 %v777_v49, %v775_v45  ;;  %v781_v58 = vadd.f32 %v780_v56, %v276_v40 }
 0x122   : > { %833 = vst [vmem:[%s1256_s28 + $0x10] sm:$0xff] %v985_v53  ;;  %v989_v59 = vpack.c.bf16 %v738_v55, %v736_v50  ;;  %834 = vst [vmem:[%s1256_s28 + $0x18] sm:$0xff] %v986_v57  ;;  %v990_v60 = vpack.c.bf16 %v781_v58, %v779_v54 }
 0x124   : > { %837 = vst [vmem:[%s1256_s28 + $0x30] sm:$0xff] %v989_v59  ;;  %838 = vst [vmem:[%s1256_s28 + $0x38] sm:$0xff] %v990_v60 }
 0x125 PF: > { %s13_s12 = sadd.s32 1, %s1007_s12  }
 0x126   : > { %p10_p4 = scmp.ge.s32.totalorder %s13_s12, 6  }
 0x128   :  { %12 = sbr.rel (!%p10_p4) target bundleno = 1 (0x1), region = 62 }

// kernel: bidirectional_lstm.5
= control target key start
LH: loop header
LB: loop body
LE: loop exit
PB: predicated region body
PF: predicated region fallthrough
CT: control target
= control target key end

     0   :  { %s728_s12 = smov 0   ;;  %s730_s13 = smov 0   ;;  %s831_s0 = inlined_call_operand.vmem [shape: bf16[2,64,128], index: 0, kind: input, shape index: {}]   ;;  %s832_s1 = inlined_call_operand.vmem [shape: bf16[2,128,128], index: 1, kind: input, shape index: {}]   ;;  %s833_s2 = inlined_call_operand.vmem [shape: f32[1,128], index: 2, kind: input, shape index: {}]   ;;  %s834_s3 = inlined_call_operand.vmem [shape: f32[64,128], index: 3, kind: output, shape index: {}]  }
   0x1   :  { %s732_s14 = smov 0  }
   0x2 LB: > { %s529_s15 = sadd.s32 4294967295, %s704_s14   ;;  %s745_s16 = sadd.s32 1, %s704_s14   ;;  %s704_s14 = sphi %s732_s14, %s837_s14   ;;  %s700_s13 = sphi %s730_s13, %s836_s13   ;;  %s696_s12 = sphi %s728_s12, %s835_s12  }
   0x3   : > { %s17_s17 = ssub.s32 %s704_s14, %s745_s16  ;;  %s20_s18 = sadd.s32 1, %s700_s13 }
   0x4   : > { %p18_p0 = scmp.eq.s32.totalorder %s17_s17, 0  ;;  %p27_p1 = scmp.ne.s32.totalorder %s700_s13, %s696_s12 }
   0x5   : > { %p28_p2 = scmp.eq.s32.totalorder %s704_s14, 0  ;;  %p532_p4 = scmp.ge.s32.totalorder %s704_s14, 4 }
   0x6   : > { %s754_s19 = scalar_select %p18_p0, %s700_s13, %s20_s18  }
   0x7   : > { %p29_p3 = por %p28_p2, %p27_p1  ;;  %127 = sbr.rel (%p532_p4) target bundleno = 21 (0x15), region = 24 }
   0xe   : > { %130 = sbr.rel (!%p29_p3) target bundleno = 21 (0x15), region = 28  ;;  %s132_s20 = sand.u32 (%p29_p3), 1, %s700_s13  }
   0xf   : > { %s579_s21 = sshll.u32 (%p29_p3), %s704_s14, 3  ;;  %s533_s22 = sshll.u32 (%p29_p3), %s132_s20, 4 }
  0x10   : > { %s137_s25 = scalar_lea.vmem (%p29_p3), %s831_s0, %s579_s21  ;;  %s134_s26 = scalar_lea.vmem (%p29_p3), [#allocation2], %s533_s22 }
  0x11   : > { %v153_v0 = vld [vmem:[%s137_s25] sm:$0xff] (%p29_p3)  }
  0x12   : > { %v157_v1 = vld [vmem:[%s137_s25 + $0x20] sm:$0xff] (%p29_p3)   ;;  %154 = vst [vmem:[%s134_s26] sm:$0xff] (%p29_p3), %v153_v0  }
  0x13   : > { %158 = vst [vmem:[%s134_s26 + $0x8] sm:$0xff] (%p29_p3), %v157_v1  }
  0x15 PF: > { %p536_p5 = scmp.ge.s32.totalorder %s704_s14, 1  ;;  %p190_p6 = scmp.lt.s32.totalorder %s704_s14, 5 }
  0x17   : > { %p191_p7 = pnand %p536_p5, %p190_p6 }
  0x18   : > { %v664_v2 = vld [vmem:[%s832_s1 + $0x40] sm:$0xff] (!%p191_p7)   ;;  %v706_v3 = vmov (!%p191_p7), 0.0   ;;  %v666_v5 = vld [vmem:[%s832_s1 + $0x48] sm:$0xff] (!%p191_p7)   ;;  %vm707_vm0 = vmmov (!%p191_p7), 0   ;;  %v668_v7 = vld [vmem:[%s832_s1 + $0x50] sm:$0xff] (!%p191_p7)   ;;  %s197_s17 = sand.u32 (!%p191_p7), 1, %s696_s12  }
  0x19   : > { %194 = sbr.rel (%p191_p7) target bundleno = 277 (0x115), region = 69  ;;  %598 = vmatprep.subr.bf16.mxu0 (!%p191_p7), %v706_v3  ;;  %618 = vmatprep.subr.bf16.mxu1 (!%p191_p7), %v706_v3  ;;  %v665_v4 = vld [vmem:[%s832_s1] sm:$0xff] (!%p191_p7)   ;;  %v667_v6 = vld [vmem:[%s832_s1 + $0x8] sm:$0xff] (!%p191_p7)   ;;  %v669_v8 = vld [vmem:[%s832_s1 + $0x10] sm:$0xff] (!%p191_p7)   ;;  %s537_s23 = sshll.u32 (!%p191_p7), %s197_s17, 4 }
  0x1a   : > { %599 = vmatpush3.bf16.msra.mxu0 (!%p191_p7), %v664_v2  ;;  %614 = vmatprep.mubr.msk.bf16.mxu0 (!%p191_p7), %vm707_vm0, %v706_v3  ;;  %v670_v9 = vld [vmem:[%s832_s1 + $0x58] sm:$0xff] (!%p191_p7)   ;;  %v672_v11 = vld [vmem:[%s832_s1 + $0x60] sm:$0xff] (!%p191_p7)   ;;  %s199_s27 = scalar_lea.vmem (!%p191_p7), [#allocation2], %s537_s23  ;;  %v674_v13 = vld [vmem:[%s832_s1 + $0x68] sm:$0xff] (!%p191_p7)   ;;  %s538_s18 = sshll.u32 (!%p191_p7), %s529_s15, 1 }
  0x1b   : > { %619 = vmatpush3.bf16.msra.mxu1 (!%p191_p7), %v665_v4  ;;  %600 = vmatprep.subr.bf16.mxu0 (!%p191_p7), %v706_v3  ;;  %v671_v10 = vld [vmem:[%s832_s1 + $0x18] sm:$0xff] (!%p191_p7)   ;;  %v673_v12 = vld [vmem:[%s832_s1 + $0x20] sm:$0xff] (!%p191_p7)   ;;  %v675_v14 = vld [vmem:[%s832_s1 + $0x28] sm:$0xff] (!%p191_p7)   ;;  %p222_p8 = scmp.lt.s32.totalorder (!%p191_p7), %s538_s18, 7 }
  0x1c   : > { %620 = vmatprep.subr.bf16.mxu1 (!%p191_p7), %v706_v3  ;;  %634 = vmatprep.mubr.msk.bf16.mxu1 (!%p191_p7), %vm707_vm0, %v706_v3  ;;  %v676_v15 = vld [vmem:[%s832_s1 + $0x70] sm:$0xff] (!%p191_p7)   ;;  %v678_v17 = vld [vmem:[%s832_s1 + $0x78] sm:$0xff] (!%p191_p7)   ;;  %v576_v23 = vld [vmem:[%s833_s2] ss:$0 sm:$0xff] (!%p191_p7) }
  0x1d   : > { %v677_v16 = vld [vmem:[%s832_s1 + $0x30] sm:$0xff] (!%p191_p7)   ;;  %v679_v18 = vld [vmem:[%s832_s1 + $0x38] sm:$0xff] (!%p191_p7)  }
  0x1e   : > { %601 = vmatpush3.bf16.msra.mxu0 (!%p191_p7), %v666_v5  ;;  %v680_v19 = vld [vmem:[%s199_s27 + $0x8] sm:$0xff] (!%p191_p7)   ;;  %v681_v20 = vld [vmem:[%s199_s27] sm:$0xff] (!%p191_p7)  }
  0x1f   : > { %621 = vmatpush3.bf16.msra.mxu1 (!%p191_p7), %v667_v6  ;;  %602 = vmatprep.subr.bf16.mxu0 (!%p191_p7), %v706_v3 }
  0x20   : > { %622 = vmatprep.subr.bf16.mxu1 %v706_v3  ;;  %s839_s18 = smov (!%p222_p8, %s538_s18), 7 }
  0x21   : > { %s539_s20 = sshll.u32 %s839_s18, 3 }
  0x22   : > { %603 = vmatpush3.bf16.msra.mxu0 %v668_v7  ;;  %s225_s25 = scalar_lea.vmem %s834_s3, %s539_s20 }
  0x23   : > { %623 = vmatpush3.bf16.msra.mxu1 %v669_v8  ;;  %604 = vmatprep.subr.bf16.mxu0 %v706_v3 }
  0x24   : > { %624 = vmatprep.subr.bf16.mxu1 %v706_v3 }
  0x26   : > { %605 = vmatpush3.bf16.msra.mxu0 %v670_v9 }
  0x27   : > { %625 = vmatpush3.bf16.msra.mxu1 %v671_v10  ;;  %606 = vmatprep.subr.bf16.mxu0 %v706_v3 }
  0x28   : > { %626 = vmatprep.subr.bf16.mxu1 %v706_v3 }
  0x2a   : > { %607 = vmatpush3.bf16.msra.mxu0 %v672_v11 }
  0x2b   : > { %627 = vmatpush3.bf16.msra.mxu1 %v673_v12  ;;  %608 = vmatprep.subr.bf16.mxu0 %v706_v3 }
  0x2c   : > { %628 = vmatprep.subr.bf16.mxu1 %v706_v3 }
  0x2e   : > { %609 = vmatpush3.bf16.msra.mxu0 %v674_v13 }
  0x2f   : > { %629 = vmatpush3.bf16.msra.mxu1 %v675_v14  ;;  %610 = vmatprep.subr.bf16.mxu0 %v706_v3 }
  0x30   : > { %630 = vmatprep.subr.bf16.mxu1 %v706_v3 }
  0x32   : > { %611 = vmatpush3.bf16.msra.mxu0 %v676_v15 }
  0x33   : > { %631 = vmatpush3.bf16.msra.mxu1 %v677_v16  ;;  %612 = vmatprep.subr.bf16.mxu0 %v706_v3 }
  0x34   : > { %632 = vmatprep.subr.bf16.mxu1 %v706_v3 }
  0x36   : > { %613 = vmatpush3.bf16.msra.mxu0 %v678_v17 }
  0x37   : > { %633 = vmatpush3.bf16.msra.mxu1 %v679_v18 }
  0x39   : > { %615 = vmatmul.mubr.bf16.vlgmr.msra.gmra.mrb[0].mxu0 %v680_v19 }
  0x3a   : > { %635 = vmatmul.mubr.bf16.vlgmr.msra.gmra.mrb[0].mxu1 %v681_v20 }
 0x10c   : > { %v354_v21 = vpop.f32.mrb[0].mxu0 }
 0x10d   : > { %v449_v22 = vpop.f32.mrb[0].mxu1  ;;  %v616_v24 = vpop.f32.mrb[1].mxu0 }
 0x10e   : > { %v450_v25 = vadd.f32 %v449_v22, %v354_v21  ;;  %v636_v26 = vpop.f32.mrb[1].mxu1  ;;  %v357_v27 = vpop.f32.mrb[2].mxu0 }
 0x10f   : > { %v452_v28 = vpop.f32.mrb[2].mxu1  ;;  %v617_v29 = vpop.f32.mrb[3].mxu0 }
 0x110   : > { %v463_v30 = vadd.f32 %v576_v23, %v450_v25  ;;  %v453_v31 = vadd.f32 %v452_v28, %v357_v27  ;;  %v637_v32 = vpop.f32.mrb[3].mxu1 }
 0x112   : > { %465 = vst [vmem:[%s225_s25] sm:$0xff] %v463_v30  ;;  %v464_v33 = vadd.f32 %v576_v23, %v453_v31 }
 0x114   : > { %466 = vst [vmem:[%s225_s25 + $0x8] sm:$0xff] %v464_v33 }
 0x115 PF: > { %p10_p9 = scmp.ge.s32.totalorder %s745_s16, 6   ;;  %s835_s12 = smov %s700_s13 }
 0x116   : > { %s836_s13 = smov %s754_s19  ;;  %s837_s14 = smov %s745_s16 }
 0x117   :  { %12 = sbr.rel (!%p10_p9) target bundleno = 2 (0x2), region = 110 }

// kernel: bidirectional_lstm.4
= control target key start
LH: loop header
LB: loop body
LE: loop exit
PB: predicated region body
PF: predicated region fallthrough
CT: control target
= control target key end

     0   :  { %s3049_s9 = smov 0   ;;  %s3051_s10 = smov 0   ;;  %s4139_s0 = inlined_call_operand.vmem [shape: bf16[8,8,1024], index: 0, kind: input, shape index: {}]   ;;  %s4140_s1 = inlined_call_operand.vmem [shape: bf16[2,128,512], index: 1, kind: input, shape index: {}]   ;;  %s4141_s2 = inlined_call_operand.vmem [shape: bf16[2,8,8,128], index: 2, kind: output, shape index: {}]  }
   0x1   :  { %s3053_s11 = smov 0   ;;  %s3055_s12 = smov 0  }
   0x2   :  { %s3057_s13 = smov 0  }
   0x3 LB: > { %s24_s14 = sadd.s32 1, %s3025_s12  ;;  %p48_p1 = scmp.ne.s32.totalorder %s3017_s10, %s3013_s9  ;;  %s3029_s13 = sphi %s3057_s13, %s12_s13   ;;  %s3025_s12 = sphi %s3055_s12, %s4244_s12   ;;  %s3021_s11 = sphi %s3053_s11, %s4243_s11   ;;  %s3017_s10 = sphi %s3051_s10, %s4242_s10   ;;  %s3013_s9 = sphi %s3049_s9, %s4241_s9  }
   0x4   : > { %p26_p0 = scmp.ge.s32.totalorder %s24_s14, 2  ;;  %p49_p2 = scmp.eq.s32.totalorder %s3029_s13, 0 }
   0x5   : > { %s41_s16 = sadd.s32 1, %s3017_s10  ;;  %p2665_p5 = scmp.ge.s32.totalorder %s3029_s13, 2 }
   0x6   : > { %s4246_s14 = smov (%p26_p0, %s24_s14), 0  ;;  %p50_p3 = por %p49_p2, %p48_p1 }
   0x7   : > { %s37_s15 = ssub.s32 %s3025_s12, %s4246_s14  ;;  %136 = sbr.rel (%p2665_p5) target bundleno = 26 (0x1a), region = 16 }
   0x8   : > { %p39_p4 = scmp.eq.s32.totalorder %s37_s15, 0 }
   0xa   : > { %s3084_s17 = scalar_select %p39_p4, %s3017_s10, %s41_s16  }
   0xe   : > { %139 = sbr.rel (!%p50_p3) target bundleno = 26 (0x1a), region = 20  ;;  %s141_s18 = sand.u32 (%p50_p3), 1, %s3017_s10  }
   0xf   : > { %s2785_s19 = sshll.u32 (%p50_p3), %s3025_s12, 4  ;;  %s2666_s20 = sshll.u32 (%p50_p3), %s141_s18, 7 }
  0x10   : > { %s3092_s23 = scalar_lea.vmem (%p50_p3), %s4139_s0, %s2785_s19  ;;  %s143_s24 = scalar_lea.vmem (%p50_p3), [#allocation4], %s2666_s20 }
  0x11   : > { %v166_v0 = vld [vmem:[%s3092_s23] sm:$0xff] (%p50_p3)  ;;  %v168_v1 = vld [vmem:[%s3092_s23 + $0x8] sm:$0xff] (%p50_p3) }
  0x12   : > { %v170_v2 = vld [vmem:[%s3092_s23 + $0x20] sm:$0xff] (%p50_p3)  ;;  %167 = vst [vmem:[%s143_s24] sm:$0xff] (%p50_p3), %v166_v0  ;;  %169 = vst [vmem:[%s143_s24 + $0x8] sm:$0xff] (%p50_p3), %v168_v1  ;;  %v172_v3 = vld [vmem:[%s3092_s23 + $0x28] sm:$0xff] (%p50_p3) }
  0x13   : > { %171 = vst [vmem:[%s143_s24 + $0x10] sm:$0xff] (%p50_p3), %v170_v2  ;;  %v174_v4 = vld [vmem:[%s3092_s23 + $0x40] sm:$0xff] (%p50_p3)  ;;  %v176_v5 = vld [vmem:[%s3092_s23 + $0x48] sm:$0xff] (%p50_p3)  ;;  %173 = vst [vmem:[%s143_s24 + $0x18] sm:$0xff] (%p50_p3), %v172_v3 }
  0x14   : > { %175 = vst [vmem:[%s143_s24 + $0x20] sm:$0xff] (%p50_p3), %v174_v4  ;;  %177 = vst [vmem:[%s143_s24 + $0x28] sm:$0xff] (%p50_p3), %v176_v5  ;;  %v178_v6 = vld [vmem:[%s3092_s23 + $0x60] sm:$0xff] (%p50_p3)  ;;  %v180_v7 = vld [vmem:[%s3092_s23 + $0x68] sm:$0xff] (%p50_p3) }
  0x15   : > { %v182_v8 = vld [vmem:[%s3092_s23 + $0x80] sm:$0xff]  ;;  %179 = vst [vmem:[%s143_s24 + $0x30] sm:$0xff] %v178_v6  ;;  %181 = vst [vmem:[%s143_s24 + $0x38] sm:$0xff] %v180_v7  ;;  %v184_v9 = vld [vmem:[%s3092_s23 + $0x88] sm:$0xff] }
  0x16   : > { %183 = vst [vmem:[%s143_s24 + $0x40] sm:$0xff] %v182_v8  ;;  %v186_v10 = vld [vmem:[%s3092_s23 + $0xa0] sm:$0xff]  ;;  %v188_v11 = vld [vmem:[%s3092_s23 + $0xa8] sm:$0xff]  ;;  %185 = vst [vmem:[%s143_s24 + $0x48] sm:$0xff] %v184_v9 }
  0x17   : > { %187 = vst [vmem:[%s143_s24 + $0x50] sm:$0xff] %v186_v10  ;;  %189 = vst [vmem:[%s143_s24 + $0x58] sm:$0xff] %v188_v11  ;;  %v190_v12 = vld [vmem:[%s3092_s23 + $0xc0] sm:$0xff]  ;;  %v192_v13 = vld [vmem:[%s3092_s23 + $0xc8] sm:$0xff] }
  0x18   : > { %v194_v14 = vld [vmem:[%s3092_s23 + $0xe0] sm:$0xff]  ;;  %191 = vst [vmem:[%s143_s24 + $0x60] sm:$0xff] %v190_v12  ;;  %193 = vst [vmem:[%s143_s24 + $0x68] sm:$0xff] %v192_v13  ;;  %v196_v15 = vld [vmem:[%s3092_s23 + $0xe8] sm:$0xff] }
  0x19   : > { %195 = vst [vmem:[%s143_s24 + $0x70] sm:$0xff] %v194_v14  ;;  %197 = vst [vmem:[%s143_s24 + $0x78] sm:$0xff] %v196_v15 }
  0x1a PF: > { %p2669_p6 = scmp.ge.s32.totalorder %s3029_s13, 1  ;;  %p210_p7 = scmp.lt.s32.totalorder %s3029_s13, 3 }
  0x1c   : > { %p211_p8 = pnand %p2669_p6, %p210_p7 }
  0x1e   : > { %214 = sbr.rel (%p211_p8) target bundleno = 4131 (0x1023), region = 47 }
  0x25   : > { %s217_s25 = sand.u32 1, %s3013_s9   ;;  %p257_p9 = scmp.lt.s32.totalorder %s3021_s11, 1  ;;  %v3031_v16 = vmov 0.0  }
  0x26   : > { %s3114_s26 = sshll.u32 %s217_s25, 7  ;;  %285 = vst [vmem:[#allocation2] sm:$0xff] %v3031_v16  ;;  %286 = vst [vmem:[#allocation3] sm:$0xff] %v3031_v16  ;;  %p2675_p10 = scmp.ne.s32.totalorder %s3021_s11, 0 }
  0x27   : > { %s258_s27 = scalar_select %p257_p9, %s3021_s11, 1 }
  0x28   : > { %s3224_s8 = scalar_lea.vmem [#allocation4], %s3114_s26  ;;  %v4142_v59 = vmov (!%p2675_p10), 0  }
  0x29   : > { %s2786_s28 = sshll.u32 %s258_s27, 8  ;;  %s2787_s29 = sshll.u32 %s258_s27, 5  ;;  %523 = vmatprep.mubr.bf16.mxu0 (!%p2675_p10), %v4142_v59  ;;  %564 = vmatprep.mubr.bf16.mxu1 (!%p2675_p10), %v4142_v59 }
  0x2a   : > { %s3120_s4 = scalar_lea.vmem %s4140_s1, %s2786_s28  ;;  %s3125_s7 = scalar_lea.vmem %s4141_s2, %s2787_s29 }
  0x2b   : > { %v3128_v17 = vld [vmem:[%s3120_s4] sm:$0xff]  ;;  %v3131_v18 = vld [vmem:[%s3120_s4 + $0x8] sm:$0xff]  ;;  %v3134_v19 = vld [vmem:[%s3120_s4 + $0x10] sm:$0xff] }
  0x2c   : > { %v3137_v20 = vld [vmem:[%s3120_s4 + $0x18] sm:$0xff]  ;;  %v3140_v21 = vld [vmem:[%s3120_s4 + $0x20] sm:$0xff]  ;;  %v3143_v22 = vld [vmem:[%s3120_s4 + $0x28] sm:$0xff]  ;;  %v3229_v49 = vcombine.high (!%p2675_p10), %v3128_v17, %v3134_v19  ;;  %v3233_v50 = vcombine.low (!%p2675_p10), %v3128_v17, %v3134_v19 }
  0x2d   : > { %v3146_v23 = vld [vmem:[%s3120_s4 + $0x30] sm:$0xff]  ;;  %v3149_v24 = vld [vmem:[%s3120_s4 + $0x38] sm:$0xff]  ;;  %v3152_v25 = vld [vmem:[%s3120_s4 + $0x40] sm:$0xff]  ;;  %v3241_v52 = vcombine.high (!%p2675_p10), %v3131_v18, %v3137_v20  ;;  %v3245_v53 = vcombine.low (!%p2675_p10), %v3131_v18, %v3137_v20 }
  0x2e   : > { %4192 = vst [vmem:[#allocation5_spill] sm:$0xff] %v3152_v25  ;;  %v3155_v26 = vld [vmem:[%s3120_s4 + $0x48] sm:$0xff]  ;;  %v3158_v27 = vld [vmem:[%s3120_s4 + $0x50] sm:$0xff]  ;;  %v3161_v28 = vld [vmem:[%s3120_s4 + $0x58] sm:$0xff]  ;;  %v3237_v51 = vcombine.high (!%p2675_p10), %v3140_v21, %v3146_v23  ;;  %v3249_v54 = vcombine.high (!%p2675_p10), %v3143_v22, %v3149_v24  ;;  %491 = vmatprep.subr.bf16.mxu0 (!%p2675_p10), %v3229_v49  ;;  %v3256_v55 = vcombine.low (!%p2675_p10), %v3140_v21, %v3146_v23 }
  0x2f   : > { %4193 = vst [vmem:[#allocation6_spill] sm:$0xff] %v3155_v26  ;;  %4194 = vst [vmem:[#allocation7_spill] sm:$0xff] %v3158_v27  ;;  %v3164_v29 = vld [vmem:[%s3120_s4 + $0x60] sm:$0xff]  ;;  %v3167_v30 = vld [vmem:[%s3120_s4 + $0x68] sm:$0xff]  ;;  %532 = vmatprep.subr.bf16.mxu1 (!%p2675_p10), %v3241_v52  ;;  %492 = vmatpush1.bf16.msra.mxu0 (!%p2675_p10), %v3233_v50  ;;  %v3261_v56 = vcombine.low (!%p2675_p10), %v3143_v22, %v3149_v24  ;;  %v3266_v57 = vcombine.high (!%p2675_p10), %v3152_v25, %v3158_v27 }
  0x30   : > { %4195 = vst [vmem:[#allocation8_spill] sm:$0xff] %v3161_v28  ;;  %4196 = vst [vmem:[#allocation9_spill] sm:$0xff] %v3164_v29  ;;  %v3170_v31 = vld [vmem:[%s3120_s4 + $0x70] sm:$0xff]  ;;  %v3173_v32 = vld [vmem:[%s3120_s4 + $0x78] sm:$0xff]  ;;  %533 = vmatpush1.bf16.msra.mxu1 (!%p2675_p10), %v3245_v53  ;;  %493 = vmatprep.subr.bf16.mxu0 (!%p2675_p10), %v3237_v51  ;;  %v3271_v58 = vcombine.high (!%p2675_p10), %v3155_v26, %v3161_v28  ;;  %v3278_v60 = vcombine.low (!%p2675_p10), %v3152_v25, %v3158_v27 }
  0x31   : > { %4197 = vst [vmem:[#allocation10_spill] sm:$0xff] %v3167_v30  ;;  %4198 = vst [vmem:[#allocation11_spill] sm:$0xff] %v3170_v31  ;;  %v3176_v33 = vld [vmem:[%s3120_s4 + $0x80] sm:$0xff]  ;;  %v3179_v34 = vld [vmem:[%s3120_s4 + $0x88] sm:$0xff]  ;;  %534 = vmatprep.subr.bf16.mxu1 (!%p2675_p10), %v3249_v54  ;;  %v3283_v61 = vcombine.low (!%p2675_p10), %v3155_v26, %v3161_v28  ;;  %v3288_v62 = vcombine.high (!%p2675_p10), %v3164_v29, %v3170_v31  ;;  %v3293_v63 = vcombine.high (!%p2675_p10), %v3167_v30, %v3173_v32 }
  0x32   : > { %4199 = vst [vmem:[#allocation12_spill] sm:$0xff] %v3173_v32  ;;  %4200 = vst [vmem:[#allocation13_spill] sm:$0xff] %v3176_v33  ;;  %v3182_v35 = vld [vmem:[%s3120_s4 + $0x90] sm:$0xff]  ;;  %v3185_v36 = vld [vmem:[%s3120_s4 + $0x98] sm:$0xff]  ;;  %v3298_v0 = vcombine.low (!%p2675_p10), %v3164_v29, %v3170_v31  ;;  %v3303_v1 = vcombine.low (!%p2675_p10), %v3167_v30, %v3173_v32 }
  0x33   : > { %4201 = vst [vmem:[#allocation14_spill] sm:$0xff] %v3179_v34  ;;  %4202 = vst [vmem:[#allocation15_spill] sm:$0xff] %v3182_v35  ;;  %v3188_v37 = vld [vmem:[%s3120_s4 + $0xa0] sm:$0xff]  ;;  %v3191_v38 = vld [vmem:[%s3120_s4 + $0xa8] sm:$0xff]  ;;  %494 = vmatpush1.bf16.msra.mxu0 (!%p2675_p10), %v3256_v55  ;;  %v3308_v2 = vcombine.high (!%p2675_p10), %v3176_v33, %v3182_v35  ;;  %v3313_v3 = vcombine.high (!%p2675_p10), %v3179_v34, %v3185_v36  ;;  %v3318_v4 = vcombine.low (!%p2675_p10), %v3176_v33, %v3182_v35 }
  0x34   : > { %4203 = vst [vmem:[#allocation16_spill] sm:$0xff] %v3185_v36  ;;  %4204 = vst [vmem:[#allocation17_spill] sm:$0xff] %v3188_v37  ;;  %v3194_v39 = vld [vmem:[%s3120_s4 + $0xb0] sm:$0xff]  ;;  %v3197_v40 = vld [vmem:[%s3120_s4 + $0xb8] sm:$0xff]  ;;  %322 = sbr.rel (%p2675_p10) target bundleno = 2087 (0x827), region = 59  ;;  %535 = vmatpush1.bf16.msra.mxu1 (!%p2675_p10), %v3261_v56  ;;  %495 = vmatprep.subr.bf16.mxu0 (!%p2675_p10), %v3266_v57  ;;  %v3323_v5 = vcombine.low (!%p2675_p10), %v3179_v34, %v3185_v36 }
  0x35   : > { %4205 = vst [vmem:[#allocation18_spill] sm:$0xff] %v3191_v38  ;;  %4206 = vst [vmem:[#allocation19_spill] sm:$0xff] %v3194_v39  ;;  %v3200_v41 = vld [vmem:[%s3120_s4 + $0xc0] sm:$0xff]  ;;  %v3203_v42 = vld [vmem:[%s3120_s4 + $0xc8] sm:$0xff]  ;;  %536 = vmatprep.subr.bf16.mxu1 (!%p2675_p10), %v3271_v58  ;;  %v3328_v6 = vcombine.high (!%p2675_p10), %v3188_v37, %v3194_v39  ;;  %v3333_v7 = vcombine.high (!%p2675_p10), %v3191_v38, %v3197_v40  ;;  %v3338_v8 = vcombine.low (!%p2675_p10), %v3188_v37, %v3194_v39 }
  0x36   : > { %4207 = vst [vmem:[#allocation20_spill] sm:$0xff] %v3197_v40  ;;  %4208 = vst [vmem:[#allocation21_spill] sm:$0xff] %v3200_v41  ;;  %v3206_v43 = vld [vmem:[%s3120_s4 + $0xd0] sm:$0xff]  ;;  %v3209_v44 = vld [vmem:[%s3120_s4 + $0xd8] sm:$0xff]  ;;  %v3343_v9 = vcombine.low (!%p2675_p10), %v3191_v38, %v3197_v40 }
  0x37   : > { %4209 = vst [vmem:[#allocation22_spill] sm:$0xff] %v3203_v42  ;;  %4210 = vst [vmem:[#allocation23_spill] sm:$0xff] %v3206_v43  ;;  %v3212_v45 = vld [vmem:[%s3120_s4 + $0xe0] sm:$0xff]  ;;  %v3215_v46 = vld [vmem:[%s3120_s4 + $0xe8] sm:$0xff]  ;;  %496 = vmatpush1.bf16.msra.mxu0 (!%p2675_p10), %v3278_v60  ;;  %v3348_v10 = vcombine.high (!%p2675_p10), %v3200_v41, %v3206_v43  ;;  %v3353_v11 = vcombine.high (!%p2675_p10), %v3203_v42, %v3209_v44  ;;  %v3358_v12 = vcombine.low (!%p2675_p10), %v3200_v41, %v3206_v43 }
  0x38   : > { %4211 = vst [vmem:[#allocation24_spill] sm:$0xff] %v3209_v44  ;;  %4212 = vst [vmem:[#allocation25_spill] sm:$0xff] %v3212_v45  ;;  %v3218_v47 = vld [vmem:[%s3120_s4 + $0xf0] sm:$0xff]  ;;  %v3221_v48 = vld [vmem:[%s3120_s4 + $0xf8] sm:$0xff]  ;;  %537 = vmatpush1.bf16.msra.mxu1 (!%p2675_p10), %v3283_v61  ;;  %497 = vmatprep.subr.bf16.mxu0 (!%p2675_p10), %v3288_v62  ;;  %v3363_v13 = vcombine.low (!%p2675_p10), %v3203_v42, %v3209_v44 }
  0x39   : > { %4213 = vst [vmem:[#allocation26_spill] sm:$0xff] %v3215_v46  ;;  %4214 = vst [vmem:[#allocation27_spill] sm:$0xff] %v3218_v47  ;;  %538 = vmatprep.subr.bf16.mxu1 (!%p2675_p10), %v3293_v63  ;;  %v3368_v14 = vcombine.high (!%p2675_p10), %v3212_v45, %v3218_v47  ;;  %v3373_v15 = vcombine.high (!%p2675_p10), %v3215_v46, %v3221_v48  ;;  %v3378_v16 = vcombine.low (!%p2675_p10), %v3212_v45, %v3218_v47  ;;  %v329_v59 = vld [vmem:[#allocation2] sm:$0xff] (!%p2675_p10) }
  0x3a   : > { %4215 = vst [vmem:[#allocation28_spill] sm:$0xff] %v3221_v48  ;;  %v3383_v42 = vcombine.low (!%p2675_p10), %v3215_v46, %v3221_v48  ;;  %v330_v44 = vpack.c.bf16 (!%p2675_p10), %v329_v59, %v329_v59  ;;  %v4216_v46 = vmov (!%p2675_p10), 0   ;;  %v324_v59 = vld [vmem:[%s3224_s8 + $0x8] sm:$0xff] (!%p2675_p10) }
  0x3b   : > { %498 = vmatpush1.bf16.msra.mxu0 %v3298_v0  ;;  %v327_v47 = vunpack.c.l.bf16 %v324_v59  ;;  %v328_v31 = vunpack.c.h.bf16 %v324_v59 }
  0x3c   : > { %539 = vmatpush1.bf16.msra.mxu1 %v3303_v1  ;;  %499 = vmatprep.subr.bf16.mxu0 %v3308_v2 }
  0x3d   : > { %540 = vmatprep.subr.bf16.mxu1 %v3313_v3 }
  0x3f   : > { %500 = vmatpush1.bf16.msra.mxu0 %v3318_v4 }
  0x40   : > { %541 = vmatpush1.bf16.msra.mxu1 %v3323_v5  ;;  %501 = vmatprep.subr.bf16.mxu0 %v3328_v6 }
  0x41   : > { %542 = vmatprep.subr.bf16.mxu1 %v3333_v7 }
  0x43   : > { %502 = vmatpush1.bf16.msra.mxu0 %v3338_v8 }
  0x44   : > { %543 = vmatpush1.bf16.msra.mxu1 %v3343_v9  ;;  %503 = vmatprep.subr.bf16.mxu0 %v3348_v10 }
  0x45   : > { %544 = vmatprep.subr.bf16.mxu1 %v3353_v11 }
  0x47   : > { %504 = vmatpush1.bf16.msra.mxu0 %v3358_v12 }
  0x48   : > { %545 = vmatpush1.bf16.msra.mxu1 %v3363_v13  ;;  %505 = vmatprep.subr.bf16.mxu0 %v3368_v14 }
  0x49   : > { %546 = vmatprep.subr.bf16.mxu1 %v3373_v15 }
  0x4b   : > { %506 = vmatpush1.bf16.msra.mxu0 %v3378_v16 }
  0x4c   : > { %547 = vmatpush1.bf16.msra.mxu1 %v3383_v42  ;;  %609 = vmatprep.subr.bf16.mxu0 %v3229_v49 }
  0x4d   : > { %650 = vmatprep.subr.bf16.mxu1 %v3241_v52 }
  0x4e   : > { %524 = vmatmul.mubr.bf16.vlgmr.msra.gmra.mrb[0].mxu0 %v330_v44 }
  0x4f   : > { %565 = vmatmul.mubr.bf16.vlgmr.msra.gmra.mrb[0].mxu1 %v330_v44  ;;  %610 = vmatpush1.bf16.msra.mxu0 %v3233_v50  ;;  %v323_v44 = vld [vmem:[%s3224_s8] sm:$0xff] }
  0x50   : > { %651 = vmatpush1.bf16.msra.mxu1 %v3245_v53  ;;  %611 = vmatprep.subr.bf16.mxu0 %v3237_v51  ;;  %v325_v48 = vunpack.c.l.bf16 %v323_v44  ;;  %v326_v45 = vunpack.c.h.bf16 %v323_v44 }
  0x51   : > { %652 = vmatprep.subr.bf16.mxu1 %v3249_v54  ;;  %641 = vmatprep.mubr.bf16.mxu0 %v4216_v46 }
  0x52   : > { %682 = vmatprep.mubr.bf16.mxu1 %v4216_v46 }
  0x53   : > { %612 = vmatpush1.bf16.msra.mxu0 %v3256_v55 }
  0x54   : > { %653 = vmatpush1.bf16.msra.mxu1 %v3261_v56  ;;  %613 = vmatprep.subr.bf16.mxu0 %v3266_v57 }
  0x55   : > { %654 = vmatprep.subr.bf16.mxu1 %v3271_v58 }
  0x57   : > { %614 = vmatpush1.bf16.msra.mxu0 %v3278_v60 }
  0x58   : > { %655 = vmatpush1.bf16.msra.mxu1 %v3283_v61  ;;  %615 = vmatprep.subr.bf16.mxu0 %v3288_v62 }
  0x59   : > { %656 = vmatprep.subr.bf16.mxu1 %v3293_v63 }
  0x5b   : > { %616 = vmatpush1.bf16.msra.mxu0 %v3298_v0 }
  0x5c   : > { %657 = vmatpush1.bf16.msra.mxu1 %v3303_v1  ;;  %617 = vmatprep.subr.bf16.mxu0 %v3308_v2 }
  0x5d   : > { %658 = vmatprep.subr.bf16.mxu1 %v3313_v3 }
  0x5f   : > { %618 = vmatpush1.bf16.msra.mxu0 %v3318_v4 }
  0x60   : > { %659 = vmatpush1.bf16.msra.mxu1 %v3323_v5  ;;  %619 = vmatprep.subr.bf16.mxu0 %v3328_v6 }
  0x61   : > { %660 = vmatprep.subr.bf16.mxu1 %v3333_v7 }
  0x63   : > { %620 = vmatpush1.bf16.msra.mxu0 %v3338_v8 }
  0x64   : > { %661 = vmatpush1.bf16.msra.mxu1 %v3343_v9  ;;  %621 = vmatprep.subr.bf16.mxu0 %v3348_v10 }
  0x65   : > { %662 = vmatprep.subr.bf16.mxu1 %v3353_v11 }
  0x67   : > { %622 = vmatpush1.bf16.msra.mxu0 %v3358_v12 }
  0x68   : > { %663 = vmatpush1.bf16.msra.mxu1 %v3363_v13  ;;  %623 = vmatprep.subr.bf16.mxu0 %v3368_v14 }
  0x69   : > { %664 = vmatprep.subr.bf16.mxu1 %v3373_v15 }
  0x6b   : > { %624 = vmatpush1.bf16.msra.mxu0 %v3378_v16 }
  0x6c   : > { %665 = vmatpush1.bf16.msra.mxu1 %v3383_v42  ;;  %728 = vmatprep.subr.bf16.mxu0 %v3229_v49 }
  0x6d   : > { %769 = vmatprep.subr.bf16.mxu1 %v3241_v52 }
 0x121   : > { %v525_v41 = vpop.f32.mrb[0].mxu0 }
 0x122   : > { %v566_v43 = vpop.f32.mrb[0].mxu1  ;;  %v573_v38 = vadd.f32 %v525_v41, %v325_v48  ;;  %v527_v40 = vpop.f32.mrb[1].mxu0 }
 0x123   : > { %v568_v37 = vpop.f32.mrb[1].mxu1  ;;  %v574_v39 = vadd.f32 %v527_v40, %v326_v45  ;;  %v529_v34 = vpop.f32.mrb[2].mxu0  ;;  %v575_v30 = vadd.f32 %v566_v43, %v327_v47 }
 0x124   : > { %v570_v36 = vpop.f32.mrb[2].mxu1  ;;  %v577_v33 = vmul.f32 0.5, %v573_v38  ;;  %v530_v35 = vpop.f32.mrb[3].mxu0  ;;  %v576_v26 = vadd.f32 %v568_v37, %v328_v31 }
 0x125   : > { %v571_v32 = vpop.f32.mrb[3].mxu1  ;;  %v581_v29 = vmul.f32 0.5, %v574_v39  ;;  %v590_v36 = vld [vmem:[#allocation3] sm:$0xff] }
 0x126   : > { %2831 = vtanh.f32 %v577_v33  ;;  %v586_v44 = vmul.f32 0.5, %v576_v26 }
 0x127   : > { %2833 = vtanh.f32 %v581_v29 }
 0x128   : > { %2835 = vtanh.f32 %v575_v30 }
 0x129   : > { %2837 = vtanh.f32 %v586_v44 }
 0x130   : > { %v2832_v28 = vpop.eup %2831 }
 0x131   : > { %v2834_v25 = vpop.eup %2833  ;;  %v579_v27 = vmul.f32 0.5, %v2832_v28  ;;  %v2709_v28 = vld [vmem:[%s3224_s8 + $0x18] sm:$0xff] }
 0x132   : > { %v2836_v41 = vpop.eup %2835  ;;  %v583_v48 = vmul.f32 0.5, %v2834_v25  ;;  %v2708_v25 = vld [vmem:[%s3224_s8 + $0x10] sm:$0xff]  ;;  %v605_v59 = vunpack.c.l.bf16 %v2709_v28 }
 0x133   : > { %v580_v34 = vadd.f32 0.5, %v579_v27  ;;  %v2838_v29 = vpop.eup %2837  ;;  %v603_v27 = vunpack.c.l.bf16 %v2708_v25  ;;  %v604_v39 = vunpack.c.h.bf16 %v2708_v25 }
 0x134   : > { %v584_v38 = vadd.f32 0.5, %v583_v48  ;;  %v588_v30 = vmul.f32 0.5, %v2838_v29 }
 0x135   : > { %v592_v35 = vmul.f32 %v2836_v41, %v580_v34 }
 0x136   : > { %v591_v40 = vmul.f32 %v590_v36, %v584_v38  ;;  %v589_v31 = vadd.f32 0.5, %v588_v30 }
 0x138   : > { %v3427_v32 = vadd.f32 %v592_v35, %v591_v40 }
 0x13a   : > { %2839 = vtanh.f32 %v3427_v32 }
 0x144   : > { %v2840_v26 = vpop.eup %2839 }
 0x145   : > { %v595_v33 = vmul.f32 %v2840_v26, %v589_v31  ;;  %v606_v31 = vunpack.c.h.bf16 %v2709_v28 }
 0x147   : > { %v598_v37 = vpack.c.bf16 %v595_v33, %v595_v33 }
 0x149   : > { %599 = vst [vmem:[%s3125_s7] sm:$0xf] %v598_v37  ;;  %642 = vmatmul.mubr.bf16.vlgmr.msra.gmra.mrb[4].mxu0 %v598_v37  ;;  %683 = vmatmul.mubr.bf16.vlgmr.msra.gmra.mrb[4].mxu1 %v598_v37 }
 0x14a   : > { %729 = vmatpush1.bf16.msra.mxu0 %v3233_v50  ;;  %770 = vmatpush1.bf16.msra.mxu1 %v3245_v53 }
 0x14b   : > { %730 = vmatprep.subr.bf16.mxu0 %v3237_v51  ;;  %771 = vmatprep.subr.bf16.mxu1 %v3249_v54 }
 0x14c   : > { %760 = vmatprep.mubr.bf16.mxu0 %v4216_v46  ;;  %801 = vmatprep.mubr.bf16.mxu1 %v4216_v46 }
 0x14e   : > { %731 = vmatpush1.bf16.msra.mxu0 %v3256_v55  ;;  %772 = vmatpush1.bf16.msra.mxu1 %v3261_v56 }
 0x14f   : > { %732 = vmatprep.subr.bf16.mxu0 %v3266_v57  ;;  %773 = vmatprep.subr.bf16.mxu1 %v3271_v58 }
 0x152   : > { %733 = vmatpush1.bf16.msra.mxu0 %v3278_v60  ;;  %774 = vmatpush1.bf16.msra.mxu1 %v3283_v61 }
 0x153   : > { %734 = vmatprep.subr.bf16.mxu0 %v3288_v62  ;;  %775 = vmatprep.subr.bf16.mxu1 %v3293_v63 }
 0x156   : > { %735 = vmatpush1.bf16.msra.mxu0 %v3298_v0  ;;  %776 = vmatpush1.bf16.msra.mxu1 %v3303_v1 }
 0x157   : > { %736 = vmatprep.subr.bf16.mxu0 %v3308_v2  ;;  %777 = vmatprep.subr.bf16.mxu1 %v3313_v3 }
 0x15a   : > { %737 = vmatpush1.bf16.msra.mxu0 %v3318_v4  ;;  %778 = vmatpush1.bf16.msra.mxu1 %v3323_v5 }
 0x15b   : > { %738 = vmatprep.subr.bf16.mxu0 %v3328_v6  ;;  %779 = vmatprep.subr.bf16.mxu1 %v3333_v7 }
 0x15e   : > { %739 = vmatpush1.bf16.msra.mxu0 %v3338_v8  ;;  %780 = vmatpush1.bf16.msra.mxu1 %v3343_v9 }
 0x15f   : > { %740 = vmatprep.subr.bf16.mxu0 %v3348_v10  ;;  %781 = vmatprep.subr.bf16.mxu1 %v3353_v11 }
 0x162   : > { %741 = vmatpush1.bf16.msra.mxu0 %v3358_v12  ;;  %782 = vmatpush1.bf16.msra.mxu1 %v3363_v13 }
 0x163   : > { %742 = vmatprep.subr.bf16.mxu0 %v3368_v14  ;;  %783 = vmatprep.subr.bf16.mxu1 %v3373_v15 }
 0x166   : > { %743 = vmatpush1.bf16.msra.mxu0 %v3378_v16  ;;  %784 = vmatpush1.bf16.msra.mxu1 %v3383_v42 }
 0x167   : > { %847 = vmatprep.subr.bf16.mxu0 %v3229_v49  ;;  %888 = vmatprep.subr.bf16.mxu1 %v3241_v52 }
 0x21c   : > { %v643_v43 = vpop.f32.mrb[4].mxu0  ;;  %v684_v45 = vpop.f32.mrb[4].mxu1 }
 0x21d   : > { %v691_v47 = vadd.f32 %v643_v43, %v603_v27  ;;  %v645_v44 = vpop.f32.mrb[5].mxu0  ;;  %v686_v41 = vpop.f32.mrb[5].mxu1  ;;  %v693_v30 = vadd.f32 %v684_v45, %v605_v59 }
 0x21e   : > { %v692_v48 = vadd.f32 %v645_v44, %v604_v39  ;;  %v647_v34 = vpop.f32.mrb[6].mxu0  ;;  %v688_v36 = vpop.f32.mrb[6].mxu1  ;;  %v694_v26 = vadd.f32 %v686_v41, %v606_v31 }
 0x21f   : > { %v695_v38 = vmul.f32 0.5, %v691_v47  ;;  %v648_v35 = vpop.f32.mrb[7].mxu0  ;;  %v689_v40 = vpop.f32.mrb[7].mxu1 }
 0x220   : > { %v699_v29 = vmul.f32 0.5, %v692_v48  ;;  %v704_v33 = vmul.f32 0.5, %v694_v26 }
 0x221   : > { %2841 = vtanh.f32 %v695_v38 }
 0x222   : > { %2843 = vtanh.f32 %v699_v29  ;;  %v2712_v29 = vld [vmem:[%s3224_s8 + $0x28] sm:$0xff] }
 0x223   : > { %2845 = vtanh.f32 %v693_v30 }
 0x224   : > { %2847 = vtanh.f32 %v704_v33 }
 0x22b   : > { %v2842_v37 = vpop.eup %2841 }
 0x22c   : > { %v2844_v25 = vpop.eup %2843  ;;  %v697_v27 = vmul.f32 0.5, %v2842_v37  ;;  %v724_v37 = vunpack.c.l.bf16 %v2712_v29 }
 0x22d   : > { %v701_v43 = vmul.f32 0.5, %v2844_v25  ;;  %v2846_v44 = vpop.eup %2845 }
 0x22e   : > { %v698_v39 = vadd.f32 0.5, %v697_v27  ;;  %v2848_v28 = vpop.eup %2847 }
 0x22f   : > { %v702_v34 = vadd.f32 0.5, %v701_v43  ;;  %v706_v45 = vmul.f32 0.5, %v2848_v28 }
 0x230   : > { %v710_v47 = vmul.f32 %v2846_v44, %v698_v39 }
 0x231   : > { %v709_v36 = vmul.f32 %v702_v34, %v3427_v32  ;;  %v707_v59 = vadd.f32 0.5, %v706_v45  ;;  %v2711_v32 = vld [vmem:[%s3224_s8 + $0x20] sm:$0xff] }
 0x232   : > { %v722_v40 = vunpack.c.l.bf16 %v2711_v32  ;;  %v723_v30 = vunpack.c.h.bf16 %v2711_v32 }
 0x233   : > { %v3468_v48 = vadd.f32 %v710_v47, %v709_v36 }
 0x235   : > { %2849 = vtanh.f32 %v3468_v48 }
 0x23f   : > { %v2850_v41 = vpop.eup %2849 }
 0x240   : > { %v713_v38 = vmul.f32 %v2850_v41, %v707_v59  ;;  %v725_v59 = vunpack.c.h.bf16 %v2712_v29 }
 0x242   : > { %v716_v35 = vpack.c.bf16 %v713_v38, %v713_v38 }
 0x244   : > { %2710 = vst [vmem:[%s3125_s7 + $0x4] sm:$0xf] %v716_v35  ;;  %761 = vmatmul.mubr.bf16.vlgmr.msra.gmra.mrb[8].mxu0 %v716_v35  ;;  %802 = vmatmul.mubr.bf16.vlgmr.msra.gmra.mrb[8].mxu1 %v716_v35 }
 0x245   : > { %848 = vmatpush1.bf16.msra.mxu0 %v3233_v50  ;;  %889 = vmatpush1.bf16.msra.mxu1 %v3245_v53 }
 0x246   : > { %849 = vmatprep.subr.bf16.mxu0 %v3237_v51  ;;  %890 = vmatprep.subr.bf16.mxu1 %v3249_v54 }
 0x247   : > { %879 = vmatprep.mubr.bf16.mxu0 %v4216_v46  ;;  %920 = vmatprep.mubr.bf16.mxu1 %v4216_v46 }
 0x249   : > { %850 = vmatpush1.bf16.msra.mxu0 %v3256_v55  ;;  %891 = vmatpush1.bf16.msra.mxu1 %v3261_v56 }
 0x24a   : > { %851 = vmatprep.subr.bf16.mxu0 %v3266_v57  ;;  %892 = vmatprep.subr.bf16.mxu1 %v3271_v58 }
 0x24d   : > { %852 = vmatpush1.bf16.msra.mxu0 %v3278_v60  ;;  %893 = vmatpush1.bf16.msra.mxu1 %v3283_v61 }
 0x24e   : > { %853 = vmatprep.subr.bf16.mxu0 %v3288_v62  ;;  %894 = vmatprep.subr.bf16.mxu1 %v3293_v63 }
 0x251   : > { %854 = vmatpush1.bf16.msra.mxu0 %v3298_v0  ;;  %895 = vmatpush1.bf16.msra.mxu1 %v3303_v1 }
 0x252   : > { %855 = vmatprep.subr.bf16.mxu0 %v3308_v2  ;;  %896 = vmatprep.subr.bf16.mxu1 %v3313_v3 }
 0x255   : > { %856 = vmatpush1.bf16.msra.mxu0 %v3318_v4  ;;  %897 = vmatpush1.bf16.msra.mxu1 %v3323_v5 }
 0x256   : > { %857 = vmatprep.subr.bf16.mxu0 %v3328_v6  ;;  %898 = vmatprep.subr.bf16.mxu1 %v3333_v7 }
 0x259   : > { %858 = vmatpush1.bf16.msra.mxu0 %v3338_v8  ;;  %899 = vmatpush1.bf16.msra.mxu1 %v3343_v9 }
 0x25a   : > { %859 = vmatprep.subr.bf16.mxu0 %v3348_v10  ;;  %900 = vmatprep.subr.bf16.mxu1 %v3353_v11 }
 0x25d   : > { %860 = vmatpush1.bf16.msra.mxu0 %v3358_v12  ;;  %901 = vmatpush1.bf16.msra.mxu1 %v3363_v13 }
 0x25e   : > { %861 = vmatprep.subr.bf16.mxu0 %v3368_v14  ;;  %902 = vmatprep.subr.bf16.mxu1 %v3373_v15 }
 0x261   : > { %862 = vmatpush1.bf16.msra.mxu0 %v3378_v16  ;;  %903 = vmatpush1.bf16.msra.mxu1 %v3383_v42 }
 0x262   : > { %966 = vmatprep.subr.bf16.mxu0 %v3229_v49  ;;  %1007 = vmatprep.subr.bf16.mxu1 %v3241_v52 }
 0x317   : > { %v762_v31 = vpop.f32.mrb[8].mxu0  ;;  %v803_v26 = vpop.f32.mrb[8].mxu1 }
 0x318   : > { %v810_v33 = vadd.f32 %v762_v31, %v722_v40  ;;  %v764_v25 = vpop.f32.mrb[9].mxu0  ;;  %v805_v27 = vpop.f32.mrb[9].mxu1  ;;  %v812_v45 = vadd.f32 %v803_v26, %v724_v37 }
 0x319   : > { %v811_v43 = vadd.f32 %v764_v25, %v723_v30  ;;  %v766_v39 = vpop.f32.mrb[10].mxu0  ;;  %v807_v44 = vpop.f32.mrb[10].mxu1  ;;  %v813_v41 = vadd.f32 %v805_v27, %v725_v59 }
 0x31a   : > { %v814_v34 = vmul.f32 0.5, %v810_v33  ;;  %v767_v47 = vpop.f32.mrb[11].mxu0  ;;  %v808_v36 = vpop.f32.mrb[11].mxu1 }
 0x31b   : > { %v818_v28 = vmul.f32 0.5, %v811_v43  ;;  %v823_v38 = vmul.f32 0.5, %v813_v41 }
 0x31c   : > { %2851 = vtanh.f32 %v814_v34 }
 0x31d   : > { %2853 = vtanh.f32 %v818_v28  ;;  %v2715_v28 = vld [vmem:[%s3224_s8 + $0x38] sm:$0xff] }
 0x31e   : > { %2855 = vtanh.f32 %v812_v45 }
 0x31f   : > { %2857 = vtanh.f32 %v823_v38 }
 0x326   : > { %v2852_v35 = vpop.eup %2851 }
 0x327   : > { %v2854_v32 = vpop.eup %2853  ;;  %v816_v40 = vmul.f32 0.5, %v2852_v35  ;;  %v843_v35 = vunpack.c.l.bf16 %v2715_v28 }
 0x328   : > { %v820_v31 = vmul.f32 0.5, %v2854_v32  ;;  %v2856_v25 = vpop.eup %2855 }
 0x329   : > { %v817_v30 = vadd.f32 0.5, %v816_v40  ;;  %v2858_v29 = vpop.eup %2857 }
 0x32a   : > { %v821_v39 = vadd.f32 0.5, %v820_v31  ;;  %v825_v26 = vmul.f32 0.5, %v2858_v29 }
 0x32b   : > { %v829_v33 = vmul.f32 %v2856_v25, %v817_v30 }
 0x32c   : > { %v828_v44 = vmul.f32 %v821_v39, %v3468_v48  ;;  %v826_v37 = vadd.f32 0.5, %v825_v26  ;;  %v2714_v48 = vld [vmem:[%s3224_s8 + $0x30] sm:$0xff] }
 0x32d   : > { %v841_v36 = vunpack.c.l.bf16 %v2714_v48  ;;  %v842_v45 = vunpack.c.h.bf16 %v2714_v48 }
 0x32e   : > { %v3509_v43 = vadd.f32 %v829_v33, %v828_v44 }
 0x330   : > { %2859 = vtanh.f32 %v3509_v43 }
 0x33a   : > { %v2860_v27 = vpop.eup %2859 }
 0x33b   : > { %v832_v34 = vmul.f32 %v2860_v27, %v826_v37  ;;  %v844_v37 = vunpack.c.h.bf16 %v2715_v28 }
 0x33d   : > { %v835_v47 = vpack.c.bf16 %v832_v34, %v832_v34 }
 0x33f   : > { %2713 = vst [vmem:[%s3125_s7 + $0x8] sm:$0xf] %v835_v47  ;;  %880 = vmatmul.mubr.bf16.vlgmr.msra.gmra.mrb[12].mxu0 %v835_v47  ;;  %921 = vmatmul.mubr.bf16.vlgmr.msra.gmra.mrb[12].mxu1 %v835_v47 }
 0x340   : > { %967 = vmatpush1.bf16.msra.mxu0 %v3233_v50  ;;  %1008 = vmatpush1.bf16.msra.mxu1 %v3245_v53 }
 0x341   : > { %968 = vmatprep.subr.bf16.mxu0 %v3237_v51  ;;  %1009 = vmatprep.subr.bf16.mxu1 %v3249_v54 }
 0x342   : > { %998 = vmatprep.mubr.bf16.mxu0 %v4216_v46  ;;  %1039 = vmatprep.mubr.bf16.mxu1 %v4216_v46 }
 0x344   : > { %969 = vmatpush1.bf16.msra.mxu0 %v3256_v55  ;;  %1010 = vmatpush1.bf16.msra.mxu1 %v3261_v56 }
 0x345   : > { %970 = vmatprep.subr.bf16.mxu0 %v3266_v57  ;;  %1011 = vmatprep.subr.bf16.mxu1 %v3271_v58 }
 0x348   : > { %971 = vmatpush1.bf16.msra.mxu0 %v3278_v60  ;;  %1012 = vmatpush1.bf16.msra.mxu1 %v3283_v61 }
 0x349   : > { %972 = vmatprep.subr.bf16.mxu0 %v3288_v62  ;;  %1013 = vmatprep.subr.bf16.mxu1 %v3293_v63 }
 0x34c   : > { %973 = vmatpush1.bf16.msra.mxu0 %v3298_v0  ;;  %1014 = vmatpush1.bf16.msra.mxu1 %v3303_v1 }
 0x34d   : > { %974 = vmatprep.subr.bf16.mxu0 %v3308_v2  ;;  %1015 = vmatprep.subr.bf16.mxu1 %v3313_v3 }
 0x350   : > { %975 = vmatpush1.bf16.msra.mxu0 %v3318_v4  ;;  %1016 = vmatpush1.bf16.msra.mxu1 %v3323_v5 }
 0x351   : > { %976 = vmatprep.subr.bf16.mxu0 %v3328_v6  ;;  %1017 = vmatprep.subr.bf16.mxu1 %v3333_v7 }
 0x354   : > { %977 = vmatpush1.bf16.msra.mxu0 %v3338_v8  ;;  %1018 = vmatpush1.bf16.msra.mxu1 %v3343_v9 }
 0x355   : > { %978 = vmatprep.subr.bf16.mxu0 %v3348_v10  ;;  %1019 = vmatprep.subr.bf16.mxu1 %v3353_v11 }
 0x358   : > { %979 = vmatpush1.bf16.msra.mxu0 %v3358_v12  ;;  %1020 = vmatpush1.bf16.msra.mxu1 %v3363_v13 }
 0x359   : > { %980 = vmatprep.subr.bf16.mxu0 %v3368_v14  ;;  %1021 = vmatprep.subr.bf16.mxu1 %v3373_v15 }
 0x35c   : > { %981 = vmatpush1.bf16.msra.mxu0 %v3378_v16  ;;  %1022 = vmatpush1.bf16.msra.mxu1 %v3383_v42 }
 0x35d   : > { %1085 = vmatprep.subr.bf16.mxu0 %v3229_v49  ;;  %1126 = vmatprep.subr.bf16.mxu1 %v3241_v52 }
 0x412   : > { %v881_v59 = vpop.f32.mrb[12].mxu0  ;;  %v922_v41 = vpop.f32.mrb[12].mxu1 }
 0x413   : > { %v929_v38 = vadd.f32 %v881_v59, %v841_v36  ;;  %v883_v32 = vpop.f32.mrb[13].mxu0  ;;  %v924_v40 = vpop.f32.mrb[13].mxu1  ;;  %v931_v26 = vadd.f32 %v922_v41, %v843_v35 }
 0x414   : > { %v930_v31 = vadd.f32 %v883_v32, %v842_v45  ;;  %v885_v30 = vpop.f32.mrb[14].mxu0  ;;  %v926_v25 = vpop.f32.mrb[14].mxu1  ;;  %v932_v27 = vadd.f32 %v924_v40, %v844_v37 }
 0x415   : > { %v933_v39 = vmul.f32 0.5, %v929_v38  ;;  %v886_v33 = vpop.f32.mrb[15].mxu0  ;;  %v927_v44 = vpop.f32.mrb[15].mxu1 }
 0x416   : > { %v937_v29 = vmul.f32 0.5, %v930_v31  ;;  %v942_v34 = vmul.f32 0.5, %v932_v27 }
 0x417   : > { %2861 = vtanh.f32 %v933_v39 }
 0x418   : > { %2863 = vtanh.f32 %v937_v29  ;;  %v2718_v29 = vld [vmem:[%s3224_s8 + $0x48] sm:$0xff] }
 0x419   : > { %2865 = vtanh.f32 %v931_v26 }
 0x41a   : > { %2867 = vtanh.f32 %v942_v34 }
 0x421   : > { %v2862_v47 = vpop.eup %2861 }
 0x422   : > { %v2864_v48 = vpop.eup %2863  ;;  %v935_v36 = vmul.f32 0.5, %v2862_v47  ;;  %v962_v47 = vunpack.c.l.bf16 %v2718_v29 }
 0x423   : > { %v939_v59 = vmul.f32 0.5, %v2864_v48  ;;  %v2866_v32 = vpop.eup %2865 }
 0x424   : > { %v936_v45 = vadd.f32 0.5, %v935_v36  ;;  %v2868_v28 = vpop.eup %2867 }
 0x425   : > { %v940_v30 = vadd.f32 0.5, %v939_v59  ;;  %v944_v41 = vmul.f32 0.5, %v2868_v28 }
 0x426   : > { %v948_v38 = vmul.f32 %v2866_v32, %v936_v45 }
 0x427   : > { %v947_v25 = vmul.f32 %v940_v30, %v3509_v43  ;;  %v945_v35 = vadd.f32 0.5, %v944_v41  ;;  %v2717_v43 = vld [vmem:[%s3224_s8 + $0x40] sm:$0xff] }
 0x428   : > { %v960_v44 = vunpack.c.l.bf16 %v2717_v43  ;;  %v961_v26 = vunpack.c.h.bf16 %v2717_v43 }
 0x429   : > { %v3550_v31 = vadd.f32 %v948_v38, %v947_v25 }
 0x42b   : > { %2869 = vtanh.f32 %v3550_v31 }
 0x435   : > { %v2870_v40 = vpop.eup %2869 }
 0x436   : > { %v951_v39 = vmul.f32 %v2870_v40, %v945_v35  ;;  %v963_v35 = vunpack.c.h.bf16 %v2718_v29 }
 0x438   : > { %v954_v33 = vpack.c.bf16 %v951_v39, %v951_v39 }
 0x43a   : > { %2716 = vst [vmem:[%s3125_s7 + $0xc] sm:$0xf] %v954_v33  ;;  %999 = vmatmul.mubr.bf16.vlgmr.msra.gmra.mrb[16].mxu0 %v954_v33  ;;  %1040 = vmatmul.mubr.bf16.vlgmr.msra.gmra.mrb[16].mxu1 %v954_v33 }
 0x43b   : > { %1086 = vmatpush1.bf16.msra.mxu0 %v3233_v50  ;;  %1127 = vmatpush1.bf16.msra.mxu1 %v3245_v53 }
 0x43c   : > { %1087 = vmatprep.subr.bf16.mxu0 %v3237_v51  ;;  %1128 = vmatprep.subr.bf16.mxu1 %v3249_v54 }
 0x43d   : > { %1117 = vmatprep.mubr.bf16.mxu0 %v4216_v46  ;;  %1158 = vmatprep.mubr.bf16.mxu1 %v4216_v46 }
 0x43f   : > { %1088 = vmatpush1.bf16.msra.mxu0 %v3256_v55  ;;  %1129 = vmatpush1.bf16.msra.mxu1 %v3261_v56 }
 0x440   : > { %1089 = vmatprep.subr.bf16.mxu0 %v3266_v57  ;;  %1130 = vmatprep.subr.bf16.mxu1 %v3271_v58 }
 0x443   : > { %1090 = vmatpush1.bf16.msra.mxu0 %v3278_v60  ;;  %1131 = vmatpush1.bf16.msra.mxu1 %v3283_v61 }
 0x444   : > { %1091 = vmatprep.subr.bf16.mxu0 %v3288_v62  ;;  %1132 = vmatprep.subr.bf16.mxu1 %v3293_v63 }
 0x447   : > { %1092 = vmatpush1.bf16.msra.mxu0 %v3298_v0  ;;  %1133 = vmatpush1.bf16.msra.mxu1 %v3303_v1 }
 0x448   : > { %1093 = vmatprep.subr.bf16.mxu0 %v3308_v2  ;;  %1134 = vmatprep.subr.bf16.mxu1 %v3313_v3 }
 0x44b   : > { %1094 = vmatpush1.bf16.msra.mxu0 %v3318_v4  ;;  %1135 = vmatpush1.bf16.msra.mxu1 %v3323_v5 }
 0x44c   : > { %1095 = vmatprep.subr.bf16.mxu0 %v3328_v6  ;;  %1136 = vmatprep.subr.bf16.mxu1 %v3333_v7 }
 0x44f   : > { %1096 = vmatpush1.bf16.msra.mxu0 %v3338_v8  ;;  %1137 = vmatpush1.bf16.msra.mxu1 %v3343_v9 }
 0x450   : > { %1097 = vmatprep.subr.bf16.mxu0 %v3348_v10  ;;  %1138 = vmatprep.subr.bf16.mxu1 %v3353_v11 }
 0x453   : > { %1098 = vmatpush1.bf16.msra.mxu0 %v3358_v12  ;;  %1139 = vmatpush1.bf16.msra.mxu1 %v3363_v13 }
 0x454   : > { %1099 = vmatprep.subr.bf16.mxu0 %v3368_v14  ;;  %1140 = vmatprep.subr.bf16.mxu1 %v3373_v15 }
 0x457   : > { %1100 = vmatpush1.bf16.msra.mxu0 %v3378_v16  ;;  %1141 = vmatpush1.bf16.msra.mxu1 %v3383_v42 }
 0x458   : > { %1204 = vmatprep.subr.bf16.mxu0 %v3229_v49  ;;  %1245 = vmatprep.subr.bf16.mxu1 %v3241_v52 }
 0x50d   : > { %v1000_v37 = vpop.f32.mrb[16].mxu0  ;;  %v1041_v27 = vpop.f32.mrb[16].mxu1 }
 0x50e   : > { %v1048_v34 = vadd.f32 %v1000_v37, %v960_v44  ;;  %v1002_v48 = vpop.f32.mrb[17].mxu0  ;;  %v1043_v36 = vpop.f32.mrb[17].mxu1  ;;  %v1050_v41 = vadd.f32 %v1041_v27, %v962_v47 }
 0x50f   : > { %v1049_v59 = vadd.f32 %v1002_v48, %v961_v26  ;;  %v1004_v45 = vpop.f32.mrb[18].mxu0  ;;  %v1045_v32 = vpop.f32.mrb[18].mxu1  ;;  %v1051_v40 = vadd.f32 %v1043_v36, %v963_v35 }
 0x510   : > { %v1052_v30 = vmul.f32 0.5, %v1048_v34  ;;  %v1005_v38 = vpop.f32.mrb[19].mxu0  ;;  %v1046_v25 = vpop.f32.mrb[19].mxu1 }
 0x511   : > { %v1056_v28 = vmul.f32 0.5, %v1049_v59  ;;  %v1061_v39 = vmul.f32 0.5, %v1051_v40 }
 0x512   : > { %2871 = vtanh.f32 %v1052_v30 }
 0x513   : > { %2873 = vtanh.f32 %v1056_v28  ;;  %v2721_v28 = vld [vmem:[%s3224_s8 + $0x58] sm:$0xff] }
 0x514   : > { %2875 = vtanh.f32 %v1050_v41 }
 0x515   : > { %2877 = vtanh.f32 %v1061_v39 }
 0x51c   : > { %v2872_v33 = vpop.eup %2871 }
 0x51d   : > { %v2874_v43 = vpop.eup %2873  ;;  %v1054_v44 = vmul.f32 0.5, %v2872_v33  ;;  %v1081_v33 = vunpack.c.l.bf16 %v2721_v28 }
 0x51e   : > { %v1058_v37 = vmul.f32 0.5, %v2874_v43  ;;  %v2876_v48 = vpop.eup %2875 }
 0x51f   : > { %v1055_v26 = vadd.f32 0.5, %v1054_v44  ;;  %v2878_v29 = vpop.eup %2877 }
 0x520   : > { %v1059_v45 = vadd.f32 0.5, %v1058_v37  ;;  %v1063_v27 = vmul.f32 0.5, %v2878_v29 }
 0x521   : > { %v1067_v34 = vmul.f32 %v2876_v48, %v1055_v26 }
 0x522   : > { %v1066_v32 = vmul.f32 %v1059_v45, %v3550_v31  ;;  %v1064_v47 = vadd.f32 0.5, %v1063_v27  ;;  %v2720_v31 = vld [vmem:[%s3224_s8 + $0x50] sm:$0xff] }
 0x523   : > { %v1079_v25 = vunpack.c.l.bf16 %v2720_v31  ;;  %v1080_v41 = vunpack.c.h.bf16 %v2720_v31 }
 0x524   : > { %v3591_v59 = vadd.f32 %v1067_v34, %v1066_v32 }
 0x526   : > { %2879 = vtanh.f32 %v3591_v59 }
 0x530   : > { %v2880_v36 = vpop.eup %2879 }
 0x531   : > { %v1070_v30 = vmul.f32 %v2880_v36, %v1064_v47 }
 0x533   : > { %v1073_v38 = vpack.c.bf16 %v1070_v30, %v1070_v30 }
 0x535   : > { %2719 = vst [vmem:[%s3125_s7 + $0x10] sm:$0xf] %v1073_v38  ;;  %1118 = vmatmul.mubr.bf16.vlgmr.msra.gmra.mrb[20].mxu0 %v1073_v38  ;;  %1159 = vmatmul.mubr.bf16.vlgmr.msra.gmra.mrb[20].mxu1 %v1073_v38 }
 0x536   : > { %1205 = vmatpush1.bf16.msra.mxu0 %v3233_v50  ;;  %1246 = vmatpush1.bf16.msra.mxu1 %v3245_v53 }
 0x537   : > { %1206 = vmatprep.subr.bf16.mxu0 %v3237_v51  ;;  %1247 = vmatprep.subr.bf16.mxu1 %v3249_v54 }
 0x538   : > { %1236 = vmatprep.mubr.bf16.mxu0 %v4216_v46  ;;  %1277 = vmatprep.mubr.bf16.mxu1 %v4216_v46 }
 0x53a   : > { %1207 = vmatpush1.bf16.msra.mxu0 %v3256_v55  ;;  %1248 = vmatpush1.bf16.msra.mxu1 %v3261_v56 }
 0x53b   : > { %1208 = vmatprep.subr.bf16.mxu0 %v3266_v57  ;;  %1249 = vmatprep.subr.bf16.mxu1 %v3271_v58 }
 0x53e   : > { %1209 = vmatpush1.bf16.msra.mxu0 %v3278_v60  ;;  %1250 = vmatpush1.bf16.msra.mxu1 %v3283_v61 }
 0x53f   : > { %1210 = vmatprep.subr.bf16.mxu0 %v3288_v62  ;;  %1251 = vmatprep.subr.bf16.mxu1 %v3293_v63 }
 0x542   : > { %1211 = vmatpush1.bf16.msra.mxu0 %v3298_v0  ;;  %1252 = vmatpush1.bf16.msra.mxu1 %v3303_v1 }
 0x543   : > { %1212 = vmatprep.subr.bf16.mxu0 %v3308_v2  ;;  %1253 = vmatprep.subr.bf16.mxu1 %v3313_v3 }
 0x546   : > { %1213 = vmatpush1.bf16.msra.mxu0 %v3318_v4  ;;  %1254 = vmatpush1.bf16.msra.mxu1 %v3323_v5 }
 0x547   : > { %1214 = vmatprep.subr.bf16.mxu0 %v3328_v6  ;;  %1255 = vmatprep.subr.bf16.mxu1 %v3333_v7 }
 0x54a   : > { %1215 = vmatpush1.bf16.msra.mxu0 %v3338_v8  ;;  %1256 = vmatpush1.bf16.msra.mxu1 %v3343_v9 }
 0x54b   : > { %1216 = vmatprep.subr.bf16.mxu0 %v3348_v10  ;;  %1257 = vmatprep.subr.bf16.mxu1 %v3353_v11 }
 0x54e   : > { %1217 = vmatpush1.bf16.msra.mxu0 %v3358_v12  ;;  %1258 = vmatpush1.bf16.msra.mxu1 %v3363_v13 }
 0x54f   : > { %1218 = vmatprep.subr.bf16.mxu0 %v3368_v14  ;;  %1259 = vmatprep.subr.bf16.mxu1 %v3373_v15 }
 0x552   : > { %1219 = vmatpush1.bf16.msra.mxu0 %v3378_v16  ;;  %1260 = vmatpush1.bf16.msra.mxu1 %v3383_v42 }
 0x553   : > { %1323 = vmatprep.subr.bf16.mxu0 %v3229_v49  ;;  %1364 = vmatprep.subr.bf16.mxu1 %v3241_v52  ;;  %v1082_v52 = vunpack.c.h.bf16 %v2721_v28 }
 0x608   : > { %v1119_v35 = vpop.f32.mrb[20].mxu0  ;;  %v1160_v40 = vpop.f32.mrb[20].mxu1 }
 0x609   : > { %v1167_v39 = vadd.f32 %v1119_v35, %v1079_v25  ;;  %v1121_v43 = vpop.f32.mrb[21].mxu0  ;;  %v1162_v44 = vpop.f32.mrb[21].mxu1  ;;  %v1169_v49 = vadd.f32 %v1160_v40, %v1081_v33 }
 0x60a   : > { %v1168_v37 = vadd.f32 %v1121_v43, %v1080_v41  ;;  %v1123_v26 = vpop.f32.mrb[22].mxu0  ;;  %v1164_v48 = vpop.f32.mrb[22].mxu1  ;;  %v1170_v27 = vadd.f32 %v1162_v44, %v1082_v52  ;;  %v2726_v52 = vld [vmem:[%s3224_s8 + $0x70] sm:$0xff] }
 0x60b   : > { %v1171_v45 = vmul.f32 0.5, %v1167_v39  ;;  %v1124_v34 = vpop.f32.mrb[23].mxu0  ;;  %v1165_v32 = vpop.f32.mrb[23].mxu1 }
 0x60c   : > { %v1175_v29 = vmul.f32 0.5, %v1168_v37  ;;  %v1180_v47 = vmul.f32 0.5, %v1170_v27  ;;  %v1317_v27 = vunpack.c.l.bf16 %v2726_v52 }
 0x60d   : > { %2881 = vtanh.f32 %v1171_v45 }
 0x60e   : > { %2883 = vtanh.f32 %v1175_v29 }
 0x60f   : > { %2885 = vtanh.f32 %v1169_v49 }
 0x610   : > { %2887 = vtanh.f32 %v1180_v47  ;;  %v2727_v47 = vld [vmem:[%s3224_s8 + $0x78] sm:$0xff] }
 0x617   : > { %v2882_v36 = vpop.eup %2881 }
 0x618   : > { %v2884_v30 = vpop.eup %2883  ;;  %v1173_v38 = vmul.f32 0.5, %v2882_v36  ;;  %v1318_v36 = vunpack.c.h.bf16 %v2726_v52 }
 0x619   : > { %v1177_v31 = vmul.f32 0.5, %v2884_v30  ;;  %v2886_v41 = vpop.eup %2885 }
 0x61a   : > { %v1174_v25 = vadd.f32 0.5, %v1173_v38  ;;  %v2888_v28 = vpop.eup %2887 }
 0x61b   : > { %v1178_v35 = vadd.f32 0.5, %v1177_v31  ;;  %v1182_v40 = vmul.f32 0.5, %v2888_v28 }
 0x61c   : > { %v1186_v39 = vmul.f32 %v2886_v41, %v1174_v25  ;;  %v1319_v25 = vunpack.c.l.bf16 %v2727_v47 }
 0x61d   : > { %v1185_v43 = vmul.f32 %v1178_v35, %v3591_v59  ;;  %v1183_v33 = vadd.f32 0.5, %v1182_v40 }
 0x61f   : > { %v3632_v37 = vadd.f32 %v1186_v39, %v1185_v43 }
 0x621   : > { %2889 = vtanh.f32 %v3632_v37 }
 0x62b   : > { %v2890_v44 = vpop.eup %2889 }
 0x62c   : > { %v1189_v26 = vmul.f32 %v2890_v44, %v1183_v33 }
 0x62e   : > { %v1192_v48 = vpack.c.bf16 %v1189_v26, %v1189_v26 }
 0x630   : > { %2722 = vst [vmem:[%s3125_s7 + $0x14] sm:$0xf] %v1192_v48  ;;  %1237 = vmatmul.mubr.bf16.vlgmr.msra.gmra.mrb[24].mxu0 %v1192_v48  ;;  %1278 = vmatmul.mubr.bf16.vlgmr.msra.gmra.mrb[24].mxu1 %v1192_v48  ;;  %v1320_v48 = vunpack.c.h.bf16 %v2727_v47 }
 0x631   : > { %1324 = vmatpush1.bf16.msra.mxu0 %v3233_v50  ;;  %1365 = vmatpush1.bf16.msra.mxu1 %v3245_v53 }
 0x632   : > { %1325 = vmatprep.subr.bf16.mxu0 %v3237_v51  ;;  %1366 = vmatprep.subr.bf16.mxu1 %v3249_v54  ;;  %v2724_v51 = vld [vmem:[%s3224_s8 + $0x68] sm:$0xff] }
 0x633   : > { %1355 = vmatprep.mubr.bf16.mxu0 %v4216_v46  ;;  %1396 = vmatprep.mubr.bf16.mxu1 %v4216_v46  ;;  %v2723_v46 = vld [vmem:[%s3224_s8 + $0x60] sm:$0xff] }
 0x634   : > { %v1198_v50 = vunpack.c.l.bf16 %v2723_v46  ;;  %v1199_v53 = vunpack.c.h.bf16 %v2723_v46 }
 0x635   : > { %1326 = vmatpush1.bf16.msra.mxu0 %v3256_v55  ;;  %1367 = vmatpush1.bf16.msra.mxu1 %v3261_v56 }
 0x636   : > { %1327 = vmatprep.subr.bf16.mxu0 %v3266_v57  ;;  %1368 = vmatprep.subr.bf16.mxu1 %v3271_v58  ;;  %v1200_v57 = vunpack.c.l.bf16 %v2724_v51 }
 0x639   : > { %1328 = vmatpush1.bf16.msra.mxu0 %v3278_v60  ;;  %1369 = vmatpush1.bf16.msra.mxu1 %v3283_v61 }
 0x63a   : > { %1329 = vmatprep.subr.bf16.mxu0 %v3288_v62  ;;  %1370 = vmatprep.subr.bf16.mxu1 %v3293_v63 }
 0x63d   : > { %1330 = vmatpush1.bf16.msra.mxu0 %v3298_v0  ;;  %1371 = vmatpush1.bf16.msra.mxu1 %v3303_v1 }
 0x63e   : > { %1331 = vmatprep.subr.bf16.mxu0 %v3308_v2  ;;  %1372 = vmatprep.subr.bf16.mxu1 %v3313_v3 }
 0x641   : > { %1332 = vmatpush1.bf16.msra.mxu0 %v3318_v4  ;;  %1373 = vmatpush1.bf16.msra.mxu1 %v3323_v5 }
 0x642   : > { %1333 = vmatprep.subr.bf16.mxu0 %v3328_v6  ;;  %1374 = vmatprep.subr.bf16.mxu1 %v3333_v7 }
 0x645   : > { %1334 = vmatpush1.bf16.msra.mxu0 %v3338_v8  ;;  %1375 = vmatpush1.bf16.msra.mxu1 %v3343_v9 }
 0x646   : > { %1335 = vmatprep.subr.bf16.mxu0 %v3348_v10  ;;  %1376 = vmatprep.subr.bf16.mxu1 %v3353_v11 }
 0x649   : > { %1336 = vmatpush1.bf16.msra.mxu0 %v3358_v12  ;;  %1377 = vmatpush1.bf16.msra.mxu1 %v3363_v13 }
 0x64a   : > { %1337 = vmatprep.subr.bf16.mxu0 %v3368_v14  ;;  %1378 = vmatprep.subr.bf16.mxu1 %v3373_v15 }
 0x64d   : > { %1338 = vmatpush1.bf16.msra.mxu0 %v3378_v16  ;;  %1379 = vmatpush1.bf16.msra.mxu1 %v3383_v42  ;;  %v1201_v42 = vunpack.c.h.bf16 %v2724_v51 }
 0x703   : > { %v1238_v54 = vpop.f32.mrb[24].mxu0  ;;  %v1279_v55 = vpop.f32.mrb[24].mxu1 }
 0x704   : > { %v1286_v56 = vadd.f32 %v1238_v54, %v1198_v50  ;;  %v1240_v58 = vpop.f32.mrb[25].mxu0  ;;  %v1281_v60 = vpop.f32.mrb[25].mxu1  ;;  %v1288_v4 = vadd.f32 %v1279_v55, %v1200_v57 }
 0x705   : > { %v1287_v61 = vadd.f32 %v1240_v58, %v1199_v53  ;;  %v1242_v62 = vpop.f32.mrb[26].mxu0  ;;  %v1283_v63 = vpop.f32.mrb[26].mxu1  ;;  %v1289_v5 = vadd.f32 %v1281_v60, %v1201_v42 }
 0x706   : > { %v1290_v0 = vmul.f32 0.5, %v1286_v56  ;;  %v1243_v1 = vpop.f32.mrb[27].mxu0  ;;  %v1284_v2 = vpop.f32.mrb[27].mxu1 }
 0x707   : > { %v1294_v3 = vmul.f32 0.5, %v1287_v61  ;;  %v1299_v6 = vmul.f32 0.5, %v1289_v5 }
 0x708   : > { %2891 = vtanh.f32 %v1290_v0 }
 0x709   : > { %2893 = vtanh.f32 %v1294_v3 }
 0x70a   : > { %2895 = vtanh.f32 %v1288_v4 }
 0x70b   : > { %2897 = vtanh.f32 %v1299_v6 }
 0x712   : > { %v2892_v7 = vpop.eup %2891 }
 0x713   : > { %v2894_v8 = vpop.eup %2893  ;;  %v1292_v9 = vmul.f32 0.5, %v2892_v7 }
 0x714   : > { %v1296_v10 = vmul.f32 0.5, %v2894_v8  ;;  %v2896_v12 = vpop.eup %2895 }
 0x715   : > { %v1293_v11 = vadd.f32 0.5, %v1292_v9  ;;  %v2898_v59 = vpop.eup %2897 }
 0x716   : > { %v1297_v13 = vadd.f32 0.5, %v1296_v10  ;;  %v1301_v45 = vmul.f32 0.5, %v2898_v59 }
 0x717   : > { %v1305_v14 = vmul.f32 %v2896_v12, %v1293_v11 }
 0x718   : > { %v1304_v15 = vmul.f32 %v1297_v13, %v3632_v37  ;;  %v1302_v34 = vadd.f32 0.5, %v1301_v45 }
 0x71a   : > { %v1306_v16 = vadd.f32 %v1305_v14, %v1304_v15 }
 0x71c   : > { %2899 = vtanh.f32 %v1306_v16 }
 0x726   : > { %v2900_v32 = vpop.eup %2899 }
 0x727   : > { %v1308_v29 = vmul.f32 %v2900_v32, %v1302_v34 }
 0x729   : > { %v1311_v49 = vpack.c.bf16 %v1308_v29, %v1308_v29 }
 0x72b   : > { %2725 = vst [vmem:[%s3125_s7 + $0x18] sm:$0xf] %v1311_v49  ;;  %1356 = vmatmul.mubr.bf16.vlgmr.msra.gmra.mrb[28].mxu0 %v1311_v49  ;;  %1397 = vmatmul.mubr.bf16.vlgmr.msra.gmra.mrb[28].mxu1 %v1311_v49 }
 0x7fe   : > { %v1357_v30 = vpop.f32.mrb[28].mxu0  ;;  %v1398_v38 = vpop.f32.mrb[28].mxu1 }
 0x7ff   : > { %v1405_v31 = vadd.f32 %v1357_v30, %v1317_v27  ;;  %v1359_v41 = vpop.f32.mrb[29].mxu0  ;;  %v1400_v35 = vpop.f32.mrb[29].mxu1  ;;  %v1407_v26 = vadd.f32 %v1398_v38, %v1319_v25 }
 0x800   : > { %v1406_v39 = vadd.f32 %v1359_v41, %v1318_v36  ;;  %v1361_v43 = vpop.f32.mrb[30].mxu0  ;;  %v1402_v37 = vpop.f32.mrb[30].mxu1  ;;  %v1408_v46 = vadd.f32 %v1400_v35, %v1320_v48 }
 0x801   : > { %v1409_v28 = vmul.f32 0.5, %v1405_v31  ;;  %v1362_v40 = vpop.f32.mrb[31].mxu0  ;;  %v1403_v33 = vpop.f32.mrb[31].mxu1 }
 0x802   : > { %v1413_v44 = vmul.f32 0.5, %v1406_v39  ;;  %v1418_v50 = vmul.f32 0.5, %v1408_v46 }
 0x803   : > { %2901 = vtanh.f32 %v1409_v28 }
 0x804   : > { %2903 = vtanh.f32 %v1413_v44 }
 0x805   : > { %2905 = vtanh.f32 %v1407_v26 }
 0x806   : > { %2907 = vtanh.f32 %v1418_v50 }
 0x80d   : > { %v2902_v51 = vpop.eup %2901 }
 0x80e   : > { %v2904_v53 = vpop.eup %2903  ;;  %v1411_v54 = vmul.f32 0.5, %v2902_v51 }
 0x80f   : > { %v1415_v55 = vmul.f32 0.5, %v2904_v53  ;;  %v2906_v57 = vpop.eup %2905 }
 0x810   : > { %v1412_v56 = vadd.f32 0.5, %v1411_v54  ;;  %v2908_v63 = vpop.eup %2907 }
 0x811   : > { %v1416_v58 = vadd.f32 0.5, %v1415_v55  ;;  %v1420_v0 = vmul.f32 0.5, %v2908_v63 }
 0x812   : > { %v1424_v60 = vmul.f32 %v2906_v57, %v1412_v56 }
 0x813   : > { %v1423_v61 = vmul.f32 %v1416_v58, %v1306_v16  ;;  %v1421_v1 = vadd.f32 0.5, %v1420_v0 }
 0x815   : > { %v1425_v62 = vadd.f32 %v1424_v60, %v1423_v61 }
 0x817   : > { %2909 = vtanh.f32 %v1425_v62  ;;  %1428 = vst [vmem:[#allocation3] sm:$0xff] %v1425_v62 }
 0x821   : > { %v2910_v2 = vpop.eup %2909 }
 0x822   : > { %v1427_v3 = vmul.f32 %v2910_v2, %v1421_v1 }
 0x824   : > { %1429 = vst [vmem:[#allocation2] sm:$0xff] %v1427_v3  ;;  %v1430_v4 = vpack.c.bf16 %v1427_v3, %v1427_v3 }
 0x826   : > { %2728 = vst [vmem:[%s3125_s7 + $0x1c] sm:$0xf] %v1430_v4 }
 0x827 PF: > { %p2729_p11 = scmp.ne.s32.totalorder %s3021_s11, 1 }
 0x828   : > { %v3678_v42 = vcombine.high (!%p2729_p11), %v3128_v17, %v3134_v19  ;;  %v3682_v5 = vcombine.low (!%p2729_p11), %v3128_v17, %v3134_v19  ;;  %v3686_v6 = vcombine.high (!%p2729_p11), %v3140_v21, %v3146_v23  ;;  %v3690_v7 = vcombine.high (!%p2729_p11), %v3131_v18, %v3137_v20  ;;  %v4217_v19 = vld [vmem:[#allocation7_spill] sm:$0xff] (!%p2729_p11)  ;;  %v4219_v11 = vld [vmem:[#allocation8_spill] sm:$0xff] (!%p2729_p11)  ;;  %v4220_v12 = vld [vmem:[#allocation6_spill] sm:$0xff] (!%p2729_p11) }
 0x829   : > { %1436 = sbr.rel (%p2729_p11) target bundleno = 4131 (0x1023), region = 63  ;;  %v3694_v8 = vcombine.low (!%p2729_p11), %v3131_v18, %v3137_v20  ;;  %v3698_v9 = vcombine.high (!%p2729_p11), %v3143_v22, %v3149_v24  ;;  %v3705_v17 = vcombine.low (!%p2729_p11), %v3140_v21, %v3146_v23  ;;  %v3710_v18 = vcombine.low (!%p2729_p11), %v3143_v22, %v3149_v24  ;;  %v4218_v20 = vld [vmem:[#allocation5_spill] sm:$0xff] (!%p2729_p11)  ;;  %v4221_v24 = vld [vmem:[#allocation11_spill] sm:$0xff] (!%p2729_p11)  ;;  %v4223_v16 = vld [vmem:[#allocation12_spill] sm:$0xff] (!%p2729_p11) }
 0x82a   : > { %1606 = vmatprep.subr.bf16.mxu0 (!%p2729_p11), %v3678_v42  ;;  %1647 = vmatprep.subr.bf16.mxu1 (!%p2729_p11), %v3690_v7  ;;  %v3715_v10 = vcombine.high (!%p2729_p11), %v4218_v20, %v4217_v19  ;;  %v3720_v13 = vcombine.high (!%p2729_p11), %v4220_v12, %v4219_v11  ;;  %v3033_v21 = vmov (!%p2729_p11), 0   ;;  %v3727_v22 = vcombine.low (!%p2729_p11), %v4218_v20, %v4217_v19  ;;  %v4222_v14 = vld [vmem:[#allocation9_spill] sm:$0xff] (!%p2729_p11)  ;;  %v4224_v59 = vld [vmem:[#allocation10_spill] sm:$0xff] (!%p2729_p11)  ;;  %v4225_v29 = vld [vmem:[#allocation15_spill] sm:$0xff] (!%p2729_p11) }
 0x82b   : > { %1607 = vmatpush1.bf16.msra.mxu0 (!%p2729_p11), %v3682_v5  ;;  %1648 = vmatpush1.bf16.msra.mxu1 (!%p2729_p11), %v3694_v8  ;;  %v3732_v23 = vcombine.low (!%p2729_p11), %v4220_v12, %v4219_v11  ;;  %v3737_v15 = vcombine.high (!%p2729_p11), %v4222_v14, %v4221_v24  ;;  %v3742_v45 = vcombine.high (!%p2729_p11), %v4224_v59, %v4223_v16  ;;  %v4226_v49 = vld [vmem:[#allocation13_spill] sm:$0xff] (!%p2729_p11)  ;;  %v4227_v27 = vld [vmem:[#allocation16_spill] sm:$0xff] (!%p2729_p11)  ;;  %v4228_v47 = vld [vmem:[#allocation14_spill] sm:$0xff] (!%p2729_p11) }
 0x82c   : > { %1608 = vmatprep.subr.bf16.mxu0 (!%p2729_p11), %v3686_v6  ;;  %1649 = vmatprep.subr.bf16.mxu1 (!%p2729_p11), %v3698_v9  ;;  %v3747_v34 = vcombine.low (!%p2729_p11), %v4222_v14, %v4221_v24  ;;  %v3752_v32 = vcombine.low (!%p2729_p11), %v4224_v59, %v4223_v16  ;;  %v3757_v52 = vcombine.high (!%p2729_p11), %v4226_v49, %v4225_v29  ;;  %v4229_v31 = vld [vmem:[#allocation19_spill] sm:$0xff] (!%p2729_p11)  ;;  %v4230_v25 = vld [vmem:[#allocation17_spill] sm:$0xff] (!%p2729_p11)  ;;  %v4231_v35 = vld [vmem:[#allocation20_spill] sm:$0xff] (!%p2729_p11) }
 0x82d   : > { %1638 = vmatprep.mubr.bf16.mxu0 (!%p2729_p11), %v3033_v21  ;;  %1679 = vmatprep.mubr.bf16.mxu1 (!%p2729_p11), %v3033_v21  ;;  %v3762_v36 = vcombine.high (!%p2729_p11), %v4228_v47, %v4227_v27  ;;  %v3767_v30 = vcombine.low (!%p2729_p11), %v4226_v49, %v4225_v29  ;;  %v3772_v38 = vcombine.low (!%p2729_p11), %v4228_v47, %v4227_v27  ;;  %v4232_v39 = vld [vmem:[#allocation18_spill] sm:$0xff] (!%p2729_p11)  ;;  %v4233_v40 = vld [vmem:[#allocation23_spill] sm:$0xff] (!%p2729_p11)  ;;  %v4234_v33 = vld [vmem:[#allocation21_spill] sm:$0xff] (!%p2729_p11) }
 0x82e   : > { %v3777_v41 = vcombine.high (!%p2729_p11), %v4230_v25, %v4229_v31  ;;  %v3782_v43 = vcombine.high (!%p2729_p11), %v4232_v39, %v4231_v35  ;;  %v3787_v37 = vcombine.low (!%p2729_p11), %v4230_v25, %v4229_v31  ;;  %v3792_v28 = vcombine.low (!%p2729_p11), %v4232_v39, %v4231_v35  ;;  %v4235_v26 = vld [vmem:[#allocation24_spill] sm:$0xff] (!%p2729_p11)  ;;  %v4236_v48 = vld [vmem:[#allocation22_spill] sm:$0xff] (!%p2729_p11)  ;;  %v4237_v53 = vld [vmem:[#allocation27_spill] sm:$0xff] (!%p2729_p11) }
 0x82f   : > { %1609 = vmatpush1.bf16.msra.mxu0 (!%p2729_p11), %v3705_v17  ;;  %1650 = vmatpush1.bf16.msra.mxu1 (!%p2729_p11), %v3710_v18  ;;  %v3797_v44 = vcombine.high (!%p2729_p11), %v4234_v33, %v4233_v40  ;;  %v3802_v46 = vcombine.high (!%p2729_p11), %v4236_v48, %v4235_v26  ;;  %v3807_v50 = vcombine.low (!%p2729_p11), %v4234_v33, %v4233_v40  ;;  %v4238_v54 = vld [vmem:[#allocation25_spill] sm:$0xff] (!%p2729_p11)  ;;  %v4239_v56 = vld [vmem:[#allocation28_spill] sm:$0xff] (!%p2729_p11)  ;;  %v4240_v57 = vld [vmem:[#allocation26_spill] sm:$0xff] (!%p2729_p11) }
 0x830   : > { %1610 = vmatprep.subr.bf16.mxu0 %v3715_v10  ;;  %1651 = vmatprep.subr.bf16.mxu1 %v3720_v13  ;;  %v3812_v51 = vcombine.low %v4236_v48, %v4235_v26  ;;  %v3817_v55 = vcombine.high %v4238_v54, %v4237_v53  ;;  %v3822_v58 = vcombine.high %v4240_v57, %v4239_v56  ;;  %v1444_v61 = vld [vmem:[#allocation2] sm:$0xff]  ;;  %v2731_v1 = vld [vmem:[%s3224_s8 + $0x78] sm:$0xff] }
 0x831   : > { %v3827_v60 = vcombine.low %v4238_v54, %v4237_v53  ;;  %v3832_v62 = vcombine.low %v4240_v57, %v4239_v56  ;;  %v1445_v63 = vpack.c.bf16 %v1444_v61, %v1444_v61  ;;  %v2730_v0 = vld [vmem:[%s3224_s8 + $0x70] sm:$0xff]  ;;  %v1442_v4 = vunpack.c.l.bf16 %v2731_v1  ;;  %v1705_v56 = vld [vmem:[#allocation3] sm:$0xff] }
 0x832   : > { %v1440_v2 = vunpack.c.l.bf16 %v2730_v0  ;;  %v1441_v3 = vunpack.c.h.bf16 %v2730_v0  ;;  %v1443_v25 = vunpack.c.h.bf16 %v2731_v1 }
 0x833   : > { %1611 = vmatpush1.bf16.msra.mxu0 %v3727_v22  ;;  %1652 = vmatpush1.bf16.msra.mxu1 %v3732_v23 }
 0x834   : > { %1612 = vmatprep.subr.bf16.mxu0 %v3737_v15  ;;  %1653 = vmatprep.subr.bf16.mxu1 %v3742_v45 }
 0x837   : > { %1613 = vmatpush1.bf16.msra.mxu0 %v3747_v34  ;;  %1654 = vmatpush1.bf16.msra.mxu1 %v3752_v32 }
 0x838   : > { %1614 = vmatprep.subr.bf16.mxu0 %v3757_v52  ;;  %1655 = vmatprep.subr.bf16.mxu1 %v3762_v36 }
 0x83b   : > { %1615 = vmatpush1.bf16.msra.mxu0 %v3767_v30  ;;  %1656 = vmatpush1.bf16.msra.mxu1 %v3772_v38 }
 0x83c   : > { %1616 = vmatprep.subr.bf16.mxu0 %v3777_v41  ;;  %1657 = vmatprep.subr.bf16.mxu1 %v3782_v43 }
 0x83f   : > { %1617 = vmatpush1.bf16.msra.mxu0 %v3787_v37  ;;  %1658 = vmatpush1.bf16.msra.mxu1 %v3792_v28 }
 0x840   : > { %1618 = vmatprep.subr.bf16.mxu0 %v3797_v44  ;;  %1659 = vmatprep.subr.bf16.mxu1 %v3802_v46 }
 0x843   : > { %1619 = vmatpush1.bf16.msra.mxu0 %v3807_v50  ;;  %1660 = vmatpush1.bf16.msra.mxu1 %v3812_v51 }
 0x844   : > { %1620 = vmatprep.subr.bf16.mxu0 %v3817_v55  ;;  %1661 = vmatprep.subr.bf16.mxu1 %v3822_v58 }
 0x847   : > { %1621 = vmatpush1.bf16.msra.mxu0 %v3827_v60  ;;  %1662 = vmatpush1.bf16.msra.mxu1 %v3832_v62 }
 0x848   : > { %1725 = vmatprep.subr.bf16.mxu0 %v3678_v42  ;;  %1766 = vmatprep.subr.bf16.mxu1 %v3690_v7 }
 0x84a   : > { %1639 = vmatmul.mubr.bf16.vlgmr.msra.gmra.mrb[0].mxu0 %v1445_v63  ;;  %1680 = vmatmul.mubr.bf16.vlgmr.msra.gmra.mrb[0].mxu1 %v1445_v63 }
 0x84b   : > { %1726 = vmatpush1.bf16.msra.mxu0 %v3682_v5  ;;  %1767 = vmatpush1.bf16.msra.mxu1 %v3694_v8 }
 0x84c   : > { %1727 = vmatprep.subr.bf16.mxu0 %v3686_v6  ;;  %1768 = vmatprep.subr.bf16.mxu1 %v3698_v9 }
 0x84d   : > { %1757 = vmatprep.mubr.bf16.mxu0 %v3033_v21  ;;  %1798 = vmatprep.mubr.bf16.mxu1 %v3033_v21 }
 0x84f   : > { %1728 = vmatpush1.bf16.msra.mxu0 %v3705_v17  ;;  %1769 = vmatpush1.bf16.msra.mxu1 %v3710_v18 }
 0x850   : > { %1729 = vmatprep.subr.bf16.mxu0 %v3715_v10  ;;  %1770 = vmatprep.subr.bf16.mxu1 %v3720_v13 }
 0x853   : > { %1730 = vmatpush1.bf16.msra.mxu0 %v3727_v22  ;;  %1771 = vmatpush1.bf16.msra.mxu1 %v3732_v23 }
 0x854   : > { %1731 = vmatprep.subr.bf16.mxu0 %v3737_v15  ;;  %1772 = vmatprep.subr.bf16.mxu1 %v3742_v45 }
 0x857   : > { %1732 = vmatpush1.bf16.msra.mxu0 %v3747_v34  ;;  %1773 = vmatpush1.bf16.msra.mxu1 %v3752_v32 }
 0x858   : > { %1733 = vmatprep.subr.bf16.mxu0 %v3757_v52  ;;  %1774 = vmatprep.subr.bf16.mxu1 %v3762_v36 }
 0x85b   : > { %1734 = vmatpush1.bf16.msra.mxu0 %v3767_v30  ;;  %1775 = vmatpush1.bf16.msra.mxu1 %v3772_v38 }
 0x85c   : > { %1735 = vmatprep.subr.bf16.mxu0 %v3777_v41  ;;  %1776 = vmatprep.subr.bf16.mxu1 %v3782_v43 }
 0x85f   : > { %1736 = vmatpush1.bf16.msra.mxu0 %v3787_v37  ;;  %1777 = vmatpush1.bf16.msra.mxu1 %v3792_v28 }
 0x860   : > { %1737 = vmatprep.subr.bf16.mxu0 %v3797_v44  ;;  %1778 = vmatprep.subr.bf16.mxu1 %v3802_v46 }
 0x863   : > { %1738 = vmatpush1.bf16.msra.mxu0 %v3807_v50  ;;  %1779 = vmatpush1.bf16.msra.mxu1 %v3812_v51 }
 0x864   : > { %1739 = vmatprep.subr.bf16.mxu0 %v3817_v55  ;;  %1780 = vmatprep.subr.bf16.mxu1 %v3822_v58 }
 0x867   : > { %1740 = vmatpush1.bf16.msra.mxu0 %v3827_v60  ;;  %1781 = vmatpush1.bf16.msra.mxu1 %v3832_v62 }
 0x868   : > { %1844 = vmatprep.subr.bf16.mxu0 %v3678_v42  ;;  %1885 = vmatprep.subr.bf16.mxu1 %v3690_v7 }
 0x91d   : > { %v1640_v19 = vpop.f32.mrb[0].mxu0  ;;  %v1681_v20 = vpop.f32.mrb[0].mxu1 }
 0x91e   : > { %v1688_v11 = vadd.f32 %v1640_v19, %v1440_v2  ;;  %v1642_v12 = vpop.f32.mrb[1].mxu0  ;;  %v1683_v24 = vpop.f32.mrb[1].mxu1  ;;  %v1690_v27 = vadd.f32 %v1681_v20, %v1442_v4 }
 0x91f   : > { %v1689_v14 = vadd.f32 %v1642_v12, %v1441_v3  ;;  %v1644_v16 = vpop.f32.mrb[2].mxu0  ;;  %v1685_v59 = vpop.f32.mrb[2].mxu1  ;;  %v1691_v35 = vadd.f32 %v1683_v24, %v1443_v25  ;;  %v2766_v24 = vld [vmem:[%s3224_s8 + $0x68] sm:$0xff] }
 0x920   : > { %v1692_v29 = vmul.f32 0.5, %v1688_v11  ;;  %v1645_v49 = vpop.f32.mrb[3].mxu0  ;;  %v1686_v47 = vpop.f32.mrb[3].mxu1  ;;  %v2765_v11 = vld [vmem:[%s3224_s8 + $0x60] sm:$0xff] }
 0x921   : > { %v1696_v31 = vmul.f32 0.5, %v1689_v14  ;;  %v1701_v39 = vmul.f32 0.5, %v1691_v35  ;;  %v1719_v12 = vunpack.c.l.bf16 %v2765_v11  ;;  %v1720_v14 = vunpack.c.h.bf16 %v2765_v11 }
 0x922   : > { %2911 = vtanh.f32 %v1692_v29  ;;  %v1721_v49 = vunpack.c.l.bf16 %v2766_v24 }
 0x923   : > { %2913 = vtanh.f32 %v1696_v31 }
 0x924   : > { %2915 = vtanh.f32 %v1690_v27 }
 0x925   : > { %2917 = vtanh.f32 %v1701_v39 }
 0x92c   : > { %v2912_v40 = vpop.eup %2911 }
 0x92d   : > { %v2914_v33 = vpop.eup %2913  ;;  %v1694_v26 = vmul.f32 0.5, %v2912_v40 }
 0x92e   : > { %v2916_v48 = vpop.eup %2915  ;;  %v1698_v53 = vmul.f32 0.5, %v2914_v33 }
 0x92f   : > { %v1695_v54 = vadd.f32 0.5, %v1694_v26  ;;  %v2918_v1 = vpop.eup %2917 }
 0x930   : > { %v1699_v57 = vadd.f32 0.5, %v1698_v53  ;;  %v1703_v2 = vmul.f32 0.5, %v2918_v1  ;;  %v1722_v53 = vunpack.c.h.bf16 %v2766_v24 }
 0x931   : > { %v1707_v61 = vmul.f32 %v2916_v48, %v1695_v54 }
 0x932   : > { %v1706_v63 = vmul.f32 %v1705_v56, %v1699_v57  ;;  %v1704_v3 = vadd.f32 0.5, %v1703_v2 }
 0x934   : > { %v3876_v0 = vadd.f32 %v1707_v61, %v1706_v63 }
 0x936   : > { %2919 = vtanh.f32 %v3876_v0 }
 0x940   : > { %v2920_v4 = vpop.eup %2919 }
 0x941   : > { %v1710_v19 = vmul.f32 %v2920_v4, %v1704_v3 }
 0x943   : > { %v1713_v20 = vpack.c.bf16 %v1710_v19, %v1710_v19 }
 0x945   : > { %2764 = vst [vmem:[%s3125_s7 + $0x1c] sm:$0xf] %v1713_v20  ;;  %1758 = vmatmul.mubr.bf16.vlgmr.msra.gmra.mrb[4].mxu0 %v1713_v20  ;;  %1799 = vmatmul.mubr.bf16.vlgmr.msra.gmra.mrb[4].mxu1 %v1713_v20 }
 0x946   : > { %1845 = vmatpush1.bf16.msra.mxu0 %v3682_v5  ;;  %1886 = vmatpush1.bf16.msra.mxu1 %v3694_v8 }
 0x947   : > { %1846 = vmatprep.subr.bf16.mxu0 %v3686_v6  ;;  %1887 = vmatprep.subr.bf16.mxu1 %v3698_v9 }
 0x948   : > { %1876 = vmatprep.mubr.bf16.mxu0 %v3033_v21  ;;  %1917 = vmatprep.mubr.bf16.mxu1 %v3033_v21 }
 0x94a   : > { %1847 = vmatpush1.bf16.msra.mxu0 %v3705_v17  ;;  %1888 = vmatpush1.bf16.msra.mxu1 %v3710_v18 }
 0x94b   : > { %1848 = vmatprep.subr.bf16.mxu0 %v3715_v10  ;;  %1889 = vmatprep.subr.bf16.mxu1 %v3720_v13 }
 0x94e   : > { %1849 = vmatpush1.bf16.msra.mxu0 %v3727_v22  ;;  %1890 = vmatpush1.bf16.msra.mxu1 %v3732_v23 }
 0x94f   : > { %1850 = vmatprep.subr.bf16.mxu0 %v3737_v15  ;;  %1891 = vmatprep.subr.bf16.mxu1 %v3742_v45 }
 0x952   : > { %1851 = vmatpush1.bf16.msra.mxu0 %v3747_v34  ;;  %1892 = vmatpush1.bf16.msra.mxu1 %v3752_v32 }
 0x953   : > { %1852 = vmatprep.subr.bf16.mxu0 %v3757_v52  ;;  %1893 = vmatprep.subr.bf16.mxu1 %v3762_v36 }
 0x956   : > { %1853 = vmatpush1.bf16.msra.mxu0 %v3767_v30  ;;  %1894 = vmatpush1.bf16.msra.mxu1 %v3772_v38 }
 0x957   : > { %1854 = vmatprep.subr.bf16.mxu0 %v3777_v41  ;;  %1895 = vmatprep.subr.bf16.mxu1 %v3782_v43 }
 0x95a   : > { %1855 = vmatpush1.bf16.msra.mxu0 %v3787_v37  ;;  %1896 = vmatpush1.bf16.msra.mxu1 %v3792_v28 }
 0x95b   : > { %1856 = vmatprep.subr.bf16.mxu0 %v3797_v44  ;;  %1897 = vmatprep.subr.bf16.mxu1 %v3802_v46 }
 0x95e   : > { %1857 = vmatpush1.bf16.msra.mxu0 %v3807_v50  ;;  %1898 = vmatpush1.bf16.msra.mxu1 %v3812_v51 }
 0x95f   : > { %1858 = vmatprep.subr.bf16.mxu0 %v3817_v55  ;;  %1899 = vmatprep.subr.bf16.mxu1 %v3822_v58 }
 0x962   : > { %1859 = vmatpush1.bf16.msra.mxu0 %v3827_v60  ;;  %1900 = vmatpush1.bf16.msra.mxu1 %v3832_v62 }
 0x963   : > { %1963 = vmatprep.subr.bf16.mxu0 %v3678_v42  ;;  %2004 = vmatprep.subr.bf16.mxu1 %v3690_v7 }
 0xa18   : > { %v1759_v16 = vpop.f32.mrb[4].mxu0  ;;  %v1800_v59 = vpop.f32.mrb[4].mxu1 }
 0xa19   : > { %v1807_v29 = vadd.f32 %v1759_v16, %v1719_v12  ;;  %v1761_v27 = vpop.f32.mrb[5].mxu0  ;;  %v1802_v47 = vpop.f32.mrb[5].mxu1  ;;  %v1809_v48 = vadd.f32 %v1800_v59, %v1721_v49 }
 0xa1a   : > { %v1808_v31 = vadd.f32 %v1761_v27, %v1720_v14  ;;  %v1763_v25 = vpop.f32.mrb[6].mxu0  ;;  %v1804_v35 = vpop.f32.mrb[6].mxu1  ;;  %v1810_v54 = vadd.f32 %v1802_v47, %v1722_v53  ;;  %v2769_v27 = vld [vmem:[%s3224_s8 + $0x58] sm:$0xff] }
 0xa1b   : > { %v1811_v39 = vmul.f32 0.5, %v1807_v29  ;;  %v1764_v40 = vpop.f32.mrb[7].mxu0  ;;  %v1805_v33 = vpop.f32.mrb[7].mxu1 }
 0xa1c   : > { %v1815_v26 = vmul.f32 0.5, %v1808_v31  ;;  %v1820_v56 = vmul.f32 0.5, %v1810_v54 }
 0xa1d   : > { %2921 = vtanh.f32 %v1811_v39  ;;  %v1840_v39 = vunpack.c.l.bf16 %v2769_v27 }
 0xa1e   : > { %2923 = vtanh.f32 %v1815_v26 }
 0xa1f   : > { %2925 = vtanh.f32 %v1809_v48 }
 0xa20   : > { %2927 = vtanh.f32 %v1820_v56 }
 0xa27   : > { %v2922_v57 = vpop.eup %2921 }
 0xa28   : > { %v2924_v61 = vpop.eup %2923  ;;  %v1813_v63 = vmul.f32 0.5, %v2922_v57 }
 0xa29   : > { %v1817_v1 = vmul.f32 0.5, %v2924_v61  ;;  %v2926_v3 = vpop.eup %2925 }
 0xa2a   : > { %v1814_v2 = vadd.f32 0.5, %v1813_v63  ;;  %v2928_v12 = vpop.eup %2927 }
 0xa2b   : > { %v1818_v4 = vadd.f32 0.5, %v1817_v1  ;;  %v1822_v24 = vmul.f32 0.5, %v2928_v12  ;;  %v1841_v1 = vunpack.c.h.bf16 %v2769_v27 }
 0xa2c   : > { %v1826_v19 = vmul.f32 %v2926_v3, %v1814_v2 }
 0xa2d   : > { %v1825_v20 = vmul.f32 %v1818_v4, %v3876_v0  ;;  %v1823_v14 = vadd.f32 0.5, %v1822_v24  ;;  %v2768_v0 = vld [vmem:[%s3224_s8 + $0x50] sm:$0xff] }
 0xa2e   : > { %v1838_v49 = vunpack.c.l.bf16 %v2768_v0  ;;  %v1839_v47 = vunpack.c.h.bf16 %v2768_v0 }
 0xa2f   : > { %v3917_v11 = vadd.f32 %v1826_v19, %v1825_v20 }
 0xa31   : > { %2929 = vtanh.f32 %v3917_v11 }
 0xa3b   : > { %v2930_v16 = vpop.eup %2929 }
 0xa3c   : > { %v1829_v59 = vmul.f32 %v2930_v16, %v1823_v14 }
 0xa3e   : > { %v1832_v29 = vpack.c.bf16 %v1829_v59, %v1829_v59 }
 0xa40   : > { %2767 = vst [vmem:[%s3125_s7 + $0x18] sm:$0xf] %v1832_v29  ;;  %1877 = vmatmul.mubr.bf16.vlgmr.msra.gmra.mrb[8].mxu0 %v1832_v29  ;;  %1918 = vmatmul.mubr.bf16.vlgmr.msra.gmra.mrb[8].mxu1 %v1832_v29 }
 0xa41   : > { %1964 = vmatpush1.bf16.msra.mxu0 %v3682_v5  ;;  %2005 = vmatpush1.bf16.msra.mxu1 %v3694_v8 }
 0xa42   : > { %1965 = vmatprep.subr.bf16.mxu0 %v3686_v6  ;;  %2006 = vmatprep.subr.bf16.mxu1 %v3698_v9 }
 0xa43   : > { %1995 = vmatprep.mubr.bf16.mxu0 %v3033_v21  ;;  %2036 = vmatprep.mubr.bf16.mxu1 %v3033_v21 }
 0xa45   : > { %1966 = vmatpush1.bf16.msra.mxu0 %v3705_v17  ;;  %2007 = vmatpush1.bf16.msra.mxu1 %v3710_v18 }
 0xa46   : > { %1967 = vmatprep.subr.bf16.mxu0 %v3715_v10  ;;  %2008 = vmatprep.subr.bf16.mxu1 %v3720_v13 }
 0xa49   : > { %1968 = vmatpush1.bf16.msra.mxu0 %v3727_v22  ;;  %2009 = vmatpush1.bf16.msra.mxu1 %v3732_v23 }
 0xa4a   : > { %1969 = vmatprep.subr.bf16.mxu0 %v3737_v15  ;;  %2010 = vmatprep.subr.bf16.mxu1 %v3742_v45 }
 0xa4d   : > { %1970 = vmatpush1.bf16.msra.mxu0 %v3747_v34  ;;  %2011 = vmatpush1.bf16.msra.mxu1 %v3752_v32 }
 0xa4e   : > { %1971 = vmatprep.subr.bf16.mxu0 %v3757_v52  ;;  %2012 = vmatprep.subr.bf16.mxu1 %v3762_v36 }
 0xa51   : > { %1972 = vmatpush1.bf16.msra.mxu0 %v3767_v30  ;;  %2013 = vmatpush1.bf16.msra.mxu1 %v3772_v38 }
 0xa52   : > { %1973 = vmatprep.subr.bf16.mxu0 %v3777_v41  ;;  %2014 = vmatprep.subr.bf16.mxu1 %v3782_v43 }
 0xa55   : > { %1974 = vmatpush1.bf16.msra.mxu0 %v3787_v37  ;;  %2015 = vmatpush1.bf16.msra.mxu1 %v3792_v28 }
 0xa56   : > { %1975 = vmatprep.subr.bf16.mxu0 %v3797_v44  ;;  %2016 = vmatprep.subr.bf16.mxu1 %v3802_v46 }
 0xa59   : > { %1976 = vmatpush1.bf16.msra.mxu0 %v3807_v50  ;;  %2017 = vmatpush1.bf16.msra.mxu1 %v3812_v51 }
 0xa5a   : > { %1977 = vmatprep.subr.bf16.mxu0 %v3817_v55  ;;  %2018 = vmatprep.subr.bf16.mxu1 %v3822_v58 }
 0xa5d   : > { %1978 = vmatpush1.bf16.msra.mxu0 %v3827_v60  ;;  %2019 = vmatpush1.bf16.msra.mxu1 %v3832_v62 }
 0xa5e   : > { %2082 = vmatprep.subr.bf16.mxu0 %v3678_v42  ;;  %2123 = vmatprep.subr.bf16.mxu1 %v3690_v7 }
 0xb13   : > { %v1878_v31 = vpop.f32.mrb[8].mxu0  ;;  %v1919_v25 = vpop.f32.mrb[8].mxu1 }
 0xb14   : > { %v1926_v35 = vadd.f32 %v1878_v31, %v1838_v49  ;;  %v1880_v40 = vpop.f32.mrb[9].mxu0  ;;  %v1921_v33 = vpop.f32.mrb[9].mxu1  ;;  %v1928_v63 = vadd.f32 %v1919_v25, %v1840_v39 }
 0xb15   : > { %v1927_v26 = vadd.f32 %v1880_v40, %v1839_v47  ;;  %v1882_v48 = vpop.f32.mrb[10].mxu0  ;;  %v1923_v53 = vpop.f32.mrb[10].mxu1  ;;  %v1929_v2 = vadd.f32 %v1921_v33, %v1841_v1  ;;  %v2772_v40 = vld [vmem:[%s3224_s8 + $0x48] sm:$0xff] }
 0xb16   : > { %v1930_v54 = vmul.f32 0.5, %v1926_v35  ;;  %v1883_v56 = vpop.f32.mrb[11].mxu0  ;;  %v1924_v57 = vpop.f32.mrb[11].mxu1 }
 0xb17   : > { %v1934_v61 = vmul.f32 0.5, %v1927_v26  ;;  %v1939_v3 = vmul.f32 0.5, %v1929_v2 }
 0xb18   : > { %2931 = vtanh.f32 %v1930_v54  ;;  %v1959_v54 = vunpack.c.l.bf16 %v2772_v40 }
 0xb19   : > { %2933 = vtanh.f32 %v1934_v61 }
 0xb1a   : > { %2935 = vtanh.f32 %v1928_v63 }
 0xb1b   : > { %2937 = vtanh.f32 %v1939_v3 }
 0xb22   : > { %v2932_v4 = vpop.eup %2931 }
 0xb23   : > { %v2934_v19 = vpop.eup %2933  ;;  %v1932_v20 = vmul.f32 0.5, %v2932_v4 }
 0xb24   : > { %v1936_v12 = vmul.f32 0.5, %v2934_v19  ;;  %v2936_v14 = vpop.eup %2935 }
 0xb25   : > { %v1933_v24 = vadd.f32 0.5, %v1932_v20  ;;  %v2938_v49 = vpop.eup %2937 }
 0xb26   : > { %v1937_v16 = vadd.f32 0.5, %v1936_v12  ;;  %v1941_v27 = vmul.f32 0.5, %v2938_v49  ;;  %v1960_v12 = vunpack.c.h.bf16 %v2772_v40 }
 0xb27   : > { %v1945_v59 = vmul.f32 %v2936_v14, %v1933_v24 }
 0xb28   : > { %v1944_v29 = vmul.f32 %v1937_v16, %v3917_v11  ;;  %v1942_v47 = vadd.f32 0.5, %v1941_v27  ;;  %v2771_v11 = vld [vmem:[%s3224_s8 + $0x40] sm:$0xff] }
 0xb29   : > { %v1957_v39 = vunpack.c.l.bf16 %v2771_v11  ;;  %v1958_v33 = vunpack.c.h.bf16 %v2771_v11 }
 0xb2a   : > { %v3958_v0 = vadd.f32 %v1945_v59, %v1944_v29 }
 0xb2c   : > { %2939 = vtanh.f32 %v3958_v0 }
 0xb36   : > { %v2940_v31 = vpop.eup %2939 }
 0xb37   : > { %v1948_v25 = vmul.f32 %v2940_v31, %v1942_v47 }
 0xb39   : > { %v1951_v35 = vpack.c.bf16 %v1948_v25, %v1948_v25 }
 0xb3b   : > { %2770 = vst [vmem:[%s3125_s7 + $0x14] sm:$0xf] %v1951_v35  ;;  %1996 = vmatmul.mubr.bf16.vlgmr.msra.gmra.mrb[12].mxu0 %v1951_v35  ;;  %2037 = vmatmul.mubr.bf16.vlgmr.msra.gmra.mrb[12].mxu1 %v1951_v35 }
 0xb3c   : > { %2083 = vmatpush1.bf16.msra.mxu0 %v3682_v5  ;;  %2124 = vmatpush1.bf16.msra.mxu1 %v3694_v8 }
 0xb3d   : > { %2084 = vmatprep.subr.bf16.mxu0 %v3686_v6  ;;  %2125 = vmatprep.subr.bf16.mxu1 %v3698_v9 }
 0xb3e   : > { %2114 = vmatprep.mubr.bf16.mxu0 %v3033_v21  ;;  %2155 = vmatprep.mubr.bf16.mxu1 %v3033_v21 }
 0xb40   : > { %2085 = vmatpush1.bf16.msra.mxu0 %v3705_v17  ;;  %2126 = vmatpush1.bf16.msra.mxu1 %v3710_v18 }
 0xb41   : > { %2086 = vmatprep.subr.bf16.mxu0 %v3715_v10  ;;  %2127 = vmatprep.subr.bf16.mxu1 %v3720_v13 }
 0xb44   : > { %2087 = vmatpush1.bf16.msra.mxu0 %v3727_v22  ;;  %2128 = vmatpush1.bf16.msra.mxu1 %v3732_v23 }
 0xb45   : > { %2088 = vmatprep.subr.bf16.mxu0 %v3737_v15  ;;  %2129 = vmatprep.subr.bf16.mxu1 %v3742_v45 }
 0xb48   : > { %2089 = vmatpush1.bf16.msra.mxu0 %v3747_v34  ;;  %2130 = vmatpush1.bf16.msra.mxu1 %v3752_v32 }
 0xb49   : > { %2090 = vmatprep.subr.bf16.mxu0 %v3757_v52  ;;  %2131 = vmatprep.subr.bf16.mxu1 %v3762_v36 }
 0xb4c   : > { %2091 = vmatpush1.bf16.msra.mxu0 %v3767_v30  ;;  %2132 = vmatpush1.bf16.msra.mxu1 %v3772_v38 }
 0xb4d   : > { %2092 = vmatprep.subr.bf16.mxu0 %v3777_v41  ;;  %2133 = vmatprep.subr.bf16.mxu1 %v3782_v43 }
 0xb50   : > { %2093 = vmatpush1.bf16.msra.mxu0 %v3787_v37  ;;  %2134 = vmatpush1.bf16.msra.mxu1 %v3792_v28 }
 0xb51   : > { %2094 = vmatprep.subr.bf16.mxu0 %v3797_v44  ;;  %2135 = vmatprep.subr.bf16.mxu1 %v3802_v46 }
 0xb54   : > { %2095 = vmatpush1.bf16.msra.mxu0 %v3807_v50  ;;  %2136 = vmatpush1.bf16.msra.mxu1 %v3812_v51 }
 0xb55   : > { %2096 = vmatprep.subr.bf16.mxu0 %v3817_v55  ;;  %2137 = vmatprep.subr.bf16.mxu1 %v3822_v58 }
 0xb58   : > { %2097 = vmatpush1.bf16.msra.mxu0 %v3827_v60  ;;  %2138 = vmatpush1.bf16.msra.mxu1 %v3832_v62 }
 0xb59   : > { %2201 = vmatprep.subr.bf16.mxu0 %v3678_v42  ;;  %2242 = vmatprep.subr.bf16.mxu1 %v3690_v7 }
 0xc0e   : > { %v1997_v26 = vpop.f32.mrb[12].mxu0  ;;  %v2038_v48 = vpop.f32.mrb[12].mxu1 }
 0xc0f   : > { %v2045_v53 = vadd.f32 %v1997_v26, %v1957_v39  ;;  %v1999_v56 = vpop.f32.mrb[13].mxu0  ;;  %v2040_v57 = vpop.f32.mrb[13].mxu1  ;;  %v2047_v20 = vadd.f32 %v2038_v48, %v1959_v54 }
 0xc10   : > { %v2046_v61 = vadd.f32 %v1999_v56, %v1958_v33  ;;  %v2001_v63 = vpop.f32.mrb[14].mxu0  ;;  %v2042_v1 = vpop.f32.mrb[14].mxu1  ;;  %v2048_v24 = vadd.f32 %v2040_v57, %v1960_v12  ;;  %v2775_v56 = vld [vmem:[%s3224_s8 + $0x38] sm:$0xff] }
 0xc11   : > { %v2049_v2 = vmul.f32 0.5, %v2045_v53  ;;  %v2002_v3 = vpop.f32.mrb[15].mxu0  ;;  %v2043_v4 = vpop.f32.mrb[15].mxu1 }
 0xc12   : > { %v2053_v19 = vmul.f32 0.5, %v2046_v61  ;;  %v2058_v14 = vmul.f32 0.5, %v2048_v24 }
 0xc13   : > { %2941 = vtanh.f32 %v2049_v2  ;;  %v2078_v2 = vunpack.c.l.bf16 %v2775_v56 }
 0xc14   : > { %2943 = vtanh.f32 %v2053_v19 }
 0xc15   : > { %2945 = vtanh.f32 %v2047_v20 }
 0xc16   : > { %2947 = vtanh.f32 %v2058_v14 }
 0xc1d   : > { %v2942_v16 = vpop.eup %2941 }
 0xc1e   : > { %v2944_v59 = vpop.eup %2943  ;;  %v2051_v29 = vmul.f32 0.5, %v2942_v16 }
 0xc1f   : > { %v2055_v49 = vmul.f32 0.5, %v2944_v59  ;;  %v2946_v47 = vpop.eup %2945 }
 0xc20   : > { %v2052_v27 = vadd.f32 0.5, %v2051_v29  ;;  %v2948_v39 = vpop.eup %2947 }
 0xc21   : > { %v2056_v31 = vadd.f32 0.5, %v2055_v49  ;;  %v2060_v40 = vmul.f32 0.5, %v2948_v39  ;;  %v2079_v49 = vunpack.c.h.bf16 %v2775_v56 }
 0xc22   : > { %v2064_v25 = vmul.f32 %v2946_v47, %v2052_v27 }
 0xc23   : > { %v2063_v35 = vmul.f32 %v2056_v31, %v3958_v0  ;;  %v2061_v33 = vadd.f32 0.5, %v2060_v40  ;;  %v2774_v0 = vld [vmem:[%s3224_s8 + $0x30] sm:$0xff] }
 0xc24   : > { %v2076_v54 = vunpack.c.l.bf16 %v2774_v0  ;;  %v2077_v57 = vunpack.c.h.bf16 %v2774_v0 }
 0xc25   : > { %v3999_v11 = vadd.f32 %v2064_v25, %v2063_v35 }
 0xc27   : > { %2949 = vtanh.f32 %v3999_v11 }
 0xc31   : > { %v2950_v26 = vpop.eup %2949 }
 0xc32   : > { %v2067_v48 = vmul.f32 %v2950_v26, %v2061_v33 }
 0xc34   : > { %v2070_v53 = vpack.c.bf16 %v2067_v48, %v2067_v48 }
 0xc36   : > { %2773 = vst [vmem:[%s3125_s7 + $0x10] sm:$0xf] %v2070_v53  ;;  %2115 = vmatmul.mubr.bf16.vlgmr.msra.gmra.mrb[16].mxu0 %v2070_v53  ;;  %2156 = vmatmul.mubr.bf16.vlgmr.msra.gmra.mrb[16].mxu1 %v2070_v53 }
 0xc37   : > { %2202 = vmatpush1.bf16.msra.mxu0 %v3682_v5  ;;  %2243 = vmatpush1.bf16.msra.mxu1 %v3694_v8 }
 0xc38   : > { %2203 = vmatprep.subr.bf16.mxu0 %v3686_v6  ;;  %2244 = vmatprep.subr.bf16.mxu1 %v3698_v9 }
 0xc39   : > { %2233 = vmatprep.mubr.bf16.mxu0 %v3033_v21  ;;  %2274 = vmatprep.mubr.bf16.mxu1 %v3033_v21 }
 0xc3b   : > { %2204 = vmatpush1.bf16.msra.mxu0 %v3705_v17  ;;  %2245 = vmatpush1.bf16.msra.mxu1 %v3710_v18 }
 0xc3c   : > { %2205 = vmatprep.subr.bf16.mxu0 %v3715_v10  ;;  %2246 = vmatprep.subr.bf16.mxu1 %v3720_v13 }
 0xc3f   : > { %2206 = vmatpush1.bf16.msra.mxu0 %v3727_v22  ;;  %2247 = vmatpush1.bf16.msra.mxu1 %v3732_v23 }
 0xc40   : > { %2207 = vmatprep.subr.bf16.mxu0 %v3737_v15  ;;  %2248 = vmatprep.subr.bf16.mxu1 %v3742_v45 }
 0xc43   : > { %2208 = vmatpush1.bf16.msra.mxu0 %v3747_v34  ;;  %2249 = vmatpush1.bf16.msra.mxu1 %v3752_v32 }
 0xc44   : > { %2209 = vmatprep.subr.bf16.mxu0 %v3757_v52  ;;  %2250 = vmatprep.subr.bf16.mxu1 %v3762_v36 }
 0xc47   : > { %2210 = vmatpush1.bf16.msra.mxu0 %v3767_v30  ;;  %2251 = vmatpush1.bf16.msra.mxu1 %v3772_v38 }
 0xc48   : > { %2211 = vmatprep.subr.bf16.mxu0 %v3777_v41  ;;  %2252 = vmatprep.subr.bf16.mxu1 %v3782_v43 }
 0xc4b   : > { %2212 = vmatpush1.bf16.msra.mxu0 %v3787_v37  ;;  %2253 = vmatpush1.bf16.msra.mxu1 %v3792_v28 }
 0xc4c   : > { %2213 = vmatprep.subr.bf16.mxu0 %v3797_v44  ;;  %2254 = vmatprep.subr.bf16.mxu1 %v3802_v46 }
 0xc4f   : > { %2214 = vmatpush1.bf16.msra.mxu0 %v3807_v50  ;;  %2255 = vmatpush1.bf16.msra.mxu1 %v3812_v51 }
 0xc50   : > { %2215 = vmatprep.subr.bf16.mxu0 %v3817_v55  ;;  %2256 = vmatprep.subr.bf16.mxu1 %v3822_v58 }
 0xc53   : > { %2216 = vmatpush1.bf16.msra.mxu0 %v3827_v60  ;;  %2257 = vmatpush1.bf16.msra.mxu1 %v3832_v62 }
 0xc54   : > { %2320 = vmatprep.subr.bf16.mxu0 %v3678_v42  ;;  %2361 = vmatprep.subr.bf16.mxu1 %v3690_v7 }
 0xd09   : > { %v2116_v61 = vpop.f32.mrb[16].mxu0  ;;  %v2157_v63 = vpop.f32.mrb[16].mxu1 }
 0xd0a   : > { %v2164_v1 = vadd.f32 %v2116_v61, %v2076_v54  ;;  %v2118_v3 = vpop.f32.mrb[17].mxu0  ;;  %v2159_v4 = vpop.f32.mrb[17].mxu1  ;;  %v2166_v29 = vadd.f32 %v2157_v63, %v2078_v2 }
 0xd0b   : > { %v2165_v19 = vadd.f32 %v2118_v3, %v2077_v57  ;;  %v2120_v20 = vpop.f32.mrb[18].mxu0  ;;  %v2161_v12 = vpop.f32.mrb[18].mxu1  ;;  %v2167_v27 = vadd.f32 %v2159_v4, %v2079_v49  ;;  %v2778_v3 = vld [vmem:[%s3224_s8 + $0x28] sm:$0xff] }
 0xd0c   : > { %v2168_v24 = vmul.f32 0.5, %v2164_v1  ;;  %v2121_v14 = vpop.f32.mrb[19].mxu0  ;;  %v2162_v16 = vpop.f32.mrb[19].mxu1 }
 0xd0d   : > { %v2172_v59 = vmul.f32 0.5, %v2165_v19  ;;  %v2177_v47 = vmul.f32 0.5, %v2167_v27 }
 0xd0e   : > { %2951 = vtanh.f32 %v2168_v24  ;;  %v2197_v24 = vunpack.c.l.bf16 %v2778_v3 }
 0xd0f   : > { %2953 = vtanh.f32 %v2172_v59 }
 0xd10   : > { %2955 = vtanh.f32 %v2166_v29 }
 0xd11   : > { %2957 = vtanh.f32 %v2177_v47 }
 0xd18   : > { %v2952_v31 = vpop.eup %2951 }
 0xd19   : > { %v2954_v25 = vpop.eup %2953  ;;  %v2170_v35 = vmul.f32 0.5, %v2952_v31 }
 0xd1a   : > { %v2174_v39 = vmul.f32 0.5, %v2954_v25  ;;  %v2956_v33 = vpop.eup %2955 }
 0xd1b   : > { %v2171_v40 = vadd.f32 0.5, %v2170_v35  ;;  %v2958_v54 = vpop.eup %2957 }
 0xd1c   : > { %v2175_v26 = vadd.f32 0.5, %v2174_v39  ;;  %v2179_v56 = vmul.f32 0.5, %v2958_v54 }
 0xd1d   : > { %v2183_v48 = vmul.f32 %v2956_v33, %v2171_v40 }
 0xd1e   : > { %v2182_v53 = vmul.f32 %v2175_v26, %v3999_v11  ;;  %v2180_v57 = vadd.f32 0.5, %v2179_v56  ;;  %v2777_v11 = vld [vmem:[%s3224_s8 + $0x20] sm:$0xff] }
 0xd1f   : > { %v2195_v2 = vunpack.c.l.bf16 %v2777_v11  ;;  %v2196_v4 = vunpack.c.h.bf16 %v2777_v11 }
 0xd20   : > { %v4040_v0 = vadd.f32 %v2183_v48, %v2182_v53 }
 0xd22   : > { %2959 = vtanh.f32 %v4040_v0 }
 0xd2c   : > { %v2960_v61 = vpop.eup %2959 }
 0xd2d   : > { %v2186_v63 = vmul.f32 %v2960_v61, %v2180_v57 }
 0xd2f   : > { %v2189_v1 = vpack.c.bf16 %v2186_v63, %v2186_v63 }
 0xd31   : > { %2776 = vst [vmem:[%s3125_s7 + $0xc] sm:$0xf] %v2189_v1  ;;  %2234 = vmatmul.mubr.bf16.vlgmr.msra.gmra.mrb[20].mxu0 %v2189_v1  ;;  %2275 = vmatmul.mubr.bf16.vlgmr.msra.gmra.mrb[20].mxu1 %v2189_v1 }
 0xd32   : > { %2321 = vmatpush1.bf16.msra.mxu0 %v3682_v5  ;;  %2362 = vmatpush1.bf16.msra.mxu1 %v3694_v8 }
 0xd33   : > { %2322 = vmatprep.subr.bf16.mxu0 %v3686_v6  ;;  %2363 = vmatprep.subr.bf16.mxu1 %v3698_v9 }
 0xd34   : > { %2352 = vmatprep.mubr.bf16.mxu0 %v3033_v21  ;;  %2393 = vmatprep.mubr.bf16.mxu1 %v3033_v21 }
 0xd36   : > { %2323 = vmatpush1.bf16.msra.mxu0 %v3705_v17  ;;  %2364 = vmatpush1.bf16.msra.mxu1 %v3710_v18 }
 0xd37   : > { %2324 = vmatprep.subr.bf16.mxu0 %v3715_v10  ;;  %2365 = vmatprep.subr.bf16.mxu1 %v3720_v13 }
 0xd3a   : > { %2325 = vmatpush1.bf16.msra.mxu0 %v3727_v22  ;;  %2366 = vmatpush1.bf16.msra.mxu1 %v3732_v23 }
 0xd3b   : > { %2326 = vmatprep.subr.bf16.mxu0 %v3737_v15  ;;  %2367 = vmatprep.subr.bf16.mxu1 %v3742_v45 }
 0xd3e   : > { %2327 = vmatpush1.bf16.msra.mxu0 %v3747_v34  ;;  %2368 = vmatpush1.bf16.msra.mxu1 %v3752_v32 }
 0xd3f   : > { %2328 = vmatprep.subr.bf16.mxu0 %v3757_v52  ;;  %2369 = vmatprep.subr.bf16.mxu1 %v3762_v36 }
 0xd42   : > { %2329 = vmatpush1.bf16.msra.mxu0 %v3767_v30  ;;  %2370 = vmatpush1.bf16.msra.mxu1 %v3772_v38 }
 0xd43   : > { %2330 = vmatprep.subr.bf16.mxu0 %v3777_v41  ;;  %2371 = vmatprep.subr.bf16.mxu1 %v3782_v43 }
 0xd46   : > { %2331 = vmatpush1.bf16.msra.mxu0 %v3787_v37  ;;  %2372 = vmatpush1.bf16.msra.mxu1 %v3792_v28 }
 0xd47   : > { %2332 = vmatprep.subr.bf16.mxu0 %v3797_v44  ;;  %2373 = vmatprep.subr.bf16.mxu1 %v3802_v46 }
 0xd4a   : > { %2333 = vmatpush1.bf16.msra.mxu0 %v3807_v50  ;;  %2374 = vmatpush1.bf16.msra.mxu1 %v3812_v51 }
 0xd4b   : > { %2334 = vmatprep.subr.bf16.mxu0 %v3817_v55  ;;  %2375 = vmatprep.subr.bf16.mxu1 %v3822_v58 }
 0xd4e   : > { %2335 = vmatpush1.bf16.msra.mxu0 %v3827_v60  ;;  %2376 = vmatpush1.bf16.msra.mxu1 %v3832_v62 }
 0xd4f   : > { %2438 = vmatprep.subr.bf16.mxu0 %v3678_v42  ;;  %2479 = vmatprep.subr.bf16.mxu1 %v3690_v7  ;;  %v2198_v7 = vunpack.c.h.bf16 %v2778_v3 }
 0xe04   : > { %v2235_v19 = vpop.f32.mrb[20].mxu0  ;;  %v2276_v20 = vpop.f32.mrb[20].mxu1 }
 0xe05   : > { %v2283_v12 = vadd.f32 %v2235_v19, %v2195_v2  ;;  %v2237_v14 = vpop.f32.mrb[21].mxu0  ;;  %v2278_v16 = vpop.f32.mrb[21].mxu1  ;;  %v2285_v42 = vadd.f32 %v2276_v20, %v2197_v24 }
 0xe06   : > { %v2284_v59 = vadd.f32 %v2237_v14, %v2196_v4  ;;  %v2239_v29 = vpop.f32.mrb[22].mxu0  ;;  %v2280_v49 = vpop.f32.mrb[22].mxu1  ;;  %v2286_v35 = vadd.f32 %v2278_v16, %v2198_v7 }
 0xe07   : > { %v2287_v27 = vmul.f32 0.5, %v2283_v12  ;;  %v2240_v47 = vpop.f32.mrb[23].mxu0  ;;  %v2281_v31 = vpop.f32.mrb[23].mxu1  ;;  %v2431_v49 = vld [vmem:[%s3224_s8 + $0x8] sm:$0xff] }
 0xe08   : > { %v2291_v25 = vmul.f32 0.5, %v2284_v59  ;;  %v2296_v39 = vmul.f32 0.5, %v2286_v35  ;;  %v2430_v59 = vld [vmem:[%s3224_s8] sm:$0xff] }
 0xe09   : > { %2961 = vtanh.f32 %v2287_v27  ;;  %v2432_v29 = vunpack.c.l.bf16 %v2430_v59  ;;  %v2433_v27 = vunpack.c.h.bf16 %v2430_v59 }
 0xe0a   : > { %2963 = vtanh.f32 %v2291_v25 }
 0xe0b   : > { %2965 = vtanh.f32 %v2285_v42  ;;  %v2434_v42 = vunpack.c.l.bf16 %v2431_v49 }
 0xe0c   : > { %2967 = vtanh.f32 %v2296_v39 }
 0xe13   : > { %v2962_v40 = vpop.eup %2961 }
 0xe14   : > { %v2964_v33 = vpop.eup %2963  ;;  %v2289_v26 = vmul.f32 0.5, %v2962_v40 }
 0xe15   : > { %v2293_v48 = vmul.f32 0.5, %v2964_v33  ;;  %v2966_v54 = vpop.eup %2965 }
 0xe16   : > { %v2290_v53 = vadd.f32 0.5, %v2289_v26  ;;  %v2968_v1 = vpop.eup %2967 }
 0xe17   : > { %v2294_v56 = vadd.f32 0.5, %v2293_v48  ;;  %v2298_v11 = vmul.f32 0.5, %v2968_v1 }
 0xe18   : > { %v2302_v57 = vmul.f32 %v2966_v54, %v2290_v53 }
 0xe19   : > { %v2301_v61 = vmul.f32 %v2294_v56, %v4040_v0  ;;  %v2299_v2 = vadd.f32 0.5, %v2298_v11 }
 0xe1b   : > { %v4081_v63 = vadd.f32 %v2302_v57, %v2301_v61  ;;  %v2435_v57 = vunpack.c.h.bf16 %v2431_v49 }
 0xe1d   : > { %2969 = vtanh.f32 %v4081_v63 }
 0xe27   : > { %v2970_v3 = vpop.eup %2969 }
 0xe28   : > { %v2305_v4 = vmul.f32 %v2970_v3, %v2299_v2 }
 0xe2a   : > { %v2308_v19 = vpack.c.bf16 %v2305_v4, %v2305_v4 }
 0xe2c   : > { %2779 = vst [vmem:[%s3125_s7 + $0x8] sm:$0xf] %v2308_v19  ;;  %2353 = vmatmul.mubr.bf16.vlgmr.msra.gmra.mrb[24].mxu0 %v2308_v19  ;;  %2394 = vmatmul.mubr.bf16.vlgmr.msra.gmra.mrb[24].mxu1 %v2308_v19 }
 0xe2d   : > { %2439 = vmatpush1.bf16.msra.mxu0 %v3682_v5  ;;  %2480 = vmatpush1.bf16.msra.mxu1 %v3694_v8  ;;  %v2780_v5 = vld [vmem:[%s3224_s8 + $0x10] sm:$0xff]  ;;  %v2781_v8 = vld [vmem:[%s3224_s8 + $0x18] sm:$0xff] }
 0xe2e   : > { %2440 = vmatprep.subr.bf16.mxu0 %v3686_v6  ;;  %2481 = vmatprep.subr.bf16.mxu1 %v3698_v9  ;;  %v2314_v6 = vunpack.c.l.bf16 %v2780_v5  ;;  %v2315_v9 = vunpack.c.h.bf16 %v2780_v5 }
 0xe2f   : > { %2470 = vmatprep.mubr.bf16.mxu0 %v3033_v21  ;;  %2511 = vmatprep.mubr.bf16.mxu1 %v3033_v21 }
 0xe31   : > { %2441 = vmatpush1.bf16.msra.mxu0 %v3705_v17  ;;  %2482 = vmatpush1.bf16.msra.mxu1 %v3710_v18 }
 0xe32   : > { %2442 = vmatprep.subr.bf16.mxu0 %v3715_v10  ;;  %2483 = vmatprep.subr.bf16.mxu1 %v3720_v13  ;;  %v2316_v13 = vunpack.c.l.bf16 %v2781_v8 }
 0xe35   : > { %2443 = vmatpush1.bf16.msra.mxu0 %v3727_v22  ;;  %2484 = vmatpush1.bf16.msra.mxu1 %v3732_v23 }
 0xe36   : > { %2444 = vmatprep.subr.bf16.mxu0 %v3737_v15  ;;  %2485 = vmatprep.subr.bf16.mxu1 %v3742_v45 }
 0xe39   : > { %2445 = vmatpush1.bf16.msra.mxu0 %v3747_v34  ;;  %2486 = vmatpush1.bf16.msra.mxu1 %v3752_v32 }
 0xe3a   : > { %2446 = vmatprep.subr.bf16.mxu0 %v3757_v52  ;;  %2487 = vmatprep.subr.bf16.mxu1 %v3762_v36 }
 0xe3d   : > { %2447 = vmatpush1.bf16.msra.mxu0 %v3767_v30  ;;  %2488 = vmatpush1.bf16.msra.mxu1 %v3772_v38  ;;  %v2317_v38 = vunpack.c.h.bf16 %v2781_v8 }
 0xe3e   : > { %2448 = vmatprep.subr.bf16.mxu0 %v3777_v41  ;;  %2489 = vmatprep.subr.bf16.mxu1 %v3782_v43 }
 0xe41   : > { %2449 = vmatpush1.bf16.msra.mxu0 %v3787_v37  ;;  %2490 = vmatpush1.bf16.msra.mxu1 %v3792_v28 }
 0xe42   : > { %2450 = vmatprep.subr.bf16.mxu0 %v3797_v44  ;;  %2491 = vmatprep.subr.bf16.mxu1 %v3802_v46 }
 0xe45   : > { %2451 = vmatpush1.bf16.msra.mxu0 %v3807_v50  ;;  %2492 = vmatpush1.bf16.msra.mxu1 %v3812_v51 }
 0xe46   : > { %2452 = vmatprep.subr.bf16.mxu0 %v3817_v55  ;;  %2493 = vmatprep.subr.bf16.mxu1 %v3822_v58 }
 0xe49   : > { %2453 = vmatpush1.bf16.msra.mxu0 %v3827_v60  ;;  %2494 = vmatpush1.bf16.msra.mxu1 %v3832_v62 }
 0xeff   : > { %v2354_v17 = vpop.f32.mrb[24].mxu0  ;;  %v2395_v18 = vpop.f32.mrb[24].mxu1 }
 0xf00   : > { %v2402_v10 = vadd.f32 %v2354_v17, %v2314_v6  ;;  %v2356_v21 = vpop.f32.mrb[25].mxu0  ;;  %v2397_v22 = vpop.f32.mrb[25].mxu1  ;;  %v2404_v30 = vadd.f32 %v2395_v18, %v2316_v13 }
 0xf01   : > { %v2403_v23 = vadd.f32 %v2356_v21, %v2315_v9  ;;  %v2358_v15 = vpop.f32.mrb[26].mxu0  ;;  %v2399_v45 = vpop.f32.mrb[26].mxu1  ;;  %v2405_v41 = vadd.f32 %v2397_v22, %v2317_v38 }
 0xf02   : > { %v2406_v34 = vmul.f32 0.5, %v2402_v10  ;;  %v2359_v32 = vpop.f32.mrb[27].mxu0  ;;  %v2400_v52 = vpop.f32.mrb[27].mxu1 }
 0xf03   : > { %v2410_v36 = vmul.f32 0.5, %v2403_v23  ;;  %v2415_v43 = vmul.f32 0.5, %v2405_v41 }
 0xf04   : > { %2971 = vtanh.f32 %v2406_v34 }
 0xf05   : > { %2973 = vtanh.f32 %v2410_v36 }
 0xf06   : > { %2975 = vtanh.f32 %v2404_v30 }
 0xf07   : > { %2977 = vtanh.f32 %v2415_v43 }
 0xf0e   : > { %v2972_v37 = vpop.eup %2971 }
 0xf0f   : > { %v2974_v28 = vpop.eup %2973  ;;  %v2408_v44 = vmul.f32 0.5, %v2972_v37 }
 0xf10   : > { %v2412_v46 = vmul.f32 0.5, %v2974_v28  ;;  %v2976_v51 = vpop.eup %2975 }
 0xf11   : > { %v2409_v50 = vadd.f32 0.5, %v2408_v44  ;;  %v2978_v0 = vpop.eup %2977 }
 0xf12   : > { %v2413_v55 = vadd.f32 0.5, %v2412_v46  ;;  %v2417_v20 = vmul.f32 0.5, %v2978_v0 }
 0xf13   : > { %v2421_v58 = vmul.f32 %v2976_v51, %v2409_v50 }
 0xf14   : > { %v2420_v60 = vmul.f32 %v2413_v55, %v4081_v63  ;;  %v2418_v12 = vadd.f32 0.5, %v2417_v20 }
 0xf16   : > { %v2422_v62 = vadd.f32 %v2421_v58, %v2420_v60 }
 0xf18   : > { %2979 = vtanh.f32 %v2422_v62 }
 0xf22   : > { %v2980_v24 = vpop.eup %2979 }
 0xf23   : > { %v2424_v14 = vmul.f32 %v2980_v24, %v2418_v12 }
 0xf25   : > { %v2427_v16 = vpack.c.bf16 %v2424_v14, %v2424_v14 }
 0xf27   : > { %2782 = vst [vmem:[%s3125_s7 + $0x4] sm:$0xf] %v2427_v16  ;;  %2471 = vmatmul.mubr.bf16.vlgmr.msra.gmra.mrb[28].mxu0 %v2427_v16  ;;  %2512 = vmatmul.mubr.bf16.vlgmr.msra.gmra.mrb[28].mxu1 %v2427_v16 }
 0xffa   : > { %v2472_v47 = vpop.f32.mrb[28].mxu0  ;;  %v2513_v31 = vpop.f32.mrb[28].mxu1 }
 0xffb   : > { %v2520_v25 = vadd.f32 %v2472_v47, %v2432_v29  ;;  %v2474_v7 = vpop.f32.mrb[29].mxu0  ;;  %v2515_v35 = vpop.f32.mrb[29].mxu1  ;;  %v2522_v56 = vadd.f32 %v2513_v31, %v2434_v42 }
 0xffc   : > { %v2521_v39 = vadd.f32 %v2474_v7, %v2433_v27  ;;  %v2476_v40 = vpop.f32.mrb[30].mxu0  ;;  %v2517_v33 = vpop.f32.mrb[30].mxu1  ;;  %v2523_v61 = vadd.f32 %v2515_v35, %v2435_v57 }
 0xffd   : > { %v2524_v26 = vmul.f32 0.5, %v2520_v25  ;;  %v2477_v48 = vpop.f32.mrb[31].mxu0  ;;  %v2518_v53 = vpop.f32.mrb[31].mxu1 }
 0xffe   : > { %v2528_v54 = vmul.f32 0.5, %v2521_v39  ;;  %v2533_v63 = vmul.f32 0.5, %v2523_v61 }
 0xfff   : > { %2981 = vtanh.f32 %v2524_v26 }
0x1000   : > { %2983 = vtanh.f32 %v2528_v54 }
0x1001   : > { %2985 = vtanh.f32 %v2522_v56 }
0x1002   : > { %2987 = vtanh.f32 %v2533_v63 }
0x1009   : > { %v2982_v1 = vpop.eup %2981 }
0x100a   : > { %v2984_v11 = vpop.eup %2983  ;;  %v2526_v2 = vmul.f32 0.5, %v2982_v1 }
0x100b   : > { %v2530_v3 = vmul.f32 0.5, %v2984_v11  ;;  %v2986_v19 = vpop.eup %2985 }
0x100c   : > { %v2527_v4 = vadd.f32 0.5, %v2526_v2  ;;  %v2988_v17 = vpop.eup %2987 }
0x100d   : > { %v2531_v5 = vadd.f32 0.5, %v2530_v3  ;;  %v2535_v18 = vmul.f32 0.5, %v2988_v17 }
0x100e   : > { %v2539_v6 = vmul.f32 %v2986_v19, %v2527_v4 }
0x100f   : > { %v2538_v8 = vmul.f32 %v2531_v5, %v2422_v62  ;;  %v2536_v10 = vadd.f32 0.5, %v2535_v18 }
0x1011   : > { %v2540_v9 = vadd.f32 %v2539_v6, %v2538_v8 }
0x1013   : > { %2989 = vtanh.f32 %v2540_v9  ;;  %2543 = vst [vmem:[#allocation3] sm:$0xff] %v2540_v9 }
0x101d   : > { %v2990_v13 = vpop.eup %2989 }
0x101e   : > { %v2542_v21 = vmul.f32 %v2990_v13, %v2536_v10 }
0x1020   : > { %2544 = vst [vmem:[#allocation2] sm:$0xff] %v2542_v21  ;;  %v2545_v22 = vpack.c.bf16 %v2542_v21, %v2542_v21 }
0x1022   : > { %2546 = vst [vmem:[%s3125_s7] sm:$0xf] %v2545_v22 }
0x1023 PF: > { %s12_s13 = sadd.s32 1, %s3029_s13   ;;  %s4241_s9 = smov %s3017_s10 }
0x1024   : > { %p9_p12 = scmp.ge.s32.totalorder %s12_s13, 4   ;;  %s4242_s10 = smov %s3084_s17 }
0x1025   : > { %s4243_s11 = smov %s3025_s12  ;;  %s4244_s12 = smov %s4246_s14 }
0x1026   :  { %11 = sbr.rel (!%p9_p12) target bundleno = 3 (0x3), region = 129 }

</bundles_post_ra>
